<compile_context>
chip_gen: v7x
topology: tpu7x:2x2x1
jax: 0.10.0
libtpu: 0.0.40
codegen_flags: <defaults>
</compile_context>

<pallas_src>
import jax
import jax.numpy as jnp
from jax import lax
from jax.experimental import pallas as pl
from jax.experimental.pallas import tpu as pltpu


# ----------------------------------------------------------------------------
# tiling / VMEM heuristics
# ----------------------------------------------------------------------------
def _vmem_limit_bytes(need_bytes):
    """Per-generation VMEM limit: 2x the static need, clamped to 3/4 capacity."""
    cap = 64 * 1024 * 1024
    try:
        cap = int(getattr(pltpu.get_tpu_info(), "vmem_capacity_bytes", cap))
    except Exception:
        pass
    want = max(16 * 1024 * 1024, 2 * int(need_bytes))
    return int(min(want, cap * 3 // 4))


def _pick_row_tile(ho, wo, cout):
    """Output rows per grid step: target M = th*Wo ~ 256 MXU rows, capped so the
    (th*Wo, Cout) f32 register accumulator stays well inside the vreg file."""
    th = max(1, min(ho, max(1, 256 // max(wo, 1))))
    max_acc_rows = max(8, (128 * 1024) // (4 * max(cout, 1)))
    while th > 1 and th * wo > max_acc_rows:
        th -= 1
    return th


# ----------------------------------------------------------------------------
# Pallas kernel: stride-1 implicit-GEMM conv + folded-BN bias + LeakyReLU
# ----------------------------------------------------------------------------
def _make_conv_kernel(*, taps, pads, n_in, th, ho, wo, cout, neg_slope=0.01):
    """Stride-1 conv with tap offsets `taps` over a virtual channel concat.

    Kernel refs (in order):
      x_refs[i]  : (Hi, Wi, Ci)        activation (batch dim squeezed)
      w_refs[i]  : (n_taps, Ci, Cout)  bf16 weight taps, BN scale folded in
      bias_ref   : (1, Cout)           f32 folded BN bias
      o_ref      : (th*Wo, Cout)       output row-band (spatially flattened)
      pad_refs   : one (Hp, Wp, Ci) bf16 VMEM scratch per input with pads[i]=True
    """

    def kernel(*refs):
        x_refs = refs[:n_in]
        w_refs = refs[n_in:2 * n_in]
        bias_ref = refs[2 * n_in]
        o_ref = refs[2 * n_in + 1]
        pad_refs = refs[2 * n_in + 2:]

        row0 = pl.program_id(1) * th

        # In-kernel zero padding (pad=1): build the 1-element halo in a bf16 VMEM
        # scratch instead of a jnp.pad HBM round trip in the wrapper.
        srcs = []
        si = 0
        for i in range(n_in):
            if pads[i]:
                sc = pad_refs[si]
                si += 1
                sc[...] = jnp.zeros(sc.shape, sc.dtype)
                sc[1:1 + ho, 1:1 + wo, :] = x_refs[i][...].astype(sc.dtype)
                srcs.append(sc)
            else:
                srcs.append(x_refs[i])

        bias = bias_ref[...]                                     # (1, Cout) f32
        acc = jnp.zeros((th * wo, cout), jnp.float32)
        # One MXU dot per (tap, input) with M = th*Wo rows (batched rows).
        for t, (dh, dw) in enumerate(taps):
            for i in range(n_in):
                tap = srcs[i][pl.ds(row0 + dh, th), pl.ds(dw, wo), :]
                tap = tap.reshape(th * wo, tap.shape[-1])
                acc = acc + jnp.dot(tap, w_refs[i][t],
                                    preferred_element_type=jnp.float32)
        y = acc + bias                                           # single hoisted add
        y = jnp.where(y >= 0, y, jnp.float32(neg_slope) * y)     # LeakyReLU(0.01)
        o_ref[...] = y.astype(o_ref.dtype)

    return kernel


def _fused_conv_bn_lrelu(inputs, weights, bias, *, taps, pads, ho, wo, out_dtype):
    """Stride-1 conv (tap list `taps`) over the virtual channel concat of `inputs`,
    fused with the folded-BN bias and LeakyReLU(0.01).

    inputs[i]: (N, Hi, Wi, Ci) NHWC.
      pads[i] True : Hi == ho, Wi == wo; a 1-element zero halo is added in-kernel.
      pads[i] False: halo already baked in: Hi >= ho + max_dh, Wi == wo + max_dw.
    weights[i]: (n_taps, Ci, Cout), BN scale folded in.
    bias: (Cout,) folded BN bias.  Returns (N, ho, wo, Cout) in out_dtype.
    """
    n = inputs[0].shape[0]
    n_in = len(inputs)
    cout = int(weights[0].shape[-1])
    dh_max = max(t[0] for t in taps)
    dw_max = max(t[1] for t in taps)

    th = _pick_row_tile(ho, wo, cout)
    n_rt = int(pl.cdiv(ho, th))
    ho_pad = n_rt * th            # over-allocated rows, sliced off afterwards

    xs = []
    for x, p in zip(inputs, pads):
        if p:
            assert x.shape[1] == ho and x.shape[2] == wo
        else:
            assert x.shape[2] == wo + dw_max
            need_rows = ho_pad + dh_max
            if x.shape[1] < need_rows:
                x = jnp.pad(x, ((0, 0), (0, need_rows - x.shape[1]),
                                (0, 0), (0, 0)))
            x = x.astype(jnp.bfloat16)
        xs.append(x)
    ws = [w.astype(jnp.bfloat16) for w in weights]
    bias2d = bias.astype(jnp.float32).reshape(1, cout)

    kernel = _make_conv_kernel(taps=taps, pads=pads, n_in=n_in, th=th,
                               ho=ho, wo=wo, cout=cout)

    in_specs = []
    for x in xs:
        in_specs.append(pl.BlockSpec((None,) + tuple(x.shape[1:]),
                                     lambda b, r: (b, 0, 0, 0)))
    for w in ws:
        in_specs.append(pl.BlockSpec(tuple(w.shape), lambda b, r: (0, 0, 0)))
    in_specs.append(pl.BlockSpec((1, cout), lambda b, r: (0, 0)))

    out_specs = pl.BlockSpec((None, th * wo, cout), lambda b, r: (b, r, 0))
    out_shape = jax.ShapeDtypeStruct((n, ho_pad * wo, cout), out_dtype)

    scratch_shapes = [
        pltpu.VMEM((ho_pad + 2, wo + 2, int(x.shape[-1])), jnp.bfloat16)
        for x, p in zip(xs, pads) if p
    ]

    flops = 2 * n * ho * wo * cout * sum(int(w.shape[0]) * int(w.shape[1])
                                         for w in ws)
    bytes_accessed = (sum(int(x.size) * x.dtype.itemsize for x in xs)
                      + sum(int(w.size) * 2 for w in ws) + cout * 4
                      + n * ho_pad * wo * cout * jnp.dtype(out_dtype).itemsize)
    vmem_need = (sum(2 * (int(x.size) // n) * x.dtype.itemsize for x in xs)
                 + sum(2 * int(w.size) * 2 for w in ws) + 2 * cout * 4
                 + 2 * th * wo * cout * jnp.dtype(out_dtype).itemsize
                 + sum((ho_pad + 2) * (wo + 2) * int(x.shape[-1]) * 2
                       for x, p in zip(xs, pads) if p))

    out = pl.pallas_call(
        kernel,
        out_shape=out_shape,
        grid_spec=pltpu.PrefetchScalarGridSpec(
            num_scalar_prefetch=0,
            grid=(n, n_rt),
            in_specs=in_specs,
            out_specs=out_specs,
            scratch_shapes=scratch_shapes),
        compiler_params=pltpu.CompilerParams(
            dimension_semantics=("parallel", "parallel"),
            vmem_limit_bytes=_vmem_limit_bytes(vmem_need)),
        cost_estimate=pl.CostEstimate(flops=int(flops), transcendentals=0,
                                      bytes_accessed=int(bytes_accessed)),
    )(*xs, *ws, bias2d)

    return out[:, :ho * wo, :].reshape(n, ho, wo, cout)


# ----------------------------------------------------------------------------
# space-to-depth rewrite of the stride-2 conv1 (wrapper-side, trace time)
# ----------------------------------------------------------------------------
def _space_to_depth_pad1(x):
    """Zero-pad H, W by 1 then 2x2 space-to-depth; channels ordered
    (row-phase, col-phase, C)."""
    n, h, w, c = x.shape
    xp = jnp.pad(x, ((0, 0), (1, 1), (1, 1), (0, 0)))
    hp, wp = h + 2, w + 2
    if hp % 2:
        xp = jnp.pad(xp, ((0, 0), (0, 1), (0, 0), (0, 0)))
        hp += 1
    if wp % 2:
        xp = jnp.pad(xp, ((0, 0), (0, 0), (0, 1), (0, 0)))
        wp += 1
    xs = xp.reshape(n, hp // 2, 2, wp // 2, 2, c)
    xs = xs.transpose(0, 1, 3, 2, 4, 5).reshape(n, hp // 2, wp // 2, 4 * c)
    return xs


def _s2d_fold_weights(w):
    """Fold a (3,3,Cin,Cout) stride-2 kernel into 2x2 taps over space-to-depth
    channels.  Returns (4, 4*Cin, Cout), taps ordered [(0,0),(0,1),(1,0),(1,1)]."""
    _, _, cin, cout = w.shape
    taps = []
    for dp in range(2):
        for dq in range(2):
            blocks = []
            for a in range(2):
                for b in range(2):
                    kh, kw = 2 * dp + a, 2 * dq + b
                    if kh < 3 and kw < 3:
                        blocks.append(w[kh, kw])
                    else:
                        blocks.append(jnp.zeros((cin, cout), w.dtype))
            taps.append(jnp.concatenate(blocks, axis=0))
    return jnp.stack(taps, axis=0)


# ----------------------------------------------------------------------------
# Plain-JAX glue: PyTorch-convention nearest resize (only if shapes differ)
# ----------------------------------------------------------------------------
def _nearest_resize_nhwc(x, out_h, out_w):
    # TODO(synk): gather glue, not a Pallas kernel. PyTorch F.interpolate 'nearest'
    #             rounding: src_idx = floor(dst_idx * in / out).
    _, h, w, _ = x.shape
    ridx = (jnp.arange(out_h) * h // out_h).astype(jnp.int32)
    cidx = (jnp.arange(out_w) * w // out_w).astype(jnp.int32)
    return jnp.take(jnp.take(x, ridx, axis=1), cidx, axis=2)


# ----------------------------------------------------------------------------
# Conv2x forward
# ----------------------------------------------------------------------------
def conv2x_forward(x_nhwc, rem_nhwc, params, *, eps=1e-5):
    # conv1: 3x3 stride-2 pad-1 + folded eval-mode BN + LeakyReLU, executed as a
    # 2x2 stride-1 conv over the space-to-depth input (dense loads, 4x K).
    s1 = params["g1"] * lax.rsqrt(params["v1"] + eps)
    w1 = params["w1"] * s1                       # fold BN scale into weight columns
    b1 = params["b1"] - params["m1"] * s1

    _, h, w, _ = x_nhwc.shape
    ho1 = (h - 1) // 2 + 1
    wo1 = (w - 1) // 2 + 1
    xs1 = _space_to_depth_pad1(x_nhwc.astype(jnp.bfloat16))
    w1s = _s2d_fold_weights(w1)
    taps1 = [(0, 0), (0, 1), (1, 0), (1, 1)]
    x1 = _fused_conv_bn_lrelu([xs1], [w1s], b1, taps=taps1, pads=(False,),
                              ho=ho1, wo=wo1, out_dtype=jnp.bfloat16)

    # nearest resize to rem's spatial size if shapes differ
    if x1.shape[1:3] != rem_nhwc.shape[1:3]:
        x1 = _nearest_resize_nhwc(x1, rem_nhwc.shape[1], rem_nhwc.shape[2])

    # conv2: 3x3 stride-1 pad-1 over the *virtual* concat([x1, rem]).  The concat
    # is never materialized: W2 is split and both halves accumulate into the same
    # register accumulator; padding + bf16 cast of rem happen inside the kernel.
    s2 = params["g2"] * lax.rsqrt(params["v2"] + eps)
    w2 = params["w2"] * s2
    b2 = params["b2"] - params["m2"] * s2
    c1 = x1.shape[-1]
    cout2 = w2.shape[-1]
    w2a = w2[:, :, :c1, :].reshape(9, c1, cout2)
    w2b = w2[:, :, c1:, :].reshape(9, w2.shape[2] - c1, cout2)
    taps2 = [(dh, dw) for dh in range(3) for dw in range(3)]
    ho2, wo2 = rem_nhwc.shape[1], rem_nhwc.shape[2]
    out = _fused_conv_bn_lrelu([x1, rem_nhwc], [w2a, w2b], b2, taps=taps2,
                               pads=(True, True), ho=ho2, wo=wo2,
                               out_dtype=jnp.float32)
    return out


def init_params(key, in_channels, out_channels):
    """Deterministic synthetic parameters matching Conv2x(in, out) default config."""
    k1, k2, k3, k4 = jax.random.split(key, 4)
    c2_in = out_channels * 2          # concat=True
    c2_out = out_channels * 2         # keep_concat=True -> mul=2
    return {
        "w1": 0.1 * jax.random.normal(k1, (3, 3, in_channels, out_channels),
                                      jnp.float32),
        "g1": 1.0 + 0.1 * jax.random.normal(k2, (out_channels,), jnp.float32),
        "b1": 0.05 * jnp.arange(out_channels, dtype=jnp.float32),
        "m1": 0.01 * jnp.arange(out_channels, dtype=jnp.float32),
        "v1": jnp.ones((out_channels,), jnp.float32),
        "w2": 0.1 * jax.random.normal(k3, (3, 3, c2_in, c2_out), jnp.float32),
        "g2": 1.0 + 0.1 * jax.random.normal(k4, (c2_out,), jnp.float32),
        "b2": 0.02 * jnp.arange(c2_out, dtype=jnp.float32),
        "m2": jnp.zeros((c2_out,), jnp.float32),
        "v2": jnp.ones((c2_out,), jnp.float32),
    }


# ----------------------------------------------------------------------------
# pure-JAX reference (same bf16 casts) for a relaxed-tolerance check
# ----------------------------------------------------------------------------
def _reference_forward(x, rem, params, eps=1e-5):
    def bc(z, w, g, b, m, v, stride):
        s = g * lax.rsqrt(v + eps)
        wf = (w * s).astype(jnp.bfloat16).astype(jnp.float32)
        bf = (b - m * s).astype(jnp.float32)
        zi = z.astype(jnp.bfloat16).astype(jnp.float32)
        y = lax.conv_general_dilated(zi, wf, window_strides=(stride, stride),
                                     padding=((1, 1), (1, 1)),
                                     dimension_numbers=("NHWC", "HWIO", "NHWC"))
        y = y + bf
        return jnp.where(y >= 0, y, 0.01 * y)

    y1 = bc(x, params["w1"], params["g1"], params["b1"], params["m1"],
            params["v1"], 2)
    y1 = y1.astype(jnp.bfloat16)
    if y1.shape[1:3] != rem.shape[1:3]:
        y1 = _nearest_resize_nhwc(y1, rem.shape[1], rem.shape[2])
    cat = jnp.concatenate([y1.astype(jnp.float32), rem], axis=-1)
    return bc(cat, params["w2"], params["g2"], params["b2"], params["m2"],
              params["v2"], 1)


if __name__ == "__main__":
    key = jax.random.PRNGKey(0)
    kx, kr, kp = jax.random.split(key, 3)

    batch, in_ch, out_ch, H, W = 2, 4, 8, 16, 16

    # PyTorch-style NCHW inputs ...
    x_nchw = jax.random.normal(kx, (batch, in_ch, H, W), jnp.float32)
    rem_nchw = jax.random.normal(kr, (batch, out_ch, H // 2, W // 2), jnp.float32)

    # ... transposed to the kernel's NHWC layout
    x_nhwc = jnp.transpose(x_nchw, (0, 2, 3, 1))
    rem_nhwc = jnp.transpose(rem_nchw, (0, 2, 3, 1))

    params = init_params(kp, in_ch, out_ch)

    fwd = jax.jit(conv2x_forward)
    out_nhwc = jax.block_until_ready(fwd(x_nhwc, rem_nhwc, params))

    # back to NCHW for shape check against PyTorch convention
    out_nchw = jnp.transpose(out_nhwc, (0, 3, 1, 2))
    assert out_nchw.shape == (batch, out_ch * 2, H // 2, W // 2), out_nchw.shape
    assert bool(jnp.all(jnp.isfinite(out_nchw)))

    # relaxed-tolerance check vs a pure-JAX (lax.conv) reference with matching casts
    ref_nhwc = _reference_forward(x_nhwc, rem_nhwc, params)
    max_err = float(jnp.max(jnp.abs(out_nhwc - ref_nhwc)))
    assert max_err < 3e-2, max_err

    print("KERNEL_OK")
</pallas_src>

<mosaic_0001>
module attributes {stable_mosaic.version = 11 : i64} {
  func.func @kernel(%arg0: i32, %arg1: i32, %arg2: memref<1x9x9x16xbf16, #tpu.memory_space<vmem>>, %arg3: memref<4x16x8xbf16, #tpu.memory_space<vmem>>, %arg4: memref<1x8xf32, #tpu.memory_space<vmem>>, %arg5: memref<1x64x8xbf16, #tpu.memory_space<vmem>>) attributes {dimension_semantics = [#tpu.dimension_semantics<parallel>, #tpu.dimension_semantics<parallel>], iteration_bounds = array<i64: 2, 1>, scalar_prefetch = 0 : i64, scratch_operands = 0 : i64, tpu.core_type = #tpu.core_type<tc>, window_params = [{transform_indices = @transform_0, window_bounds = array<i64: 1, 9, 9, 16>}, {pipeline_mode = #tpu.pipeline_mode<synchronous>, transform_indices = @transform_1, window_bounds = array<i64: 4, 16, 8>}, {pipeline_mode = #tpu.pipeline_mode<synchronous>, transform_indices = @transform_2, window_bounds = array<i64: 1, 8>}, {transform_indices = @transform_3, window_bounds = array<i64: 1, 64, 8>}]} {
    %c8_i32 = arith.constant 8 : i32
    %0 = arith.muli %arg1, %c8_i32 : i32
    %c0 = arith.constant 0 : index
    %c0_0 = arith.constant 0 : index
    %1 = vector.load %arg4[%c0, %c0_0] : memref<1x8xf32, #tpu.memory_space<vmem>>, vector<1x8xf32>
    %cst = arith.constant 0.000000e+00 : f32
    %2 = vector.broadcast %cst : f32 to vector<64x8xf32>
    %c0_i32 = arith.constant 0 : i32
    %3 = arith.addi %0, %c0_i32 : i32
    %c0_1 = arith.constant 0 : index
    %4 = arith.index_cast %3 : i32 to index
    %c0_2 = arith.constant 0 : index
    %c0_3 = arith.constant 0 : index
    %5 = vector.load %arg2[%c0_1, %4, %c0_2, %c0_3] : memref<1x9x9x16xbf16, #tpu.memory_space<vmem>>, vector<1x8x8x16xbf16>
    %6 = vector.shape_cast %5 : vector<1x8x8x16xbf16> to vector<8x8x16xbf16>
    %7 = vector.shape_cast %6 : vector<8x8x16xbf16> to vector<64x16xbf16>
    %c0_4 = arith.constant 0 : index
    %c0_5 = arith.constant 0 : index
    %c0_6 = arith.constant 0 : index
    %8 = vector.load %arg3[%c0_4, %c0_5, %c0_6] : memref<4x16x8xbf16, #tpu.memory_space<vmem>>, vector<1x16x8xbf16>
    %9 = vector.shape_cast %8 : vector<1x16x8xbf16> to vector<16x8xbf16>
    %cst_7 = arith.constant dense<0.000000e+00> : vector<64x8xf32>
    %10 = tpu.matmul %7, %9, %cst_7 {dimension_numbers = #tpu.dot_dimension_numbers<[1], [0], [0], [1], [0, 0, 1, 1], [], []>} : vector<64x16xbf16>, vector<16x8xbf16>, vector<64x8xf32> -> vector<64x8xf32>
    %11 = arith.addf %2, %10 : vector<64x8xf32>
    %c0_i32_8 = arith.constant 0 : i32
    %12 = arith.addi %0, %c0_i32_8 : i32
    %c0_9 = arith.constant 0 : index
    %13 = arith.index_cast %12 : i32 to index
    %c1 = arith.constant 1 : index
    %c0_10 = arith.constant 0 : index
    %14 = vector.load %arg2[%c0_9, %13, %c1, %c0_10] : memref<1x9x9x16xbf16, #tpu.memory_space<vmem>>, vector<1x8x8x16xbf16>
    %15 = vector.shape_cast %14 : vector<1x8x8x16xbf16> to vector<8x8x16xbf16>
    %16 = vector.shape_cast %15 : vector<8x8x16xbf16> to vector<64x16xbf16>
    %c1_11 = arith.constant 1 : index
    %c0_12 = arith.constant 0 : index
    %c0_13 = arith.constant 0 : index
    %17 = vector.load %arg3[%c1_11, %c0_12, %c0_13] : memref<4x16x8xbf16, #tpu.memory_space<vmem>>, vector<1x16x8xbf16>
    %18 = vector.shape_cast %17 : vector<1x16x8xbf16> to vector<16x8xbf16>
    %cst_14 = arith.constant dense<0.000000e+00> : vector<64x8xf32>
    %19 = tpu.matmul %16, %18, %cst_14 {dimension_numbers = #tpu.dot_dimension_numbers<[1], [0], [0], [1], [0, 0, 1, 1], [], []>} : vector<64x16xbf16>, vector<16x8xbf16>, vector<64x8xf32> -> vector<64x8xf32>
    %20 = arith.addf %11, %19 : vector<64x8xf32>
    %c1_i32 = arith.constant 1 : i32
    %21 = arith.addi %0, %c1_i32 : i32
    %c0_15 = arith.constant 0 : index
    %22 = arith.index_cast %21 : i32 to index
    %c0_16 = arith.constant 0 : index
    %c0_17 = arith.constant 0 : index
    %23 = vector.load %arg2[%c0_15, %22, %c0_16, %c0_17] : memref<1x9x9x16xbf16, #tpu.memory_space<vmem>>, vector<1x8x8x16xbf16>
    %24 = vector.shape_cast %23 : vector<1x8x8x16xbf16> to vector<8x8x16xbf16>
    %25 = vector.shape_cast %24 : vector<8x8x16xbf16> to vector<64x16xbf16>
    %c2 = arith.constant 2 : index
    %c0_18 = arith.constant 0 : index
    %c0_19 = arith.constant 0 : index
    %26 = vector.load %arg3[%c2, %c0_18, %c0_19] : memref<4x16x8xbf16, #tpu.memory_space<vmem>>, vector<1x16x8xbf16>
    %27 = vector.shape_cast %26 : vector<1x16x8xbf16> to vector<16x8xbf16>
    %cst_20 = arith.constant dense<0.000000e+00> : vector<64x8xf32>
    %28 = tpu.matmul %25, %27, %cst_20 {dimension_numbers = #tpu.dot_dimension_numbers<[1], [0], [0], [1], [0, 0, 1, 1], [], []>} : vector<64x16xbf16>, vector<16x8xbf16>, vector<64x8xf32> -> vector<64x8xf32>
    %29 = arith.addf %20, %28 : vector<64x8xf32>
    %c1_i32_21 = arith.constant 1 : i32
    %30 = arith.addi %0, %c1_i32_21 : i32
    %c0_22 = arith.constant 0 : index
    %31 = arith.index_cast %30 : i32 to index
    %c1_23 = arith.constant 1 : index
    %c0_24 = arith.constant 0 : index
    %32 = vector.load %arg2[%c0_22, %31, %c1_23, %c0_24] : memref<1x9x9x16xbf16, #tpu.memory_space<vmem>>, vector<1x8x8x16xbf16>
    %33 = vector.shape_cast %32 : vector<1x8x8x16xbf16> to vector<8x8x16xbf16>
    %34 = vector.shape_cast %33 : vector<8x8x16xbf16> to vector<64x16xbf16>
    %c3 = arith.constant 3 : index
    %c0_25 = arith.constant 0 : index
    %c0_26 = arith.constant 0 : index
    %35 = vector.load %arg3[%c3, %c0_25, %c0_26] : memref<4x16x8xbf16, #tpu.memory_space<vmem>>, vector<1x16x8xbf16>
    %36 = vector.shape_cast %35 : vector<1x16x8xbf16> to vector<16x8xbf16>
    %cst_27 = arith.constant dense<0.000000e+00> : vector<64x8xf32>
    %37 = tpu.matmul %34, %36, %cst_27 {dimension_numbers = #tpu.dot_dimension_numbers<[1], [0], [0], [1], [0, 0, 1, 1], [], []>} : vector<64x16xbf16>, vector<16x8xbf16>, vector<64x8xf32> -> vector<64x8xf32>
    %38 = arith.addf %29, %37 : vector<64x8xf32>
    %39 = vector.broadcast %1 : vector<1x8xf32> to vector<64x8xf32>
    %40 = arith.addf %38, %39 : vector<64x8xf32>
    %cst_28 = arith.constant 0.000000e+00 : f32
    %41 = vector.broadcast %cst_28 : f32 to vector<64x8xf32>
    %42 = arith.cmpf oge, %40, %41 : vector<64x8xf32>
    %cst_29 = arith.constant 0.00999999977 : f32
    %43 = vector.broadcast %cst_29 : f32 to vector<64x8xf32>
    %44 = arith.mulf %43, %40 : vector<64x8xf32>
    %45 = arith.select %42, %40, %44 : vector<64x8xi1>, vector<64x8xf32>
    %46 = arith.truncf %45 : vector<64x8xf32> to vector<64x8xbf16>
    %c0_30 = arith.constant 0 : index
    %c0_31 = arith.constant 0 : index
    %c0_32 = arith.constant 0 : index
    %47 = vector.load %arg5[%c0_30, %c0_31, %c0_32] : memref<1x64x8xbf16, #tpu.memory_space<vmem>>, vector<1x64x8xbf16>
    %48 = vector.shape_cast %47 : vector<1x64x8xbf16> to vector<64x8xbf16>
    %49 = vector.shape_cast %46 : vector<64x8xbf16> to vector<1x64x8xbf16>
    tpu.vector_store %arg5[%c0_30, %c0_31, %c0_32], %49 {strides = array<i32>} : memref<1x64x8xbf16, #tpu.memory_space<vmem>>, vector<1x64x8xbf16>,
    return
  }
  func.func @transform_0(%arg0: i32, %arg1: i32) -> (i32, i32, i32, i32) {
    %c0_i32 = arith.constant 0 : i32
    %c0_i32_0 = arith.constant 0 : i32
    %c0_i32_1 = arith.constant 0 : i32
    %c0_i32_2 = arith.constant 0 : i32
    return %arg0, %c0_i32, %c0_i32_0, %c0_i32_1 : i32, i32, i32, i32
  }
  func.func @transform_1(%arg0: i32, %arg1: i32) -> (i32, i32, i32) {
    %c0_i32 = arith.constant 0 : i32
    %c0_i32_0 = arith.constant 0 : i32
    %c0_i32_1 = arith.constant 0 : i32
    %c0_i32_2 = arith.constant 0 : i32
    return %c0_i32, %c0_i32_0, %c0_i32_1 : i32, i32, i32
  }
  func.func @transform_2(%arg0: i32, %arg1: i32) -> (i32, i32) {
    %c0_i32 = arith.constant 0 : i32
    %c0_i32_0 = arith.constant 0 : i32
    %c0_i32_1 = arith.constant 0 : i32
    return %c0_i32, %c0_i32_0 : i32, i32
  }
  func.func @transform_3(%arg0: i32, %arg1: i32) -> (i32, i32, i32) {
    %c0_i32 = arith.constant 0 : i32
    %c0_i32_0 = arith.constant 0 : i32
    return %arg0, %arg1, %c0_i32 : i32, i32, i32
  }
}

module attributes {stable_mosaic.version = 11 : i64} {
  func.func @kernel(%arg0: i32, %arg1: i32, %arg2: memref<1x8x8x8xbf16, #tpu.memory_space<vmem>>, %arg3: memref<1x8x8x8xf32, #tpu.memory_space<vmem>>, %arg4: memref<9x8x16xbf16, #tpu.memory_space<vmem>>, %arg5: memref<9x8x16xbf16, #tpu.memory_space<vmem>>, %arg6: memref<1x16xf32, #tpu.memory_space<vmem>>, %arg7: memref<1x64x16xf32, #tpu.memory_space<vmem>>, %arg8: memref<10x10x8xbf16, #tpu.memory_space<vmem>>, %arg9: memref<10x10x8xbf16, #tpu.memory_space<vmem>>) attributes {dimension_semantics = [#tpu.dimension_semantics<parallel>, #tpu.dimension_semantics<parallel>], iteration_bounds = array<i64: 2, 1>, scalar_prefetch = 0 : i64, scratch_operands = 2 : i64, tpu.core_type = #tpu.core_type<tc>, window_params = [{transform_indices = @transform_0, window_bounds = array<i64: 1, 8, 8, 8>}, {transform_indices = @transform_1, window_bounds = array<i64: 1, 8, 8, 8>}, {pipeline_mode = #tpu.pipeline_mode<synchronous>, transform_indices = @transform_2, window_bounds = array<i64: 9, 8, 16>}, {pipeline_mode = #tpu.pipeline_mode<synchronous>, transform_indices = @transform_3, window_bounds = array<i64: 9, 8, 16>}, {pipeline_mode = #tpu.pipeline_mode<synchronous>, transform_indices = @transform_4, window_bounds = array<i64: 1, 16>}, {transform_indices = @transform_5, window_bounds = array<i64: 1, 64, 16>}]} {
    %c8_i32 = arith.constant 8 : i32
    %0 = arith.muli %arg1, %c8_i32 : i32
    %cst = arith.constant 0.000000e+00 : bf16
    %1 = vector.broadcast %cst : bf16 to vector<10x10x8xbf16>
    %c0 = arith.constant 0 : index
    %c0_0 = arith.constant 0 : index
    %c0_1 = arith.constant 0 : index
    %2 = vector.load %arg8[%c0, %c0_0, %c0_1] : memref<10x10x8xbf16, #tpu.memory_space<vmem>>, vector<10x10x8xbf16>
    tpu.vector_store %arg8[%c0, %c0_0, %c0_1], %1 {strides = array<i32>} : memref<10x10x8xbf16, #tpu.memory_space<vmem>>, vector<10x10x8xbf16>,
    %c0_2 = arith.constant 0 : index
    %c0_3 = arith.constant 0 : index
    %c0_4 = arith.constant 0 : index
    %c0_5 = arith.constant 0 : index
    %3 = vector.load %arg2[%c0_2, %c0_3, %c0_4, %c0_5] : memref<1x8x8x8xbf16, #tpu.memory_space<vmem>>, vector<1x8x8x8xbf16>
    %4 = vector.shape_cast %3 : vector<1x8x8x8xbf16> to vector<8x8x8xbf16>
    %c1 = arith.constant 1 : index
    %c1_6 = arith.constant 1 : index
    %c0_7 = arith.constant 0 : index
    %5 = vector.load %arg8[%c1, %c1_6, %c0_7] : memref<10x10x8xbf16, #tpu.memory_space<vmem>>, vector<8x8x8xbf16>
    tpu.vector_store %arg8[%c1, %c1_6, %c0_7], %4 {strides = array<i32>} : memref<10x10x8xbf16, #tpu.memory_space<vmem>>, vector<8x8x8xbf16>,
    %cst_8 = arith.constant 0.000000e+00 : bf16
    %6 = vector.broadcast %cst_8 : bf16 to vector<10x10x8xbf16>
    %c0_9 = arith.constant 0 : index
    %c0_10 = arith.constant 0 : index
    %c0_11 = arith.constant 0 : index
    %7 = vector.load %arg9[%c0_9, %c0_10, %c0_11] : memref<10x10x8xbf16, #tpu.memory_space<vmem>>, vector<10x10x8xbf16>
    tpu.vector_store %arg9[%c0_9, %c0_10, %c0_11], %6 {strides = array<i32>} : memref<10x10x8xbf16, #tpu.memory_space<vmem>>, vector<10x10x8xbf16>,
    %c0_12 = arith.constant 0 : index
    %c0_13 = arith.constant 0 : index
    %c0_14 = arith.constant 0 : index
    %c0_15 = arith.constant 0 : index
    %8 = vector.load %arg3[%c0_12, %c0_13, %c0_14, %c0_15] : memref<1x8x8x8xf32, #tpu.memory_space<vmem>>, vector<1x8x8x8xf32>
    %9 = vector.shape_cast %8 : vector<1x8x8x8xf32> to vector<8x8x8xf32>
    %10 = arith.truncf %9 : vector<8x8x8xf32> to vector<8x8x8xbf16>
    %c1_16 = arith.constant 1 : index
    %c1_17 = arith.constant 1 : index
    %c0_18 = arith.constant 0 : index
    %11 = vector.load %arg9[%c1_16, %c1_17, %c0_18] : memref<10x10x8xbf16, #tpu.memory_space<vmem>>, vector<8x8x8xbf16>
    tpu.vector_store %arg9[%c1_16, %c1_17, %c0_18], %10 {strides = array<i32>} : memref<10x10x8xbf16, #tpu.memory_space<vmem>>, vector<8x8x8xbf16>,
    %c0_19 = arith.constant 0 : index
    %c0_20 = arith.constant 0 : index
    %12 = vector.load %arg6[%c0_19, %c0_20] : memref<1x16xf32, #tpu.memory_space<vmem>>, vector<1x16xf32>
    %cst_21 = arith.constant 0.000000e+00 : f32
    %13 = vector.broadcast %cst_21 : f32 to vector<64x16xf32>
    %c0_i32 = arith.constant 0 : i32
    %14 = arith.addi %0, %c0_i32 : i32
    %15 = arith.index_cast %14 : i32 to index
    %c0_22 = arith.constant 0 : index
    %c0_23 = arith.constant 0 : index
    %16 = vector.load %arg8[%15, %c0_22, %c0_23] : memref<10x10x8xbf16, #tpu.memory_space<vmem>>, vector<8x8x8xbf16>
    %17 = vector.shape_cast %16 : vector<8x8x8xbf16> to vector<64x8xbf16>
    %c0_24 = arith.constant 0 : index
    %c0_25 = arith.constant 0 : index
    %c0_26 = arith.constant 0 : index
    %18 = vector.load %arg4[%c0_24, %c0_25, %c0_26] : memref<9x8x16xbf16, #tpu.memory_space<vmem>>, vector<1x8x16xbf16>
    %19 = vector.shape_cast %18 : vector<1x8x16xbf16> to vector<8x16xbf16>
    %cst_27 = arith.constant dense<0.000000e+00> : vector<64x16xf32>
    %20 = tpu.matmul %17, %19, %cst_27 {dimension_numbers = #tpu.dot_dimension_numbers<[1], [0], [0], [1], [0, 0, 1, 1], [], []>} : vector<64x8xbf16>, vector<8x16xbf16>, vector<64x16xf32> -> vector<64x16xf32>
    %21 = arith.addf %13, %20 : vector<64x16xf32>
    %c0_i32_28 = arith.constant 0 : i32
    %22 = arith.addi %0, %c0_i32_28 : i32
    %23 = arith.index_cast %22 : i32 to index
    %c0_29 = arith.constant 0 : index
    %c0_30 = arith.constant 0 : index
    %24 = vector.load %arg9[%23, %c0_29, %c0_30] : memref<10x10x8xbf16, #tpu.memory_space<vmem>>, vector<8x8x8xbf16>
    %25 = vector.shape_cast %24 : vector<8x8x8xbf16> to vector<64x8xbf16>
    %c0_31 = arith.constant 0 : index
    %c0_32 = arith.constant 0 : index
    %c0_33 = arith.constant 0 : index
    %26 = vector.load %arg5[%c0_31, %c0_32, %c0_33] : memref<9x8x16xbf16, #tpu.memory_space<vmem>>, vector<1x8x16xbf16>
    %27 = vector.shape_cast %26 : vector<1x8x16xbf16> to vector<8x16xbf16>
    %cst_34 = arith.constant dense<0.000000e+00> : vector<64x16xf32>
    %28 = tpu.matmul %25, %27, %cst_34 {dimension_numbers = #tpu.dot_dimension_numbers<[1], [0], [0], [1], [0, 0, 1, 1], [], []>} : vector<64x8xbf16>, vector<8x16xbf16>, vector<64x16xf32> -> vector<64x16xf32>
    %29 = arith.addf %21, %28 : vector<64x16xf32>
    %c0_i32_35 = arith.constant 0 : i32
    %30 = arith.addi %0, %c0_i32_35 : i32
    %31 = arith.index_cast %30 : i32 to index
    %c1_36 = arith.constant 1 : index
    %c0_37 = arith.constant 0 : index
    %32 = vector.load %arg8[%31, %c1_36, %c0_37] : memref<10x10x8xbf16, #tpu.memory_space<vmem>>, vector<8x8x8xbf16>
    %33 = vector.shape_cast %32 : vector<8x8x8xbf16> to vector<64x8xbf16>
    %c1_38 = arith.constant 1 : index
    %c0_39 = arith.constant 0 : index
    %c0_40 = arith.constant 0 : index
    %34 = vector.load %arg4[%c1_38, %c0_39, %c0_40] : memref<9x8x16xbf16, #tpu.memory_space<vmem>>, vector<1x8x16xbf16>
    %35 = vector.shape_cast %34 : vector<1x8x16xbf16> to vector<8x16xbf16>
    %cst_41 = arith.constant dense<0.000000e+00> : vector<64x16xf32>
    %36 = tpu.matmul %33, %35, %cst_41 {dimension_numbers = #tpu.dot_dimension_numbers<[1], [0], [0], [1], [0, 0, 1, 1], [], []>} : vector<64x8xbf16>, vector<8x16xbf16>, vector<64x16xf32> -> vector<64x16xf32>
    %37 = arith.addf %29, %36 : vector<64x16xf32>
    %c0_i32_42 = arith.constant 0 : i32
    %38 = arith.addi %0, %c0_i32_42 : i32
    %39 = arith.index_cast %38 : i32 to index
    %c1_43 = arith.constant 1 : index
    %c0_44 = arith.constant 0 : index
    %40 = vector.load %arg9[%39, %c1_43, %c0_44] : memref<10x10x8xbf16, #tpu.memory_space<vmem>>, vector<8x8x8xbf16>
    %41 = vector.shape_cast %40 : vector<8x8x8xbf16> to vector<64x8xbf16>
    %c1_45 = arith.constant 1 : index
    %c0_46 = arith.constant 0 : index
    %c0_47 = arith.constant 0 : index
    %42 = vector.load %arg5[%c1_45, %c0_46, %c0_47] : memref<9x8x16xbf16, #tpu.memory_space<vmem>>, vector<1x8x16xbf16>
    %43 = vector.shape_cast %42 : vector<1x8x16xbf16> to vector<8x16xbf16>
    %cst_48 = arith.constant dense<0.000000e+00> : vector<64x16xf32>
    %44 = tpu.matmul %41, %43, %cst_48 {dimension_numbers = #tpu.dot_dimension_numbers<[1], [0], [0], [1], [0, 0, 1, 1], [], []>} : vector<64x8xbf16>, vector<8x16xbf16>, vector<64x16xf32> -> vector<64x16xf32>
    %45 = arith.addf %37, %44 : vector<64x16xf32>
    %c0_i32_49 = arith.constant 0 : i32
    %46 = arith.addi %0, %c0_i32_49 : i32
    %47 = arith.index_cast %46 : i32 to index
    %c2 = arith.constant 2 : index
    %c0_50 = arith.constant 0 : index
    %48 = vector.load %arg8[%47, %c2, %c0_50] : memref<10x10x8xbf16, #tpu.memory_space<vmem>>, vector<8x8x8xbf16>
    %49 = vector.shape_cast %48 : vector<8x8x8xbf16> to vector<64x8xbf16>
    %c2_51 = arith.constant 2 : index
    %c0_52 = arith.constant 0 : index
    %c0_53 = arith.constant 0 : index
    %50 = vector.load %arg4[%c2_51, %c0_52, %c0_53] : memref<9x8x16xbf16, #tpu.memory_space<vmem>>, vector<1x8x16xbf16>
    %51 = vector.shape_cast %50 : vector<1x8x16xbf16> to vector<8x16xbf16>
    %cst_54 = arith.constant dense<0.000000e+00> : vector<64x16xf32>
    %52 = tpu.matmul %49, %51, %cst_54 {dimension_numbers = #tpu.dot_dimension_numbers<[1], [0], [0], [1], [0, 0, 1, 1], [], []>} : vector<64x8xbf16>, vector<8x16xbf16>, vector<64x16xf32> -> vector<64x16xf32>
    %53 = arith.addf %45, %52 : vector<64x16xf32>
    %c0_i32_55 = arith.constant 0 : i32
    %54 = arith.addi %0, %c0_i32_55 : i32
    %55 = arith.index_cast %54 : i32 to index
    %c2_56 = arith.constant 2 : index
    %c0_57 = arith.constant 0 : index
    %56 = vector.load %arg9[%55, %c2_56, %c0_57] : memref<10x10x8xbf16, #tpu.memory_space<vmem>>, vector<8x8x8xbf16>
    %57 = vector.shape_cast %56 : vector<8x8x8xbf16> to vector<64x8xbf16>
    %c2_58 = arith.constant 2 : index
    %c0_59 = arith.constant 0 : index
    %c0_60 = arith.constant 0 : index
    %58 = vector.load %arg5[%c2_58, %c0_59, %c0_60] : memref<9x8x16xbf16, #tpu.memory_space<vmem>>, vector<1x8x16xbf16>
    %59 = vector.shape_cast %58 : vector<1x8x16xbf16> to vector<8x16xbf16>
    %cst_61 = arith.constant dense<0.000000e+00> : vector<64x16xf32>
    %60 = tpu.matmul %57, %59, %cst_61 {dimension_numbers = #tpu.dot_dimension_numbers<[1], [0], [0], [1], [0, 0, 1, 1], [], []>} : vector<64x8xbf16>, vector<8x16xbf16>, vector<64x16xf32> -> vector<64x16xf32>
    %61 = arith.addf %53, %60 : vector<64x16xf32>
    %c1_i32 = arith.constant 1 : i32
    %62 = arith.addi %0, %c1_i32 : i32
    %63 = arith.index_cast %62 : i32 to index
    %c0_62 = arith.constant 0 : index
    %c0_63 = arith.constant 0 : index
    %64 = vector.load %arg8[%63, %c0_62, %c0_63] : memref<10x10x8xbf16, #tpu.memory_space<vmem>>, vector<8x8x8xbf16>
    %65 = vector.shape_cast %64 : vector<8x8x8xbf16> to vector<64x8xbf16>
    %c3 = arith.constant 3 : index
    %c0_64 = arith.constant 0 : index
    %c0_65 = arith.constant 0 : index
    %66 = vector.load %arg4[%c3, %c0_64, %c0_65] : memref<9x8x16xbf16, #tpu.memory_space<vmem>>, vector<1x8x16xbf16>
    %67 = vector.shape_cast %66 : vector<1x8x16xbf16> to vector<8x16xbf16>
    %cst_66 = arith.constant dense<0.000000e+00> : vector<64x16xf32>
    %68 = tpu.matmul %65, %67, %cst_66 {dimension_numbers = #tpu.dot_dimension_numbers<[1], [0], [0], [1], [0, 0, 1, 1], [], []>} : vector<64x8xbf16>, vector<8x16xbf16>, vector<64x16xf32> -> vector<64x16xf32>
    %69 = arith.addf %61, %68 : vector<64x16xf32>
    %c1_i32_67 = arith.constant 1 : i32
    %70 = arith.addi %0, %c1_i32_67 : i32
    %71 = arith.index_cast %70 : i32 to index
    %c0_68 = arith.constant 0 : index
    %c0_69 = arith.constant 0 : index
    %72 = vector.load %arg9[%71, %c0_68, %c0_69] : memref<10x10x8xbf16, #tpu.memory_space<vmem>>, vector<8x8x8xbf16>
    %73 = vector.shape_cast %72 : vector<8x8x8xbf16> to vector<64x8xbf16>
    %c3_70 = arith.constant 3 : index
    %c0_71 = arith.constant 0 : index
    %c0_72 = arith.constant 0 : index
    %74 = vector.load %arg5[%c3_70, %c0_71, %c0_72] : memref<9x8x16xbf16, #tpu.memory_space<vmem>>, vector<1x8x16xbf16>
    %75 = vector.shape_cast %74 : vector<1x8x16xbf16> to vector<8x16xbf16>
    %cst_73 = arith.constant dense<0.000000e+00> : vector<64x16xf32>
    %76 = tpu.matmul %73, %75, %cst_73 {dimension_numbers = #tpu.dot_dimension_numbers<[1], [0], [0], [1], [0, 0, 1, 1], [], []>} : vector<64x8xbf16>, vector<8x16xbf16>, vector<64x16xf32> -> vector<64x16xf32>
    %77 = arith.addf %69, %76 : vector<64x16xf32>
    %c1_i32_74 = arith.constant 1 : i32
    %78 = arith.addi %0, %c1_i32_74 : i32
    %79 = arith.index_cast %78 : i32 to index
    %c1_75 = arith.constant 1 : index
    %c0_76 = arith.constant 0 : index
    %80 = vector.load %arg8[%79, %c1_75, %c0_76] : memref<10x10x8xbf16, #tpu.memory_space<vmem>>, vector<8x8x8xbf16>
    %81 = vector.shape_cast %80 : vector<8x8x8xbf16> to vector<64x8xbf16>
    %c4 = arith.constant 4 : index
    %c0_77 = arith.constant 0 : index
    %c0_78 = arith.constant 0 : index
    %82 = vector.load %arg4[%c4, %c0_77, %c0_78] : memref<9x8x16xbf16, #tpu.memory_space<vmem>>, vector<1x8x16xbf16>
    %83 = vector.shape_cast %82 : vector<1x8x16xbf16> to vector<8x16xbf16>
    %cst_79 = arith.constant dense<0.000000e+00> : vector<64x16xf32>
    %84 = tpu.matmul %81, %83, %cst_79 {dimension_numbers = #tpu.dot_dimension_numbers<[1], [0], [0], [1], [0, 0, 1, 1], [], []>} : vector<64x8xbf16>, vector<8x16xbf16>, vector<64x16xf32> -> vector<64x16xf32>
    %85 = arith.addf %77, %84 : vector<64x16xf32>
    %c1_i32_80 = arith.constant 1 : i32
    %86 = arith.addi %0, %c1_i32_80 : i32
    %87 = arith.index_cast %86 : i32 to index
    %c1_81 = arith.constant 1 : index
    %c0_82 = arith.constant 0 : index
    %88 = vector.load %arg9[%87, %c1_81, %c0_82] : memref<10x10x8xbf16, #tpu.memory_space<vmem>>, vector<8x8x8xbf16>
    %89 = vector.shape_cast %88 : vector<8x8x8xbf16> to vector<64x8xbf16>
    %c4_83 = arith.constant 4 : index
    %c0_84 = arith.constant 0 : index
    %c0_85 = arith.constant 0 : index
    %90 = vector.load %arg5[%c4_83, %c0_84, %c0_85] : memref<9x8x16xbf16, #tpu.memory_space<vmem>>, vector<1x8x16xbf16>
    %91 = vector.shape_cast %90 : vector<1x8x16xbf16> to vector<8x16xbf16>
    %cst_86 = arith.constant dense<0.000000e+00> : vector<64x16xf32>
    %92 = tpu.matmul %89, %91, %cst_86 {dimension_numbers = #tpu.dot_dimension_numbers<[1], [0], [0], [1], [0, 0, 1, 1], [], []>} : vector<64x8xbf16>, vector<8x16xbf16>, vector<64x16xf32> -> vector<64x16xf32>
    %93 = arith.addf %85, %92 : vector<64x16xf32>
    %c1_i32_87 = arith.constant 1 : i32
    %94 = arith.addi %0, %c1_i32_87 : i32
    %95 = arith.index_cast %94 : i32 to index
    %c2_88 = arith.constant 2 : index
    %c0_89 = arith.constant 0 : index
    %96 = vector.load %arg8[%95, %c2_88, %c0_89] : memref<10x10x8xbf16, #tpu.memory_space<vmem>>, vector<8x8x8xbf16>
    %97 = vector.shape_cast %96 : vector<8x8x8xbf16> to vector<64x8xbf16>
    %c5 = arith.constant 5 : index
    %c0_90 = arith.constant 0 : index
    %c0_91 = arith.constant 0 : index
    %98 = vector.load %arg4[%c5, %c0_90, %c0_91] : memref<9x8x16xbf16, #tpu.memory_space<vmem>>, vector<1x8x16xbf16>
    %99 = vector.shape_cast %98 : vector<1x8x16xbf16> to vector<8x16xbf16>
    %cst_92 = arith.constant dense<0.000000e+00> : vector<64x16xf32>
    %100 = tpu.matmul %97, %99, %cst_92 {dimension_numbers = #tpu.dot_dimension_numbers<[1], [0], [0], [1], [0, 0, 1, 1], [], []>} : vector<64x8xbf16>, vector<8x16xbf16>, vector<64x16xf32> -> vector<64x16xf32>
    %101 = arith.addf %93, %100 : vector<64x16xf32>
    %c1_i32_93 = arith.constant 1 : i32
    %102 = arith.addi %0, %c1_i32_93 : i32
    %103 = arith.index_cast %102 : i32 to index
    %c2_94 = arith.constant 2 : index
    %c0_95 = arith.constant 0 : index
    %104 = vector.load %arg9[%103, %c2_94, %c0_95] : memref<10x10x8xbf16, #tpu.memory_space<vmem>>, vector<8x8x8xbf16>
    %105 = vector.shape_cast %104 : vector<8x8x8xbf16> to vector<64x8xbf16>
    %c5_96 = arith.constant 5 : index
    %c0_97 = arith.constant 0 : index
    %c0_98 = arith.constant 0 : index
    %106 = vector.load %arg5[%c5_96, %c0_97, %c0_98] : memref<9x8x16xbf16, #tpu.memory_space<vmem>>, vector<1x8x16xbf16>
    %107 = vector.shape_cast %106 : vector<1x8x16xbf16> to vector<8x16xbf16>
    %cst_99 = arith.constant dense<0.000000e+00> : vector<64x16xf32>
    %108 = tpu.matmul %105, %107, %cst_99 {dimension_numbers = #tpu.dot_dimension_numbers<[1], [0], [0], [1], [0, 0, 1, 1], [], []>} : vector<64x8xbf16>, vector<8x16xbf16>, vector<64x16xf32> -> vector<64x16xf32>
    %109 = arith.addf %101, %108 : vector<64x16xf32>
    %c2_i32 = arith.constant 2 : i32
    %110 = arith.addi %0, %c2_i32 : i32
    %111 = arith.index_cast %110 : i32 to index
    %c0_100 = arith.constant 0 : index
    %c0_101 = arith.constant 0 : index
    %112 = vector.load %arg8[%111, %c0_100, %c0_101] : memref<10x10x8xbf16, #tpu.memory_space<vmem>>, vector<8x8x8xbf16>
    %113 = vector.shape_cast %112 : vector<8x8x8xbf16> to vector<64x8xbf16>
    %c6 = arith.constant 6 : index
    %c0_102 = arith.constant 0 : index
    %c0_103 = arith.constant 0 : index
    %114 = vector.load %arg4[%c6, %c0_102, %c0_103] : memref<9x8x16xbf16, #tpu.memory_space<vmem>>, vector<1x8x16xbf16>
    %115 = vector.shape_cast %114 : vector<1x8x16xbf16> to vector<8x16xbf16>
    %cst_104 = arith.constant dense<0.000000e+00> : vector<64x16xf32>
    %116 = tpu.matmul %113, %115, %cst_104 {dimension_numbers = #tpu.dot_dimension_numbers<[1], [0], [0], [1], [0, 0, 1, 1], [], []>} : vector<64x8xbf16>, vector<8x16xbf16>, vector<64x16xf32> -> vector<64x16xf32>
    %117 = arith.addf %109, %116 : vector<64x16xf32>
    %c2_i32_105 = arith.constant 2 : i32
    %118 = arith.addi %0, %c2_i32_105 : i32
    %119 = arith.index_cast %118 : i32 to index
    %c0_106 = arith.constant 0 : index
    %c0_107 = arith.constant 0 : index
    %120 = vector.load %arg9[%119, %c0_106, %c0_107] : memref<10x10x8xbf16, #tpu.memory_space<vmem>>, vector<8x8x8xbf16>
    %121 = vector.shape_cast %120 : vector<8x8x8xbf16> to vector<64x8xbf16>
    %c6_108 = arith.constant 6 : index
    %c0_109 = arith.constant 0 : index
    %c0_110 = arith.constant 0 : index
    %122 = vector.load %arg5[%c6_108, %c0_109, %c0_110] : memref<9x8x16xbf16, #tpu.memory_space<vmem>>, vector<1x8x16xbf16>
    %123 = vector.shape_cast %122 : vector<1x8x16xbf16> to vector<8x16xbf16>
    %cst_111 = arith.constant dense<0.000000e+00> : vector<64x16xf32>
    %124 = tpu.matmul %121, %123, %cst_111 {dimension_numbers = #tpu.dot_dimension_numbers<[1], [0], [0], [1], [0, 0, 1, 1], [], []>} : vector<64x8xbf16>, vector<8x16xbf16>, vector<64x16xf32> -> vector<64x16xf32>
    %125 = arith.addf %117, %124 : vector<64x16xf32>
    %c2_i32_112 = arith.constant 2 : i32
    %126 = arith.addi %0, %c2_i32_112 : i32
    %127 = arith.index_cast %126 : i32 to index
    %c1_113 = arith.constant 1 : index
    %c0_114 = arith.constant 0 : index
    %128 = vector.load %arg8[%127, %c1_113, %c0_114] : memref<10x10x8xbf16, #tpu.memory_space<vmem>>, vector<8x8x8xbf16>
    %129 = vector.shape_cast %128 : vector<8x8x8xbf16> to vector<64x8xbf16>
    %c7 = arith.constant 7 : index
    %c0_115 = arith.constant 0 : index
    %c0_116 = arith.constant 0 : index
    %130 = vector.load %arg4[%c7, %c0_115, %c0_116] : memref<9x8x16xbf16, #tpu.memory_space<vmem>>, vector<1x8x16xbf16>
    %131 = vector.shape_cast %130 : vector<1x8x16xbf16> to vector<8x16xbf16>
    %cst_117 = arith.constant dense<0.000000e+00> : vector<64x16xf32>
    %132 = tpu.matmul %129, %131, %cst_117 {dimension_numbers = #tpu.dot_dimension_numbers<[1], [0], [0], [1], [0, 0, 1, 1], [], []>} : vector<64x8xbf16>, vector<8x16xbf16>, vector<64x16xf32> -> vector<64x16xf32>
    %133 = arith.addf %125, %132 : vector<64x16xf32>
    %c2_i32_118 = arith.constant 2 : i32
    %134 = arith.addi %0, %c2_i32_118 : i32
    %135 = arith.index_cast %134 : i32 to index
    %c1_119 = arith.constant 1 : index
    %c0_120 = arith.constant 0 : index
    %136 = vector.load %arg9[%135, %c1_119, %c0_120] : memref<10x10x8xbf16, #tpu.memory_space<vmem>>, vector<8x8x8xbf16>
    %137 = vector.shape_cast %136 : vector<8x8x8xbf16> to vector<64x8xbf16>
    %c7_121 = arith.constant 7 : index
    %c0_122 = arith.constant 0 : index
    %c0_123 = arith.constant 0 : index
    %138 = vector.load %arg5[%c7_121, %c0_122, %c0_123] : memref<9x8x16xbf16, #tpu.memory_space<vmem>>, vector<1x8x16xbf16>
    %139 = vector.shape_cast %138 : vector<1x8x16xbf16> to vector<8x16xbf16>
    %cst_124 = arith.constant dense<0.000000e+00> : vector<64x16xf32>
    %140 = tpu.matmul %137, %139, %cst_124 {dimension_numbers = #tpu.dot_dimension_numbers<[1], [0], [0], [1], [0, 0, 1, 1], [], []>} : vector<64x8xbf16>, vector<8x16xbf16>, vector<64x16xf32> -> vector<64x16xf32>
    %141 = arith.addf %133, %140 : vector<64x16xf32>
    %c2_i32_125 = arith.constant 2 : i32
    %142 = arith.addi %0, %c2_i32_125 : i32
    %143 = arith.index_cast %142 : i32 to index
    %c2_126 = arith.constant 2 : index
    %c0_127 = arith.constant 0 : index
    %144 = vector.load %arg8[%143, %c2_126, %c0_127] : memref<10x10x8xbf16, #tpu.memory_space<vmem>>, vector<8x8x8xbf16>
    %145 = vector.shape_cast %144 : vector<8x8x8xbf16> to vector<64x8xbf16>
    %c8 = arith.constant 8 : index
    %c0_128 = arith.constant 0 : index
    %c0_129 = arith.constant 0 : index
    %146 = vector.load %arg4[%c8, %c0_128, %c0_129] : memref<9x8x16xbf16, #tpu.memory_space<vmem>>, vector<1x8x16xbf16>
    %147 = vector.shape_cast %146 : vector<1x8x16xbf16> to vector<8x16xbf16>
    %cst_130 = arith.constant dense<0.000000e+00> : vector<64x16xf32>
    %148 = tpu.matmul %145, %147, %cst_130 {dimension_numbers = #tpu.dot_dimension_numbers<[1], [0], [0], [1], [0, 0, 1, 1], [], []>} : vector<64x8xbf16>, vector<8x16xbf16>, vector<64x16xf32> -> vector<64x16xf32>
    %149 = arith.addf %141, %148 : vector<64x16xf32>
    %c2_i32_131 = arith.constant 2 : i32
    %150 = arith.addi %0, %c2_i32_131 : i32
    %151 = arith.index_cast %150 : i32 to index
    %c2_132 = arith.constant 2 : index
    %c0_133 = arith.constant 0 : index
    %152 = vector.load %arg9[%151, %c2_132, %c0_133] : memref<10x10x8xbf16, #tpu.memory_space<vmem>>, vector<8x8x8xbf16>
    %153 = vector.shape_cast %152 : vector<8x8x8xbf16> to vector<64x8xbf16>
    %c8_134 = arith.constant 8 : index
    %c0_135 = arith.constant 0 : index
    %c0_136 = arith.constant 0 : index
    %154 = vector.load %arg5[%c8_134, %c0_135, %c0_136] : memref<9x8x16xbf16, #tpu.memory_space<vmem>>, vector<1x8x16xbf16>
    %155 = vector.shape_cast %154 : vector<1x8x16xbf16> to vector<8x16xbf16>
    %cst_137 = arith.constant dense<0.000000e+00> : vector<64x16xf32>
    %156 = tpu.matmul %153, %155, %cst_137 {dimension_numbers = #tpu.dot_dimension_numbers<[1], [0], [0], [1], [0, 0, 1, 1], [], []>} : vector<64x8xbf16>, vector<8x16xbf16>, vector<64x16xf32> -> vector<64x16xf32>
    %157 = arith.addf %149, %156 : vector<64x16xf32>
    %158 = vector.broadcast %12 : vector<1x16xf32> to vector<64x16xf32>
    %159 = arith.addf %157, %158 : vector<64x16xf32>
    %cst_138 = arith.constant 0.000000e+00 : f32
    %160 = vector.broadcast %cst_138 : f32 to vector<64x16xf32>
    %161 = arith.cmpf oge, %159, %160 : vector<64x16xf32>
    %cst_139 = arith.constant 0.00999999977 : f32
    %162 = vector.broadcast %cst_139 : f32 to vector<64x16xf32>
    %163 = arith.mulf %162, %159 : vector<64x16xf32>
    %164 = arith.select %161, %159, %163 : vector<64x16xi1>, vector<64x16xf32>
    %c0_140 = arith.constant 0 : index
    %c0_141 = arith.constant 0 : index
    %c0_142 = arith.constant 0 : index
    %165 = vector.load %arg7[%c0_140, %c0_141, %c0_142] : memref<1x64x16xf32, #tpu.memory_space<vmem>>, vector<1x64x16xf32>
    %166 = vector.shape_cast %165 : vector<1x64x16xf32> to vector<64x16xf32>
    %167 = vector.shape_cast %164 : vector<64x16xf32> to vector<1x64x16xf32>
    tpu.vector_store %arg7[%c0_140, %c0_141, %c0_142], %167 {strides = array<i32>} : memref<1x64x16xf32, #tpu.memory_space<vmem>>, vector<1x64x16xf32>,
    return
  }
  func.func @transform_0(%arg0: i32, %arg1: i32) -> (i32, i32, i32, i32) {
    %c0_i32 = arith.constant 0 : i32
    %c0_i32_0 = arith.constant 0 : i32
    %c0_i32_1 = arith.constant 0 : i32
    %c0_i32_2 = arith.constant 0 : i32
    return %arg0, %c0_i32, %c0_i32_0, %c0_i32_1 : i32, i32, i32, i32
  }
  func.func @transform_1(%arg0: i32, %arg1: i32) -> (i32, i32, i32, i32) {
    %c0_i32 = arith.constant 0 : i32
    %c0_i32_0 = arith.constant 0 : i32
    %c0_i32_1 = arith.constant 0 : i32
    %c0_i32_2 = arith.constant 0 : i32
    return %arg0, %c0_i32, %c0_i32_0, %c0_i32_1 : i32, i32, i32, i32
  }
  func.func @transform_2(%arg0: i32, %arg1: i32) -> (i32, i32, i32) {
    %c0_i32 = arith.constant 0 : i32
    %c0_i32_0 = arith.constant 0 : i32
    %c0_i32_1 = arith.constant 0 : i32
    %c0_i32_2 = arith.constant 0 : i32
    return %c0_i32, %c0_i32_0, %c0_i32_1 : i32, i32, i32
  }
  func.func @transform_3(%arg0: i32, %arg1: i32) -> (i32, i32, i32) {
    %c0_i32 = arith.constant 0 : i32
    %c0_i32_0 = arith.constant 0 : i32
    %c0_i32_1 = arith.constant 0 : i32
    %c0_i32_2 = arith.constant 0 : i32
    return %c0_i32, %c0_i32_0, %c0_i32_1 : i32, i32, i32
  }
  func.func @transform_4(%arg0: i32, %arg1: i32) -> (i32, i32) {
    %c0_i32 = arith.constant 0 : i32
    %c0_i32_0 = arith.constant 0 : i32
    %c0_i32_1 = arith.constant 0 : i32
    return %c0_i32, %c0_i32_0 : i32, i32
  }
  func.func @transform_5(%arg0: i32, %arg1: i32) -> (i32, i32, i32) {
    %c0_i32 = arith.constant 0 : i32
    %c0_i32_0 = arith.constant 0 : i32
    return %arg0, %arg1, %c0_i32 : i32, i32, i32
  }
}

</mosaic_0001>

<bundles_post_ra>
// kernel: conv2x_forward.2
= control target key start
LH: loop header
LB: loop body
LE: loop exit
PB: predicated region body
PF: predicated region fallthrough
CT: control target
= control target key end

     0   :  { %s1320_s12 = smov 0   ;;  %s1322_s13 = smov 0   ;;  %s1526_s0 = inlined_call_operand.vmem [shape: bf16[2,9,9,16], index: 0, kind: input, shape index: {}]   ;;  %s1527_s1 = inlined_call_operand.vmem [shape: bf16[4,16,8], index: 1, kind: input, shape index: {}]   ;;  %s1528_s2 = inlined_call_operand.vmem [shape: f32[1,8], index: 2, kind: input, shape index: {}]   ;;  %s1529_s3 = inlined_call_operand.vmem [shape: bf16[2,64,8], index: 3, kind: output, shape index: {}]  }
   0x1   :  { %s1324_s14 = smov 0  }
   0x2 LB: > { %s25_s15 = sadd.s32 1, %s1294_s13  ;;  %p1065_p0 = scmp.ge.s32.totalorder %s1298_s14, 1  ;;  %s1298_s14 = sphi %s1324_s14, %s13_s14   ;;  %s1294_s13 = sphi %s1322_s13, %s1533_s13   ;;  %s1290_s12 = sphi %s1320_s12, %s1532_s12  }
   0x3   : > { %p27_p1 = scmp.ge.s32.totalorder %s25_s15, 2  ;;  %p151_p2 = scmp.lt.s32.totalorder %s1298_s14, 3 }
   0x5   : > { %s1535_s15 = smov (%p27_p1, %s25_s15), 0  ;;  %p152_p3 = pnand %p1065_p0, %p151_p2 }
   0x6   : > { %v1264_v0 = vld [vmem:[%s1527_s1 + $0x10] sm:$0xff] (!%p152_p3)   ;;  %p179_p4 = scmp.lt.s32.totalorder (!%p152_p3), %s1290_s12, 1  ;;  %v1267_v1 = vld [vmem:[%s1527_s1 + $0x8] sm:$0xff] (!%p152_p3)   ;;  %v1349_v2 = vld [vmem:[%s1527_s1] sm:$0xff] (!%p152_p3)   ;;  %vm354_vm0 = vcmask (!%p152_p3), 130048   ;;  %vm965_vm6 = vcmask (!%p152_p3), 60416  }
   0x7   : > { %155 = sbr.rel (%p152_p3) target bundleno = 298 (0x12a), region = 32  ;;  %1195 = vmatprep.subr.bf16.mxu0 (!%p152_p3), %v1264_v0  ;;  %1175 = vmatprep.subr.bf16.mxu1 (!%p152_p3), %v1267_v1  ;;  %v1271_v3 = vld [vmem:[%s1527_s1 + $0x18] sm:$0xff] (!%p152_p3)   ;;  %vm218_vm1 = vsmask.f32 (!%p152_p3), 3328  ;;  %vm219_vm2 = vsmask.f32 (!%p152_p3), 7440 }
   0x8   : > { %1196 = vmatpush3.bf16.msra.mxu0 (!%p152_p3), %v1264_v0  ;;  %1176 = vmatpush3.bf16.msra.mxu1 (!%p152_p3), %v1267_v1  ;;  %vm1392_vm3 = vmor (!%p152_p3), %vm218_vm1, %vm219_vm2  ;;  %v1135_v31 = vld [vmem:[%s1528_s2] ss:$0 sm:$0xff] (!%p152_p3) }
   0x9   : > { %1185 = vmatprep.subr.bf16.mxu1 (!%p152_p3), %v1349_v2  ;;  %1205 = vmatprep.subr.bf16.mxu0 (!%p152_p3), %v1271_v3 }
   0xe   : > { %s1537_s12 = smov (!%p179_p4, %s1290_s12), 1 }
   0xf   : > { %s1239_s22 = smul.u32 72, %s1537_s12  ;;  %s1146_s30 = sshll.u32 %s1537_s12, 5 }
  0x10   : > { %s1499_s6 = scalar_lea.vmem %s1529_s3, %s1146_s30 }
  0x11   : > { %s1359_s27 = scalar_lea.vmem %s1526_s0, %s1239_s22 }
  0x12   : > { %v1265_v4 = vld [vmem:[%s1359_s27 + $0x8] ss:$8 sps:$4 sm:$0xff]   ;;  %v1266_v5 = vld [vmem:[%s1359_s27 + $0x18] ss:$8 sps:$4 sm:$0xff]   ;;  %v210_v9 = vld [vmem:[%s1359_s27 + $0x4] sm:$0x1] }
  0x13   : > { %1197 = vmatprep.mubr.msk.bf16.mxu0 %vm354_vm0, %v1265_v4  ;;  %v1268_v6 = vld [vmem:[%s1359_s27 + $0x28] ss:$8 sps:$4 sm:$0xff]   ;;  %v1367_v7 = vld [vmem:[%s1359_s27] sm:$0xf]  ;;  %v211_v10 = vld [vmem:[%s1359_s27 + $0xc] sm:$0x1] }
  0x14   : > { %1198 = vmatmul.mubr.msk.bf16.vlgmr.msra.gmra.mrb[0].mxu0 %vm354_vm0, %v1266_v5  ;;  %v1370_v8 = vld [vmem:[%s1359_s27 + $0x8] sm:$0xf]  ;;  %v222_v11 = vshrl.u32 %v1367_v7, 16  ;;  %v225_v12 = vshll.u32 %v1367_v7, 16  ;;  %v231_v13 = vshll.u32 %v210_v9, 16  ;;  %v245_v16 = vshll.u32 %v211_v10, 16 }
  0x15   : > { %1201 = vmatprep.mubr.msk.bf16.mxu0 %vm354_vm0, %v1268_v6  ;;  %v236_v14 = vshrl.u32 %v1370_v8, 16  ;;  %1206 = vmatpush3.bf16.msra.mxu0 %v1271_v3  ;;  %v239_v15 = vshll.u32 %v1370_v8, 16  ;;  %v1270_v21 = vld [vmem:[%s1359_s27 + $0x38] ss:$8 sps:$4 sm:$0xff]   ;;  %v1381_v24 = vld [vmem:[%s1359_s27 + $0x10] sm:$0xf] }
  0x16   : > { %v224_v17 = vrot.slane %v222_v11, 4  ;;  %v227_v18 = vrot.slane %v225_v12, 5  ;;  %v233_v19 = vrot.slane %v231_v13, 5  ;;  %v247_v23 = vrot.slane %v245_v16, 5  ;;  %v1384_v25 = vld [vmem:[%s1359_s27 + $0x18] sm:$0xf] }
  0x17   : > { %v238_v20 = vrot.slane %v236_v14, 4  ;;  %v241_v22 = vrot.slane %v239_v15, 5  ;;  %v212_v27 = vld [vmem:[%s1359_s27 + $0x14] sm:$0x1]  ;;  %v213_v28 = vld [vmem:[%s1359_s27 + $0x1c] sm:$0x1] }
  0x18   : > { %v228_v26 = vor.u32 %v227_v18, %v224_v17  ;;  %v250_v29 = vshrl.u32 %v1381_v24, 16  ;;  %v253_v30 = vshll.u32 %v1381_v24, 16  ;;  %v259_v33 = vshll.u32 %v212_v27, 16  ;;  %v1108_v36 = vld [vmem:[%s1359_s27 + $0x8] sm:$0xf] }
  0x19   : > { %v242_v32 = vor.u32 %v241_v22, %v238_v20  ;;  %v264_v34 = vshrl.u32 %v1384_v25, 16  ;;  %v267_v35 = vshll.u32 %v1384_v25, 16  ;;  %v273_v40 = vshll.u32 %v213_v28, 16  ;;  %v1109_v41 = vld [vmem:[%s1359_s27 + $0xc] sm:$0x1] }
  0x1a   : > { %v229_v37 = vrot.slane %v228_v26, 4  ;;  %v252_v38 = vrot.slane %v250_v29, 4  ;;  %v255_v39 = vrot.slane %v253_v30, 5  ;;  %v261_v43 = vrot.slane %v259_v33, 5  ;;  %v1110_v46 = vld [vmem:[%s1359_s27 + $0x10] sm:$0xf] }
  0x1b   : > { %v243_v42 = vrot.slane %v242_v32, 4  ;;  %v266_v44 = vrot.slane %v264_v34, 4  ;;  %v269_v45 = vrot.slane %v267_v35, 5  ;;  %v275_v49 = vrot.slane %v273_v40, 5  ;;  %v1111_v53 = vld [vmem:[%s1359_s27 + $0x14] sm:$0x1] }
  0x1c   : > { %1202 = vmatmul.mubr.msk.bf16.gmra.mrb[4].mxu0 %vm354_vm0, %v1270_v21  ;;  %v234_v47 = vsel %vm1392_vm3, %v229_v37, %v233_v19  ;;  %v256_v48 = vor.u32 %v255_v39, %v252_v38  ;;  %v678_v50 = vshrl.u32 %v1108_v36, 16  ;;  %v681_v54 = vshll.u32 %v1108_v36, 16  ;;  %v1408_v56 = vld [vmem:[%s1359_s27 + $0x20] sm:$0xf]  ;;  %v214_v1 = vld [vmem:[%s1359_s27 + $0x24] sm:$0x1] }
  0x1d   : > { %v248_v51 = vsel %vm1392_vm3, %v243_v42, %v247_v23  ;;  %v270_v52 = vor.u32 %v269_v45, %v266_v44  ;;  %v687_v55 = vshll.u32 %v1109_v41, 16  ;;  %v692_v60 = vshrl.u32 %v1110_v46, 16  ;;  %v1415_v6 = vld [vmem:[%s1359_s27 + $0x28] sm:$0xf]  ;;  %v215_v13 = vld [vmem:[%s1359_s27 + $0x2c] sm:$0x1] }
  0x1e   : > { %v1071_v57 = vcombine.low %v234_v47, %v248_v51  ;;  %v257_v58 = vrot.slane %v256_v48, 4  ;;  %v680_v59 = vrot.slane %v678_v50, 4  ;;  %v683_v62 = vrot.slane %v681_v54, 5  ;;  %v1112_v15 = vld [vmem:[%s1359_s27 + $0x18] sm:$0xf] }
  0x1f   : > { %v271_v61 = vrot.slane %v270_v52, 4  ;;  %v689_v63 = vrot.slane %v687_v55, 5  ;;  %v695_v0 = vshll.u32 %v1110_v46, 16  ;;  %v694_v4 = vrot.slane %v692_v60, 4  ;;  %v1113_v26 = vld [vmem:[%s1359_s27 + $0x1c] sm:$0x1] }
  0x20   : > { %1177 = vmatprep.mubr.msk.bf16.mxu1 %vm354_vm0, %v1071_v57  ;;  %v262_v3 = vsel %vm1392_vm3, %v257_v58, %v261_v43  ;;  %v701_v5 = vshll.u32 %v1111_v53, 16  ;;  %v278_v9 = vshrl.u32 %v1408_v56, 16  ;;  %v684_v11 = vor.u32 %v683_v62, %v680_v59  ;;  %v1114_v30 = vld [vmem:[%s1359_s27 + $0x20] sm:$0xf]  ;;  %v1115_v39 = vld [vmem:[%s1359_s27 + $0x24] sm:$0x1] }
  0x21   : > { %v276_v10 = vsel %vm1392_vm3, %v271_v61, %v275_v49  ;;  %v697_v12 = vrot.slane %v695_v0, 5  ;;  %v281_v14 = vshll.u32 %v1408_v56, 16  ;;  %v287_v19 = vshll.u32 %v214_v1, 16  ;;  %v1438_v50 = vld [vmem:[%s1359_s27 + $0x38] sm:$0xf] }
  0x22   : > { %v1072_v16 = vcombine.low %v262_v3, %v276_v10  ;;  %v703_v17 = vrot.slane %v701_v5, 5  ;;  %v280_v18 = vrot.slane %v278_v9, 4  ;;  %v685_v20 = vrot.slane %v684_v11, 4  ;;  %v216_v51 = vld [vmem:[%s1359_s27 + $0x34] sm:$0x1] }
  0x23   : > { %v698_v21 = vor.u32 %v697_v12, %v694_v4  ;;  %v283_v22 = vrot.slane %v281_v14, 5  ;;  %v292_v23 = vshrl.u32 %v1415_v6, 16  ;;  %v289_v27 = vrot.slane %v287_v19, 5  ;;  %v217_v62 = vld [vmem:[%s1359_s27 + $0x3c] sm:$0x1] }
  0x24   : > { %1178 = vmatmul.mubr.msk.bf16.vlgmr.msra.gmra.mrb[0].mxu1 %vm354_vm0, %v1072_v16  ;;  %v295_v28 = vshll.u32 %v1415_v6, 16  ;;  %v301_v29 = vshll.u32 %v215_v13, 16  ;;  %v706_v32 = vshrl.u32 %v1112_v15, 16  ;;  %v690_v33 = vsel %vm1392_vm3, %v685_v20, %v689_v63  ;;  %v1116_v10 = vld [vmem:[%s1359_s27 + $0x28] sm:$0xf] }
  0x25   : > { %1186 = vmatpush3.bf16.msra.mxu1 %v1349_v2  ;;  %v699_v34 = vrot.slane %v698_v21, 4  ;;  %v284_v35 = vor.u32 %v283_v22, %v280_v18  ;;  %v294_v36 = vrot.slane %v292_v23, 4  ;;  %v709_v41 = vshll.u32 %v1112_v15, 16  ;;  %v1435_v2 = vld [vmem:[%s1359_s27 + $0x30] sm:$0xf] }
  0x26   : > { %v297_v37 = vrot.slane %v295_v28, 5  ;;  %v303_v38 = vrot.slane %v301_v29, 5  ;;  %v708_v40 = vrot.slane %v706_v32, 4  ;;  %v715_v44 = vshll.u32 %v1113_v26, 16  ;;  %v1117_v11 = vld [vmem:[%s1359_s27 + $0x2c] sm:$0x1] }
  0x27   : > { %v704_v42 = vsel %vm1392_vm3, %v699_v34, %v703_v17  ;;  %v285_v43 = vrot.slane %v284_v35, 4  ;;  %v720_v45 = vshrl.u32 %v1114_v30, 16  ;;  %v711_v48 = vrot.slane %v709_v41, 5  ;;  %v1118_v15 = vld [vmem:[%s1359_s27 + $0x30] sm:$0xf] }
  0x28   : > { %v1126_v46 = vcombine.low %v690_v33, %v704_v42  ;;  %v298_v47 = vor.u32 %v297_v37, %v294_v36  ;;  %v723_v49 = vshll.u32 %v1114_v30, 16  ;;  %v717_v53 = vrot.slane %v715_v44, 5  ;;  %v1119_v22 = vld [vmem:[%s1359_s27 + $0x34] sm:$0x1]  ;;  %v1120_v30 = vld [vmem:[%s1359_s27 + $0x38] sm:$0xf] }
  0x29   : > { %v290_v52 = vsel %vm1392_vm3, %v285_v43, %v289_v27  ;;  %v722_v54 = vrot.slane %v720_v45, 4  ;;  %v729_v55 = vshll.u32 %v1115_v39, 16  ;;  %v712_v58 = vor.u32 %v711_v48, %v708_v40  ;;  %v1121_v36 = vld [vmem:[%s1359_s27 + $0x3c] sm:$0x1]  ;;  %v1122_v41 = vld [vmem:[%s1359_s27 + $0x40] sm:$0xf] }
  0x2a   : > { %1207 = vmatprep.mubr.msk.bf16.mxu0 %vm354_vm0, %v1126_v46  ;;  %v299_v57 = vrot.slane %v298_v47, 4  ;;  %v725_v59 = vrot.slane %v723_v49, 5  ;;  %v306_v60 = vshrl.u32 %v1435_v2, 16  ;;  %v309_v63 = vshll.u32 %v1435_v2, 16 }
  0x2b   : > { %v731_v61 = vrot.slane %v729_v55, 5  ;;  %v315_v0 = vshll.u32 %v216_v51, 16  ;;  %v320_v1 = vshrl.u32 %v1438_v50, 16  ;;  %v713_v4 = vrot.slane %v712_v58, 4 }
  0x2c   : > { %v304_v3 = vsel %vm1392_vm3, %v299_v57, %v303_v38  ;;  %v726_v5 = vor.u32 %v725_v59, %v722_v54  ;;  %v308_v9 = vrot.slane %v306_v60, 4  ;;  %v311_v13 = vrot.slane %v309_v63, 5 }
  0x2d   : > { %v1073_v12 = vcombine.low %v290_v52, %v304_v3  ;;  %v322_v14 = vrot.slane %v320_v1, 4  ;;  %v1080_v16 = vcombine.low %v1367_v7, %v1370_v8  ;;  %v718_v17 = vsel %vm1392_vm3, %v713_v4, %v717_v53  ;;  %v1123_v52 = vld [vmem:[%s1359_s27 + $0x44] sm:$0x1] }
  0x2e   : > { %v727_v18 = vrot.slane %v726_v5, 4  ;;  %v323_v19 = vshll.u32 %v1438_v50, 16  ;;  %v329_v20 = vshll.u32 %v217_v62, 16  ;;  %v312_v21 = vor.u32 %v311_v13, %v308_v9 }
  0x2f   : > { %1181 = vmatprep.mubr.msk.bf16.mxu1 %vm354_vm0, %v1073_v12  ;;  %v734_v23 = vshrl.u32 %v1116_v10, 16  ;;  %v737_v26 = vshll.u32 %v1116_v10, 16  ;;  %v743_v27 = vshll.u32 %v1117_v11, 16  ;;  %v317_v7 = vrot.slane %v315_v0, 5 }
  0x30   : > { %v732_v28 = vsel %vm1392_vm3, %v727_v18, %v731_v61  ;;  %v325_v8 = vrot.slane %v323_v19, 5  ;;  %v748_v29 = vshrl.u32 %v1118_v15, 16  ;;  %v313_v33 = vrot.slane %v312_v21, 4 }
  0x31   : > { %v1127_v32 = vcombine.low %v718_v17, %v732_v28  ;;  %v736_v34 = vrot.slane %v734_v23, 4  ;;  %v739_v35 = vrot.slane %v737_v26, 5  ;;  %v331_v38 = vrot.slane %v329_v20, 5 }
  0x32   : > { %v326_v37 = vor.u32 %v325_v8, %v322_v14  ;;  %v750_v39 = vrot.slane %v748_v29, 4  ;;  %v751_v40 = vshll.u32 %v1118_v15, 16  ;;  %v745_v43 = vrot.slane %v743_v27, 5 }
  0x33   : > { %1208 = vmatmul.mubr.msk.bf16.vlgmr.msra.gmra.mrb[0].mxu0 %vm354_vm0, %v1127_v32  ;;  %v740_v42 = vor.u32 %v739_v35, %v736_v34  ;;  %v757_v44 = vshll.u32 %v1119_v22, 16  ;;  %v762_v45 = vshrl.u32 %v1120_v30, 16  ;;  %v318_v46 = vsel %vm1392_vm3, %v313_v33, %v317_v7 }
  0x34   : > { %v327_v47 = vrot.slane %v326_v37, 4  ;;  %v753_v48 = vrot.slane %v751_v40, 5  ;;  %v765_v49 = vshll.u32 %v1120_v30, 16  ;;  %v771_v54 = vshll.u32 %v1121_v36, 16 }
  0x35   : > { %v741_v51 = vrot.slane %v740_v42, 4  ;;  %v764_v53 = vrot.slane %v762_v45, 4  ;;  %v776_v55 = vshrl.u32 %v1122_v41, 16  ;;  %v759_v59 = vrot.slane %v757_v44, 5 }
  0x36   : > { %v332_v57 = vsel %vm1392_vm3, %v327_v47, %v331_v38  ;;  %v754_v58 = vor.u32 %v753_v48, %v750_v39  ;;  %v767_v60 = vrot.slane %v765_v49, 5  ;;  %v779_v63 = vshll.u32 %v1122_v41, 16 }
  0x37   : > { %v1074_v61 = vcombine.low %v318_v46, %v332_v57  ;;  %v778_v62 = vrot.slane %v776_v55, 4  ;;  %v746_v0 = vsel %vm1392_vm3, %v741_v51, %v745_v43  ;;  %v785_v4 = vshll.u32 %v1123_v52, 16 }
  0x38   : > { %v755_v1 = vrot.slane %v754_v58, 4  ;;  %v768_v3 = vor.u32 %v767_v60, %v764_v53  ;;  %v773_v5 = vrot.slane %v771_v54, 5  ;;  %v781_v9 = vrot.slane %v779_v63, 5 }
  0x39   : > { %1182 = vmatmul.mubr.msk.bf16.gmra.mrb[4].mxu1 %vm354_vm0, %v1074_v61  ;;  %v787_v14 = vrot.slane %v785_v4, 5  ;;  %v1081_v18 = vcombine.low %v1381_v24, %v1384_v25  ;;  %v1082_v19 = vcombine.low %v1408_v56, %v1415_v6  ;;  %v1083_v21 = vcombine.low %v1435_v2, %v1438_v50 }
  0x3a   : > { %v760_v10 = vsel %vm1392_vm3, %v755_v1, %v759_v59  ;;  %1187 = vmatprep.mubr.msk.bf16.mxu1 %vm354_vm0, %v1080_v16  ;;  %v769_v11 = vrot.slane %v768_v3, 4  ;;  %v782_v13 = vor.u32 %v781_v9, %v778_v62 }
  0x3b   : > { %v1128_v12 = vcombine.low %v746_v0, %v760_v10 }
  0x3c   : > { %v774_v15 = vsel %vm1392_vm3, %v769_v11, %v773_v5  ;;  %v783_v17 = vrot.slane %v782_v13, 4 }
  0x3d   : > { %1211 = vmatprep.mubr.msk.bf16.mxu0 %vm354_vm0, %v1128_v12 }
  0x3e   : > { %v788_v20 = vsel %vm1392_vm3, %v783_v17, %v787_v14 }
  0x3f   : > { %v1129_v16 = vcombine.low %v774_v15, %v788_v20 }
  0x41   : > { %1188 = vmatmul.mubr.msk.bf16.vlgmr.msra.gmra.mrb[0].mxu1 %vm354_vm0, %v1081_v18  ;;  %1212 = vmatmul.mubr.msk.bf16.gmra.mrb[4].mxu0 %vm354_vm0, %v1129_v16 }
  0x42   : > { %1191 = vmatprep.mubr.msk.bf16.mxu1 %vm354_vm0, %v1082_v19 }
  0x49   : > { %1192 = vmatmul.mubr.msk.bf16.gmra.mrb[4].mxu1 %vm354_vm0, %v1083_v21 }
 0x106   : > { %v1209_v22 = vpop.f32.mrb[0].mxu0 }
 0x107   : > { %v856_v24 = vpop.f32.mrb[1].mxu0 }
 0x108   : > { %v1210_v25 = vpop.f32.mrb[2].mxu0 }
 0x109   : > { %v859_v56 = vpop.f32.mrb[3].mxu0 }
 0x114   : > { %v1189_v6 = vpop.f32.mrb[0].mxu1  ;;  %v1213_v23 = vpop.f32.mrb[4].mxu0 }
 0x115   : > { %v1215_v26 = vadd.f32 %v1209_v22, %v1189_v6  ;;  %v504_v27 = vpop.f32.mrb[1].mxu1  ;;  %v872_v28 = vpop.f32.mrb[5].mxu0 }
 0x116   : > { %v1216_v7 = vadd.f32 %v856_v24, %v504_v27  ;;  %v1190_v8 = vpop.f32.mrb[2].mxu1  ;;  %v1214_v2 = vpop.f32.mrb[6].mxu0 }
 0x117   : > { %v903_v29 = vadd.f32 %v1215_v26, %v1135_v31  ;;  %v1217_v50 = vadd.f32 %v1210_v25, %v1190_v8  ;;  %v507_v30 = vpop.f32.mrb[3].mxu1  ;;  %v875_v33 = vpop.f32.mrb[7].mxu0 }
 0x118   : > { %v901_v32 = vadd.f32 %v1216_v7, %v1135_v31  ;;  %v1218_v34 = vadd.f32 %v859_v56, %v507_v30 }
 0x119   : > { %vm911_vm4 = vcmp.ge.f32.partialorder %v903_v29, 0.0  ;;  %v919_v35 = vmul.f32 0.01, %v903_v29  ;;  %v904_v36 = vadd.f32 %v1217_v50, %v1135_v31 }
 0x11a   : > { %vm909_vm5 = vcmp.ge.f32.partialorder %v901_v32, 0.0  ;;  %v917_v37 = vmul.f32 0.01, %v901_v32  ;;  %v902_v38 = vadd.f32 %v1218_v34, %v1135_v31 }
 0x11b   : > { %v927_v39 = vsel %vm911_vm4, %v903_v29, %v919_v35  ;;  %vm912_vm7 = vcmp.ge.f32.partialorder %v904_v36, 0.0  ;;  %v920_v40 = vmul.f32 0.01, %v904_v36 }
 0x11c   : > { %v1149_v41 = vpack.c.bf16 %v927_v39, %v927_v39  ;;  %v925_v42 = vsel %vm909_vm5, %v901_v32, %v917_v37  ;;  %vm910_vm8 = vcmp.ge.f32.partialorder %v902_v38, 0.0  ;;  %v918_v43 = vmul.f32 0.01, %v902_v38  ;;  %v1193_v44 = vpop.f32.mrb[4].mxu1 }
 0x11d   : > { %v1147_v45 = vpack.c.bf16 %v925_v42, %v925_v42  ;;  %v928_v46 = vsel %vm912_vm7, %v904_v36, %v920_v40  ;;  %v1219_v47 = vadd.f32 %v1213_v23, %v1193_v44  ;;  %v520_v48 = vpop.f32.mrb[5].mxu1 }
 0x11e   : > { %968 = vst.msk [vmem:[%s1499_s6 + $0x8] sm:$0xf] %vm965_vm6, %v1149_v41  ;;  %v1150_v49 = vpack.c.bf16 %v928_v46, %v928_v46  ;;  %v926_v51 = vsel %vm910_vm8, %v902_v38, %v918_v43  ;;  %v1220_v52 = vadd.f32 %v872_v28, %v520_v48  ;;  %v1194_v53 = vpop.f32.mrb[6].mxu1 }
 0x11f   : > { %966 = vst.msk [vmem:[%s1499_s6] sm:$0xf] %vm965_vm6, %v1147_v45  ;;  %v1148_v54 = vpack.c.bf16 %v926_v51, %v926_v51  ;;  %v907_v55 = vadd.f32 %v1219_v47, %v1135_v31  ;;  %v1221_v57 = vadd.f32 %v1214_v2, %v1194_v53  ;;  %v523_v58 = vpop.f32.mrb[7].mxu1 }
 0x120   : > { %969 = vst.msk [vmem:[%s1499_s6 + $0xc] sm:$0xf] %vm965_vm6, %v1150_v49  ;;  %v905_v59 = vadd.f32 %v1220_v52, %v1135_v31  ;;  %v1222_v60 = vadd.f32 %v875_v33, %v523_v58 }
 0x121   : > { %967 = vst.msk [vmem:[%s1499_s6 + $0x4] sm:$0xf] %vm965_vm6, %v1148_v54  ;;  %vm915_vm9 = vcmp.ge.f32.partialorder %v907_v55, 0.0  ;;  %v923_v61 = vmul.f32 0.01, %v907_v55  ;;  %v908_v62 = vadd.f32 %v1221_v57, %v1135_v31 }
 0x122   : > { %vm913_vm10 = vcmp.ge.f32.partialorder %v905_v59, 0.0  ;;  %v921_v63 = vmul.f32 0.01, %v905_v59  ;;  %v906_v0 = vadd.f32 %v1222_v60, %v1135_v31 }
 0x123   : > { %v931_v1 = vsel %vm915_vm9, %v907_v55, %v923_v61  ;;  %vm916_vm11 = vcmp.ge.f32.partialorder %v908_v62, 0.0  ;;  %v924_v3 = vmul.f32 0.01, %v908_v62 }
 0x124   : > { %v1153_v4 = vpack.c.bf16 %v931_v1, %v931_v1  ;;  %v929_v5 = vsel %vm913_vm10, %v905_v59, %v921_v63  ;;  %vm914_vm12 = vcmp.ge.f32.partialorder %v906_v0, 0.0  ;;  %v922_v9 = vmul.f32 0.01, %v906_v0 }
 0x125   : > { %v1151_v10 = vpack.c.bf16 %v929_v5, %v929_v5  ;;  %v932_v11 = vsel %vm916_vm11, %v908_v62, %v924_v3 }
 0x126   : > { %972 = vst.msk [vmem:[%s1499_s6 + $0x18] sm:$0xf] %vm965_vm6, %v1153_v4  ;;  %v1154_v12 = vpack.c.bf16 %v932_v11, %v932_v11  ;;  %v930_v13 = vsel %vm914_vm12, %v906_v0, %v922_v9 }
 0x127   : > { %970 = vst.msk [vmem:[%s1499_s6 + $0x10] sm:$0xf] %vm965_vm6, %v1151_v10  ;;  %v1152_v14 = vpack.c.bf16 %v930_v13, %v930_v13 }
 0x128   : > { %973 = vst.msk [vmem:[%s1499_s6 + $0x1c] sm:$0xf] %vm965_vm6, %v1154_v12 }
 0x129   : > { %971 = vst.msk [vmem:[%s1499_s6 + $0x14] sm:$0xf] %vm965_vm6, %v1152_v14 }
 0x12a PF: > { %s13_s14 = sadd.s32 1, %s1298_s14   ;;  %s1532_s12 = smov %s1294_s13 }
 0x12b   : > { %p10_p5 = scmp.ge.s32.totalorder %s13_s14, 4   ;;  %s1533_s13 = smov %s1535_s15 }
 0x12d   :  { %12 = sbr.rel (!%p10_p5) target bundleno = 2 (0x2), region = 67 }

// kernel: conv2x_forward.3
= control target key start
LH: loop header
LB: loop body
LE: loop exit
PB: predicated region body
PF: predicated region fallthrough
CT: control target
= control target key end

     0   :  { %10 = vsyncpa [#allocation5], 0  ;;  %s5764_s0 = inlined_call_operand.vmem [shape: bf16[2,8,8,8], index: 0, kind: input, shape index: {}]   ;;  %s5765_s1 = inlined_call_operand.vmem [shape: f32[2,8,8,8], index: 1, kind: input, shape index: {}]   ;;  %s5766_s2 = inlined_call_operand.vmem [shape: bf16[9,8,16], index: 2, kind: input, shape index: {}]   ;;  %s5767_s3 = inlined_call_operand.vmem [shape: bf16[9,8,16], index: 3, kind: input, shape index: {}]   ;;  %s5768_s4 = inlined_call_operand.vmem [shape: f32[1,16], index: 4, kind: input, shape index: {}]   ;;  %s5769_s5 = inlined_call_operand.hbm [shape: f32[2,64,16], index: 5, kind: output, shape index: {}]  }
   0x1   :  { %12 = vsyncpa [#allocation5 + $0x1], 0  ;;  %s4824_s18 = smov 0   ;;  %s4826_s19 = smov 0  }
   0x2   :  { %s4828_s20 = smov 0   ;;  %s4830_s21 = smov 0  }
   0x3   :  { %s4832_s22 = smov 0   ;;  %s4834_s23 = smov 0  }
   0x4 LB: > { %s3826_s24 = sadd.s32 4294967295, %s4788_s23   ;;  %s3827_s25 = sadd.s32 4294967294, %s4788_s23   ;;  %s4788_s23 = sphi %s4834_s23, %s18_s23   ;;  %s4784_s22 = sphi %s4832_s22, %s5784_s22   ;;  %s4780_s21 = sphi %s4830_s21, %s5783_s21   ;;  %s4776_s20 = sphi %s4828_s20, %s5782_s20   ;;  %s4772_s19 = sphi %s4826_s19, %s5781_s19   ;;  %s4768_s18 = sphi %s4824_s18, %s5780_s18  }
   0x5   : > { %s30_s26 = sadd.s32 1, %s4784_s22  ;;  %s154_s27 = sadd.s32 1, %s4776_s20 }
   0x6   : > { %p32_p0 = scmp.ge.s32.totalorder %s30_s26, 2  ;;  %p164_p1 = scmp.ne.s32.totalorder %s4776_s20, %s4772_s19 }
   0x7   : > { %p165_p2 = scmp.eq.s32.totalorder %s3826_s24, 1  ;;  %p170_p3 = scmp.ne.s32.totalorder %s4772_s19, %s4768_s18 }
   0x8   : > { %s5786_s26 = smov (%p32_p0, %s30_s26), 0  ;;  %p171_p5 = scmp.eq.s32.totalorder %s3827_s25, 1 }
   0x9   : > { %p4864_p4 = por %p165_p2, %p164_p1  ;;  %s149_s29 = ssub.s32 %s4784_s22, %s5786_s26 }
   0xa   : > { %p3830_p6 = scmp.ge.s32.totalorder %s4788_s23, 1  ;;  %p152_p7 = scmp.eq.s32.totalorder %s149_s29, 0 }
   0xb   : > { %p4871_p8 = por %p171_p5, %p170_p3  ;;  %p214_p9 = scmp.lt.s32.totalorder %s4788_s23, 3 }
   0xc   : > { %s4877_s6 = scalar_select %p152_p7, %s4776_s20, %s154_s27  }
   0xd   : > { %p215_p10 = pnand %p3830_p6, %p214_p9 }
   0xe   : > { %v637_v0 = vld [vmem:[%s5767_s3] sm:$0xf] (!%p215_p10)  ;;  %vm671_vm0 = vcmask (!%p215_p10), 1043456   ;;  %p247_p11 = scmp.lt.s32.totalorder (!%p215_p10), %s4780_s21, 1  ;;  %vm260_vm1 = vcmask (!%p215_p10), 60416   ;;  %v4790_v2 = vmov (!%p215_p10), 0  }
   0xf   : > { %218 = sbr.rel (%p215_p10) target bundleno = 475 (0x1db), region = 40  ;;  %4603 = vmatprep.subr.msk.bf16.mxu1 (!%p215_p10), %vm671_vm0, %v637_v0  ;;  %v673_v1 = vsel (!%p215_p10), %vm671_vm0, %v637_v0, 0  ;;  %425 = vst.msk [vmem:[#allocation3] sm:$0xf] (!%p215_p10), %vm260_vm1, %v4790_v2  ;;  %427 = vst.msk [vmem:[#allocation3 + $0x8] sm:$0xf] (!%p215_p10), %vm260_vm1, %v4790_v2 }
  0x10   : > { %261 = vst.msk [vmem:[#allocation2] sm:$0xf] (!%p215_p10), %vm260_vm1, %v4790_v2  ;;  %264 = vst.msk [vmem:[#allocation2 + $0x8] sm:$0xf] (!%p215_p10), %vm260_vm1, %v4790_v2  ;;  %v3987_v3 = vld [vmem:[%s5767_s3 + $0x10] sm:$0xf] (!%p215_p10)  ;;  %4288 = vmatpush3.bf16.msra.mxu1 (!%p215_p10), %v673_v1 }
  0x11   : > { %266 = vst.msk [vmem:[#allocation2 + $0x10] sm:$0xf] (!%p215_p10), %vm260_vm1, %v4790_v2  ;;  %268 = vst.msk [vmem:[#allocation2 + $0x18] sm:$0xf] (!%p215_p10), %vm260_vm1, %v4790_v2  ;;  %4612 = vmatprep.subr.msk.bf16.mxu0 (!%p215_p10), %vm671_vm0, %v3987_v3  ;;  %v2249_v4 = vsel (!%p215_p10), %vm671_vm0, %v3987_v3, 0  ;;  %vm262_vm2 = vcmask (!%p215_p10), 57344  }
  0x12   : > { %270 = vst.msk [vmem:[#allocation2 + $0x20] sm:$0xf] (!%p215_p10), %vm260_vm1, %v4790_v2  ;;  %272 = vst.msk [vmem:[#allocation2 + $0x28] sm:$0xf] (!%p215_p10), %vm260_vm1, %v4790_v2  ;;  %v626_v5 = vld [vmem:[%s5766_s2] sm:$0xf] (!%p215_p10)  ;;  %4378 = vmatpush3.bf16.msra.mxu0 (!%p215_p10), %v2249_v4 }
  0x13   : > { %274 = vst.msk [vmem:[#allocation2 + $0x30] sm:$0xf] (!%p215_p10), %vm260_vm1, %v4790_v2  ;;  %276 = vst.msk [vmem:[#allocation2 + $0x38] sm:$0xf] (!%p215_p10), %vm260_vm1, %v4790_v2  ;;  %4604 = vmatprep.subr.msk.bf16.mxu1 (!%p215_p10), %vm671_vm0, %v626_v5  ;;  %vm372_vm3 = vsmask.f32 (!%p215_p10), 7938 }
  0x14   : > { %278 = vst.msk [vmem:[#allocation2 + $0x40] sm:$0xf] (!%p215_p10), %vm260_vm1, %v4790_v2  ;;  %280 = vst.msk [vmem:[#allocation2 + $0x48] sm:$0xf] (!%p215_p10), %vm260_vm1, %v4790_v2  ;;  %v4012_v6 = vld [vmem:[%s5766_s2 + $0x14] sm:$0xf] (!%p215_p10) }
  0x15   : > { %429 = vst.msk [vmem:[#allocation3 + $0x10] sm:$0xf] (!%p215_p10), %vm260_vm1, %v4790_v2  ;;  %431 = vst.msk [vmem:[#allocation3 + $0x18] sm:$0xf] (!%p215_p10), %vm260_vm1, %v4790_v2  ;;  %vm378_vm4 = vsmask.f32 (!%p215_p10), 256  ;;  %4613 = vmatprep.subr.msk.bf16.mxu0 (!%p215_p10), %vm671_vm0, %v4012_v6 }
  0x16   : > { %433 = vst.msk [vmem:[#allocation3 + $0x20] sm:$0xf] %vm260_vm1, %v4790_v2  ;;  %435 = vst.msk [vmem:[#allocation3 + $0x28] sm:$0xf] %vm260_vm1, %v4790_v2  ;;  %s4911_s11 = scalar_select %p247_p11, %s4780_s21, 1  ;;  %v4963_v12 = vsel %vm671_vm0, %v626_v5, 0 }
  0x17   : > { %437 = vst.msk [vmem:[#allocation3 + $0x30] sm:$0xf] %vm260_vm1, %v4790_v2  ;;  %439 = vst.msk [vmem:[#allocation3 + $0x38] sm:$0xf] %vm260_vm1, %v4790_v2  ;;  %v4952_v7 = vld [vmem:[%s5766_s2 + $0x4] sm:$0xf] }
  0x18   : > { %441 = vst.msk [vmem:[#allocation3 + $0x40] sm:$0xf] %vm260_vm1, %v4790_v2  ;;  %443 = vst.msk [vmem:[#allocation3 + $0x48] sm:$0xf] %vm260_vm1, %v4790_v2  ;;  %s4187_s14 = sshll.u32 %s4911_s11, 6  ;;  %v4966_v13 = vsel %vm671_vm0, %v4012_v6, 0 }
  0x19   : > { %428 = vst.msk [vmem:[#allocation3 + $0xc] sm:$0x1] %vm262_vm2, %v4790_v2  ;;  %430 = vst.msk [vmem:[#allocation3 + $0x14] sm:$0x1] %vm262_vm2, %v4790_v2  ;;  %s4946_s25 = scalar_lea.vmem %s5765_s1, %s4187_s14  ;;  %v4957_v8 = vld [vmem:[%s5767_s3 + $0x14] sm:$0xf] }
  0x1a   : > { %263 = vst.msk [vmem:[#allocation2 + $0x4] sm:$0x1] %vm262_vm2, %v4790_v2  ;;  %265 = vst.msk [vmem:[#allocation2 + $0xc] sm:$0x1] %vm262_vm2, %v4790_v2  ;;  %v445_v9 = vld [vmem:[%s4946_s25] sm:$0xff]  ;;  %v446_v10 = vld [vmem:[%s4946_s25 + $0x8] sm:$0xff] }
  0x1b   : > { %267 = vst.msk [vmem:[#allocation2 + $0x14] sm:$0x1] %vm262_vm2, %v4790_v2  ;;  %269 = vst.msk [vmem:[#allocation2 + $0x1c] sm:$0x1] %vm262_vm2, %v4790_v2  ;;  %v447_v11 = vld [vmem:[%s4946_s25 + $0x10] sm:$0xff]  ;;  %v4188_v14 = vpack.c.bf16 %v445_v9, %v445_v9  ;;  %v4189_v15 = vpack.c.bf16 %v446_v10, %v446_v10  ;;  %v448_v17 = vld [vmem:[%s4946_s25 + $0x18] sm:$0xff] }
  0x1c   : > { %271 = vst.msk [vmem:[#allocation2 + $0x24] sm:$0x1] %vm262_vm2, %v4790_v2  ;;  %273 = vst.msk [vmem:[#allocation2 + $0x2c] sm:$0x1] %vm262_vm2, %v4790_v2  ;;  %v4190_v16 = vpack.c.bf16 %v447_v11, %v447_v11  ;;  %v449_v18 = vld [vmem:[%s4946_s25 + $0x20] sm:$0xff]  ;;  %v450_v19 = vld [vmem:[%s4946_s25 + $0x28] sm:$0xff]  ;;  %v4191_v21 = vpack.c.bf16 %v448_v17, %v448_v17 }
  0x1d   : > { %275 = vst.msk [vmem:[#allocation2 + $0x34] sm:$0x1] %vm262_vm2, %v4790_v2  ;;  %277 = vst.msk [vmem:[#allocation2 + $0x3c] sm:$0x1] %vm262_vm2, %v4790_v2  ;;  %v4973_v20 = vsel %vm671_vm0, %v4952_v7, 0  ;;  %v4192_v22 = vpack.c.bf16 %v449_v18, %v449_v18  ;;  %v4193_v23 = vpack.c.bf16 %v450_v19, %v450_v19  ;;  %v4977_v24 = vsel %vm671_vm0, %v4957_v8, 0 }
  0x1e   : > { %279 = vst.msk [vmem:[#allocation2 + $0x44] sm:$0x1] %vm262_vm2, %v4790_v2  ;;  %281 = vst.msk [vmem:[#allocation2 + $0x4c] sm:$0x1] %vm262_vm2, %v4790_v2  ;;  %s4186_s9 = sshll.u32 %s4911_s11, 5  ;;  %v486_v25 = vshrl.u32 %v4188_v14, 16 }
  0x1f   : > { %426 = vst.msk [vmem:[#allocation3 + $0x4] sm:$0x1] %vm262_vm2, %v4790_v2  ;;  %432 = vst.msk [vmem:[#allocation3 + $0x1c] sm:$0x1] %vm262_vm2, %v4790_v2  ;;  %v489_v26 = vshll.u32 %v4188_v14, 16  ;;  %v494_v27 = vshrl.u32 %v4189_v15, 16  ;;  %s4989_s12 = scalar_lea.vmem %s5764_s0, %s4186_s9 }
  0x20   : > { %434 = vst.msk [vmem:[#allocation3 + $0x24] sm:$0x1] %vm262_vm2, %v4790_v2  ;;  %436 = vst.msk [vmem:[#allocation3 + $0x2c] sm:$0x1] %vm262_vm2, %v4790_v2  ;;  %v497_v28 = vshll.u32 %v4189_v15, 16  ;;  %v502_v30 = vshrl.u32 %v4190_v16, 16 }
  0x21   : > { %438 = vst.msk [vmem:[#allocation3 + $0x34] sm:$0x1] %vm262_vm2, %v4790_v2  ;;  %440 = vst.msk [vmem:[#allocation3 + $0x3c] sm:$0x1] %vm262_vm2, %v4790_v2  ;;  %v566_v29 = vld [vmem:[#allocation3 + $0x8] sm:$0xf] }
  0x22   : > { %442 = vst.msk [vmem:[#allocation3 + $0x44] sm:$0x1] %vm262_vm2, %v4790_v2  ;;  %444 = vst.msk [vmem:[#allocation3 + $0x4c] sm:$0x1] %vm262_vm2, %v4790_v2  ;;  %v505_v31 = vshll.u32 %v4190_v16, 16  ;;  %v510_v32 = vshrl.u32 %v4191_v21, 16 }
  0x23   : > { %v513_v33 = vshll.u32 %v4191_v21, 16  ;;  %v488_v34 = vrot.slane %v486_v25, 7  ;;  %v496_v35 = vrot.slane %v494_v27, 7  ;;  %v572_v36 = vld [vmem:[#allocation3 + $0x10] sm:$0xf]  ;;  %v518_v37 = vshrl.u32 %v4192_v22, 16  ;;  %vm4982_vm5 = vmand %vm260_vm1, %vm372_vm3 }
  0x24   : > { %v521_v38 = vshll.u32 %v4192_v22, 16  ;;  %v504_v40 = vrot.slane %v502_v30, 7  ;;  %v578_v41 = vld [vmem:[#allocation3 + $0x18] sm:$0xf]  ;;  %v512_v42 = vrot.slane %v510_v32, 7  ;;  %v526_v43 = vshrl.u32 %v4193_v23, 16  ;;  %vm4994_vm7 = vmand %vm262_vm2, %vm378_vm4 }
  0x25   : > { %v529_v44 = vshll.u32 %v4193_v23, 16  ;;  %v491_v45 = vor.u32 %v489_v26, %v488_v34  ;;  %v492_v46 = vrot.slane %v488_v34, 4  ;;  %v499_v47 = vor.u32 %v497_v28, %v496_v35  ;;  %v584_v49 = vld [vmem:[#allocation3 + $0x20] sm:$0xf]  ;;  %v590_v55 = vld [vmem:[#allocation3 + $0x28] sm:$0xf] }
  0x26   : > { %v520_v48 = vrot.slane %v518_v37, 7  ;;  %v451_v50 = vld [vmem:[%s4946_s25 + $0x30] sm:$0xff]  ;;  %vm658_vm6 = vcmask 64512   ;;  %v507_v51 = vor.u32 %v505_v31, %v504_v40  ;;  %v508_v52 = vrot.slane %v504_v40, 4  ;;  %v569_v57 = vld [vmem:[#allocation3 + $0xc] sm:$0x1] }
  0x27   : > { %v515_v53 = vor.u32 %v513_v33, %v512_v42  ;;  %v516_v54 = vrot.slane %v512_v42, 4  ;;  %v567_v58 = vsel %vm4982_vm5, %v491_v45, %v566_v29  ;;  %v573_v59 = vsel %vm4982_vm5, %v499_v47, %v572_v36  ;;  %v596_v62 = vld [vmem:[#allocation3 + $0x30] sm:$0xf]  ;;  %v575_v63 = vld [vmem:[#allocation3 + $0x14] sm:$0x1]  ;;  %s244_s7 = sand.u32 1, %s4772_s19  }
  0x28   : > { %v523_v60 = vor.u32 %v521_v38, %v520_v48  ;;  %v524_v61 = vrot.slane %v520_v48, 4  ;;  %v581_v0 = vld [vmem:[#allocation3 + $0x1c] sm:$0x1]  ;;  %568 = vst [vmem:[#allocation3 + $0x8] sm:$0xf] %v567_v58  ;;  %v579_v1 = vsel %vm4982_vm5, %v507_v51, %v578_v41  ;;  %v4194_v3 = vpack.c.bf16 %v451_v50, %v451_v50  ;;  %s3831_s10 = sshll.u32 %s244_s7, 6 }
  0x29   : > { %574 = vst [vmem:[#allocation3 + $0x10] sm:$0xf] %v573_v59  ;;  %v585_v2 = vsel %vm4982_vm5, %v515_v53, %v584_v49  ;;  %v528_v4 = vrot.slane %v526_v43, 7  ;;  %v587_v5 = vld [vmem:[#allocation3 + $0x24] sm:$0x1]  ;;  %v500_v10 = vrot.slane %v496_v35, 4  ;;  %v570_v11 = vsel %vm4994_vm7, %v492_v46, %v569_v57 }
  0x2a   : > { %v282_v6 = vld [vmem:[%s4989_s12] sm:$0xf]  ;;  %580 = vst [vmem:[#allocation3 + $0x18] sm:$0xf] %v579_v1  ;;  %586 = vst [vmem:[#allocation3 + $0x20] sm:$0xf] %v585_v2  ;;  %v591_v9 = vsel %vm4982_vm5, %v523_v60, %v590_v55  ;;  %v582_v14 = vsel %vm4994_vm7, %v508_v52, %v581_v0  ;;  %v588_v25 = vsel %vm4994_vm7, %v516_v54, %v587_v5 }
  0x2b   : > { %v283_v15 = vld [vmem:[%s4989_s12 + $0x4] sm:$0xf]  ;;  %592 = vst [vmem:[#allocation3 + $0x28] sm:$0xf] %v591_v9  ;;  %v531_v16 = vor.u32 %v529_v44, %v528_v4  ;;  %v532_v17 = vrot.slane %v528_v4, 4  ;;  %v534_v18 = vshrl.u32 %v4194_v3, 16  ;;  %v576_v23 = vsel %vm4994_vm7, %v500_v10, %v575_v63 }
  0x2c   : > { %v537_v19 = vshll.u32 %v4194_v3, 16  ;;  %571 = vst [vmem:[#allocation3 + $0xc] sm:$0x1] %v570_v11  ;;  %583 = vst [vmem:[#allocation3 + $0x1c] sm:$0x1] %v582_v14  ;;  %v291_v26 = vshrl.u32 %v282_v6, 16 }
  0x2d   : > { %v5015_v21 = vld [vmem:[%s4989_s12 + $0x8] sm:$0xf]  ;;  %v294_v27 = vshll.u32 %v282_v6, 16  ;;  %v536_v28 = vrot.slane %v534_v18, 7  ;;  %v597_v29 = vsel %vm4982_vm5, %v531_v16, %v596_v62  ;;  %577 = vst [vmem:[#allocation3 + $0x14] sm:$0x1] %v576_v23 }
  0x2e   : > { %v602_v22 = vld [vmem:[#allocation3 + $0x38] sm:$0xf]  ;;  %vm856_vm8 = vsmask.f32 3328  ;;  %vm857_vm9 = vsmask.f32 7440 }
  0x2f   : > { %589 = vst [vmem:[#allocation3 + $0x24] sm:$0x1] %v588_v25  ;;  %v299_v30 = vshrl.u32 %v283_v15, 16  ;;  %v302_v31 = vshll.u32 %v283_v15, 16  ;;  %v593_v32 = vld [vmem:[#allocation3 + $0x2c] sm:$0x1]  ;;  %v539_v38 = vor.u32 %v537_v19, %v536_v28  ;;  %vm5061_vm10 = vmor %vm856_vm8, %vm857_vm9 }
  0x30   : > { %598 = vst [vmem:[#allocation3 + $0x30] sm:$0xf] %v597_v29  ;;  %v5023_v33 = vrot.slane %v291_v26, 7  ;;  %v374_v34 = vld [vmem:[#allocation2 + $0x8] sm:$0xf]  ;;  %v307_v35 = vshrl.u32 %v5015_v21, 16  ;;  %v594_v36 = vsel %vm4994_vm7, %v524_v61, %v593_v32 }
  0x31   : > { %v599_v37 = vld [vmem:[#allocation3 + $0x34] sm:$0x1]  ;;  %v540_v40 = vrot.slane %v536_v28, 4  ;;  %v5028_v41 = vrot.slane %v299_v30, 7  ;;  %v383_v42 = vld [vmem:[#allocation2 + $0x10] sm:$0xf]  ;;  %v603_v48 = vsel %vm4982_vm5, %v539_v38, %v602_v22 }
  0x32   : > { %595 = vst [vmem:[#allocation3 + $0x2c] sm:$0x1] %v594_v36  ;;  %v600_v43 = vsel %vm4994_vm7, %v532_v17, %v599_v37  ;;  %v605_v44 = vld [vmem:[#allocation3 + $0x3c] sm:$0x1]  ;;  %v4679_v45 = vld [vmem:[#allocation3] ss:$8 sps:$4 sm:$0xff]   ;;  %v296_v46 = vor.u32 %v294_v27, %v5023_v33 }
  0x33   : > { %601 = vst [vmem:[#allocation3 + $0x34] sm:$0x1] %v600_v43  ;;  %v4680_v47 = vld [vmem:[#allocation3 + $0x10] ss:$8 sps:$4 sm:$0xff]   ;;  %v304_v49 = vor.u32 %v302_v31, %v5028_v41  ;;  %v606_v50 = vsel %vm4994_vm7, %v540_v40, %v605_v44  ;;  %4289 = vmatprep.mubr.msk.bf16.mxu1 %vm658_vm6, %v4679_v45  ;;  %v4681_v51 = vld [vmem:[#allocation3 + $0x20] ss:$8 sps:$4 sm:$0xff]  }
  0x34   : > { %604 = vst [vmem:[#allocation3 + $0x38] sm:$0xf] %v603_v48  ;;  %v3971_v52 = vld [vmem:[#allocation3 + $0x8] sm:$0xf]  ;;  %v375_v53 = vsel %vm4982_vm5, %v296_v46, %v374_v34  ;;  %607 = vst [vmem:[#allocation3 + $0x3c] sm:$0x1] %v606_v50  ;;  %4290 = vmatmul.mubr.msk.bf16.vlgmr.msra.gmra.mrb[0].mxu1 %vm658_vm6, %v4680_v47 }
  0x35   : > { %v5042_v54 = vld [vmem:[#allocation3 + $0xc] sm:$0x1]  ;;  %v3973_v55 = vld [vmem:[#allocation3 + $0x10] sm:$0xf]  ;;  %v2111_v57 = vshrl.u32 %v3971_v52, 16  ;;  %v2114_v58 = vshll.u32 %v3971_v52, 16  ;;  %v384_v59 = vsel %vm4982_vm5, %v304_v49, %v383_v42  ;;  %4293 = vmatprep.mubr.msk.bf16.mxu1 %vm658_vm6, %v4681_v51  ;;  %4298 = vmatpush3.bf16.msra.mxu1 %v4963_v12 }
  0x36   : > { %376 = vst [vmem:[#allocation2 + $0x8] sm:$0xf] %v375_v53  ;;  %v5047_v60 = vld [vmem:[#allocation3 + $0x14] sm:$0x1]  ;;  %v2120_v61 = vshll.u32 %v5042_v54, 16  ;;  %v2125_v62 = vshrl.u32 %v3973_v55, 16  ;;  %4605 = vmatprep.subr.msk.bf16.mxu1 %vm671_vm0, %v4952_v7 }
  0x37   : > { %v2128_v63 = vshll.u32 %v3973_v55, 16  ;;  %v310_v0 = vshll.u32 %v5015_v21, 16  ;;  %385 = vst [vmem:[#allocation2 + $0x10] sm:$0xf] %v384_v59  ;;  %v2113_v1 = vrot.slane %v2111_v57, 4  ;;  %v2116_v2 = vrot.slane %v2114_v58, 5 }
  0x38   : > { %v2134_v3 = vshll.u32 %v5047_v60, 16  ;;  %v2508_v4 = vrot.slane %v5042_v54, 5  ;;  %v2122_v5 = vrot.slane %v2120_v61, 5  ;;  %v2127_v6 = vrot.slane %v2125_v62, 4  ;;  %v3975_v11 = vld [vmem:[#allocation3 + $0x18] sm:$0xf] }
  0x39   : > { %v2130_v9 = vrot.slane %v2128_v63, 5  ;;  %v2512_v10 = vrot.slane %v5047_v60, 5  ;;  %v2117_v12 = vor.u32 %v2116_v2, %v2113_v1  ;;  %v5057_v15 = vld [vmem:[#allocation3 + $0x1c] sm:$0x1]  ;;  %v3977_v16 = vld [vmem:[#allocation3 + $0x20] sm:$0xf] }
  0x3a   : > { %v2136_v14 = vrot.slane %v2134_v3, 5  ;;  %v2139_v17 = vshrl.u32 %v3975_v11, 16  ;;  %v5065_v19 = vld [vmem:[#allocation3 + $0x24] sm:$0x1]  ;;  %v2142_v22 = vshll.u32 %v3975_v11, 16  ;;  %v2148_v23 = vshll.u32 %v5057_v15, 16 }
  0x3b   : > { %v2131_v7 = vor.u32 %v2130_v9, %v2127_v6  ;;  %v2153_v25 = vshrl.u32 %v3977_v16, 16  ;;  %v452_v26 = vld [vmem:[%s4946_s25 + $0x38] sm:$0xff]  ;;  %v4682_v27 = vld [vmem:[#allocation3 + $0x30] ss:$8 sps:$4 sm:$0xff]   ;;  %v2118_v28 = vrot.slane %v2117_v12, 4  ;;  %v297_v34 = vrot.slane %v5023_v33, 4 }
  0x3c   : > { %v2141_v29 = vrot.slane %v2139_v17, 4  ;;  %v2144_v31 = vrot.slane %v2142_v22, 5  ;;  %v2150_v32 = vrot.slane %v2148_v23, 5  ;;  %4294 = vmatmul.mubr.msk.bf16.gmra.mrb[4].mxu1 %vm658_vm6, %v4682_v27  ;;  %v2156_v38 = vshll.u32 %v3977_v16, 16  ;;  %v389_v43 = vld [vmem:[#allocation2 + $0x18] sm:$0xf] }
  0x3d   : > { %v2132_v30 = vrot.slane %v2131_v7, 4  ;;  %v2123_v36 = vsel %vm5061_vm10, %v2118_v28, %v2122_v5  ;;  %v2155_v37 = vrot.slane %v2153_v25, 4  ;;  %v2162_v40 = vshll.u32 %v5065_v19, 16  ;;  %v4683_v42 = vld [vmem:[#allocation2] ss:$8 sps:$4 sm:$0xff]   ;;  %s5689_s11 = scalar_lea.vmem [#allocation4], %s3831_s10 }
  0x3e   : > { %v2145_v45 = vor.u32 %v2144_v31, %v2141_v29  ;;  %v2516_v46 = vrot.slane %v5057_v15, 5  ;;  %v5079_v47 = vrot.slane %v307_v35, 7  ;;  %v3979_v48 = vld [vmem:[#allocation3 + $0x28] sm:$0xf]  ;;  %v2158_v50 = vrot.slane %v2156_v38, 5  ;;  %4299 = vmatprep.mubr.msk.bf16.mxu1 %vm658_vm6, %v4683_v42  ;;  %s3721_s13 = sshll.u32 %s5689_s11, 4  ;;  %s5708_s13 = int_to_ptr.vmem [resolvable:$true] %s3721_s13 }
  0x3f   : > { %v2137_v44 = vsel %vm5061_vm10, %v2132_v30, %v2136_v14  ;;  %v2520_v51 = vrot.slane %v5065_v19, 5  ;;  %v5083_v52 = vld [vmem:[#allocation3 + $0x2c] sm:$0x1]  ;;  %v3981_v53 = vld [vmem:[#allocation3 + $0x30] sm:$0xf]  ;;  %v4195_v55 = vpack.c.bf16 %v452_v26, %v452_v26  ;;  %v2164_v58 = vrot.slane %v2162_v40, 5 }
  0x40   : > { %v3988_v49 = vcombine.low %v2123_v36, %v2137_v44  ;;  %v2146_v57 = vrot.slane %v2145_v45, 4  ;;  %v312_v59 = vor.u32 %v310_v0, %v5079_v47  ;;  %v2167_v61 = vshrl.u32 %v3979_v48, 16  ;;  %v5087_v35 = vld [vmem:[#allocation3 + $0x34] sm:$0x1]  ;;  %v3983_v0 = vld [vmem:[#allocation3 + $0x38] sm:$0xf] }
  0x41   : > { %v2159_v21 = vor.u32 %v2158_v50, %v2155_v37  ;;  %v2170_v62 = vshll.u32 %v3979_v48, 16  ;;  %v2176_v63 = vshll.u32 %v5083_v52, 16  ;;  %v2181_v1 = vshrl.u32 %v3981_v53, 16  ;;  %v5095_v23 = vld [vmem:[#allocation3 + $0x3c] sm:$0x1]  ;;  %s5718_s16 = scalar_lea.sflag [#allocation5], %s244_s7 }
  0x42   : > { %4379 = vmatprep.mubr.msk.bf16.mxu0 %vm658_vm6, %v3988_v49  ;;  %v2151_v2 = vsel %vm5061_vm10, %v2146_v57, %v2150_v32  ;;  %v390_v3 = vsel %vm4982_vm5, %v312_v59, %v389_v43  ;;  %v2169_v5 = vrot.slane %v2167_v61, 4  ;;  %v2184_v6 = vshll.u32 %v3981_v53, 16  ;;  %v285_v29 = vld [vmem:[%s4989_s12 + $0xc] sm:$0xf]  ;;  %v608_v37 = vld [vmem:[#allocation3 + $0x40] sm:$0xf] }
  0x43   : > { %v2160_v9 = vrot.slane %v2159_v21, 4  ;;  %391 = vst [vmem:[#allocation2 + $0x18] sm:$0xf] %v390_v3  ;;  %v2172_v11 = vrot.slane %v2170_v62, 5  ;;  %v2178_v12 = vrot.slane %v2176_v63, 5  ;;  %v2183_v14 = vrot.slane %v2181_v1, 4 }
  0x44   : > { %v2186_v16 = vrot.slane %v2184_v6, 5  ;;  %v2190_v17 = vshll.u32 %v5087_v35, 16  ;;  %v542_v7 = vshrl.u32 %v4195_v55, 16  ;;  %v545_v22 = vshll.u32 %v4195_v55, 16  ;;  %v611_v40 = vld [vmem:[#allocation3 + $0x44] sm:$0x1] }
  0x45   : > { %v2165_v25 = vsel %vm5061_vm10, %v2160_v9, %v2164_v58  ;;  %v2173_v26 = vor.u32 %v2172_v11, %v2169_v5  ;;  %v2195_v27 = vshrl.u32 %v3983_v0, 16  ;;  %v2198_v28 = vshll.u32 %v3983_v0, 16  ;;  %v286_v50 = vld [vmem:[%s4989_s12 + $0x10] sm:$0xf]  ;;  %v395_v61 = vld [vmem:[#allocation2 + $0x20] sm:$0xf] }
  0x46   : > { %v3989_v30 = vcombine.low %v2151_v2, %v2165_v25  ;;  %v2187_v31 = vor.u32 %v2186_v16, %v2183_v14  ;;  %v2192_v32 = vrot.slane %v2190_v17, 5  ;;  %v544_v36 = vrot.slane %v542_v7, 7  ;;  %v398_v21 = vld [vmem:[#allocation2 + $0x24] sm:$0x1]  ;;  %v287_v62 = vld [vmem:[%s4989_s12 + $0x14] sm:$0xf] }
  0x47   : > { %v2174_v38 = vrot.slane %v2173_v26, 4  ;;  %v2197_v42 = vrot.slane %v2195_v27, 4  ;;  %v2200_v43 = vrot.slane %v2198_v28, 5  ;;  %v2204_v44 = vshll.u32 %v5095_v23, 16  ;;  %v288_v63 = vld [vmem:[%s4989_s12 + $0x18] sm:$0xf] }
  0x48   : > { %4380 = vmatmul.mubr.msk.bf16.vlgmr.msra.gmra.mrb[0].mxu0 %vm658_vm6, %v3989_v30  ;;  %v2188_v45 = vrot.slane %v2187_v31, 4  ;;  %v547_v48 = vor.u32 %v545_v22, %v544_v36  ;;  %v548_v49 = vrot.slane %v544_v36, 4  ;;  %v315_v53 = vshrl.u32 %v285_v29, 16  ;;  %v401_v17 = vld [vmem:[#allocation2 + $0x28] sm:$0xf]  ;;  %s4710_s17 = scalar_lea.vmem %s5708_s13, 1024 }
  0x49   : > { %4388 = vmatpush3.bf16.msra.mxu0 %v4966_v13  ;;  %v313_v55 = vrot.slane %v5079_v47, 4  ;;  %v2179_v57 = vsel %vm5061_vm10, %v2174_v38, %v2178_v12  ;;  %v2201_v58 = vor.u32 %v2200_v43, %v2197_v42  ;;  %v318_v59 = vshll.u32 %v285_v29, 16  ;;  %v380_v12 = vld [vmem:[#allocation2 + $0xc] sm:$0x1]  ;;  %v386_v25 = vld [vmem:[#allocation2 + $0x14] sm:$0x1]  ;;  %p4711_p12 = scmp.ne.s32.totalorder %s5708_s13, %s4710_s17 }
  0x4a   : > { %v4684_v1 = vld [vmem:[#allocation2 + $0x10] ss:$8 sps:$4 sm:$0xff]   ;;  %v2193_v2 = vsel %vm5061_vm10, %v2188_v45, %v2192_v32  ;;  %v609_v3 = vsel %vm4982_vm5, %v547_v48, %v608_v37  ;;  %v612_v13 = vsel %vm4994_vm7, %v548_v49, %v611_v40  ;;  %v317_v5 = vrot.slane %v315_v53, 7  ;;  %4614 = vmatprep.subr.msk.bf16.mxu0 %vm671_vm0, %v4957_v8  ;;  %v5125_v30 = vld [vmem:[#allocation2 + $0x8] sm:$0xe]  ;;  %s4791_s24 = smov [#allocation4]  }
  0x4b   : > { %vm1327_vm11 = vcmask 1042432   ;;  %vm1328_vm12 = vcmask 1046532   ;;  %v3990_v6 = vcombine.low %v2179_v57, %v2193_v2  ;;  %610 = vst [vmem:[#allocation3 + $0x40] sm:$0xf] %v609_v3  ;;  %613 = vst [vmem:[#allocation3 + $0x44] sm:$0x1] %v612_v13  ;;  %4300 = vmatmul.mubr.msk.bf16.vlgmr.msra.gmra.mrb[0].mxu1 %vm658_vm6, %v4684_v1  ;;  %p4712_p13 = pnand %p4711_p12, %p4864_p4 }
  0x4c   : > { %v5117_v0 = vrot.slane %v2204_v44, 5  ;;  %v323_v9 = vshrl.u32 %v286_v50, 16  ;;  %v326_v11 = vshll.u32 %v286_v50, 16  ;;  %v320_v14 = vor.u32 %v318_v59, %v317_v5  ;;  %v407_v29 = vld [vmem:[#allocation2 + $0x30] sm:$0xf]  ;;  %4308 = vmatpush3.bf16.msra.mxu1 %v4973_v20  ;;  %vm5166_vm13 = vmor %vm1327_vm11, %vm1328_vm12  ;;  %s4714_s25 = sshll.u32 %s4791_s24, 4  ;;  %s4715_s25 = int_to_ptr.vmem [resolvable:$false] %s4714_s25 }
  0x4d   : > { %v321_v16 = vrot.slane %v317_v5, 4  ;;  %v331_v7 = vshrl.u32 %v287_v62, 16  ;;  %v334_v22 = vshll.u32 %v287_v62, 16  ;;  %4383 = vmatprep.mubr.msk.bf16.mxu0 %vm658_vm6, %v3990_v6  ;;  %v5121_v26 = vrot.slane %v2201_v58, 4  ;;  %v5133_v38 = vld [vmem:[#allocation2 + $0x10] sm:$0xe]  ;;  %p4713_p0 = pneg %p4712_p13  ;;  %p4717_p1 = scmp.lt.s32.totalorder %s5708_s13, %s4715_s25 }
  0x4e   : > { %v5123_v8 = vrot.slane %v323_v9, 7  ;;  %v339_v27 = vshrl.u32 %v288_v63, 16  ;;  %v342_v28 = vshll.u32 %v288_v63, 16  ;;  %v396_v31 = vsel %vm4982_vm5, %v320_v14, %v395_v61  ;;  %v392_v40 = vld [vmem:[#allocation2 + $0x1c] sm:$0x1]  ;;  %s4716_s27 = scalar_lea.vmem %s4715_s25, 2048 }
  0x4f   : > { %v399_v32 = vsel %vm4994_vm7, %v321_v16, %v398_v21  ;;  %v333_v36 = vrot.slane %v331_v7, 7  ;;  %v305_v37 = vrot.slane %v5028_v41, 4  ;;  %397 = vst [vmem:[#allocation2 + $0x20] sm:$0xf] %v396_v31  ;;  %v381_v20 = vsel %vm4994_vm7, %v297_v34, %v380_v12  ;;  %v5141_v45 = vld [vmem:[#allocation2 + $0x18] sm:$0xe]  ;;  %p4718_p2 = scmp.lt.s32.totalorder %s4716_s27, %s4710_s17 }
  0x50   : > { %v328_v42 = vor.u32 %v326_v11, %v5123_v8  ;;  %v329_v43 = vrot.slane %v5123_v8, 4  ;;  %400 = vst [vmem:[#allocation2 + $0x24] sm:$0x1] %v399_v32  ;;  %v341_v44 = vrot.slane %v339_v27, 7  ;;  %v840_v48 = vld [vmem:[#allocation2] sm:$0xf]  ;;  %v393_v3 = vsel %vm4994_vm7, %v313_v55, %v392_v40 }
  0x51   : > { %v336_v49 = vor.u32 %v334_v22, %v333_v36  ;;  %v337_v41 = vrot.slane %v333_v36, 4  ;;  %v413_v50 = vld [vmem:[#allocation2 + $0x38] sm:$0xf]  ;;  %382 = vst [vmem:[#allocation2 + $0xc] sm:$0x1] %v381_v20  ;;  %v387_v53 = vsel %vm4994_vm7, %v305_v37, %v386_v25  ;;  %v4004_v57 = vrot.slane %v5125_v30, 9  ;;  %p4719_p3 = por %p4718_p2, %p4717_p1 }
  0x52   : > { %v5146_v58 = vld [vmem:[#allocation2 + $0x4] sm:$0x1]  ;;  %v402_v33 = vsel %vm4982_vm5, %v328_v42, %v401_v17  ;;  %v344_v59 = vor.u32 %v342_v28, %v341_v44  ;;  %v345_v61 = vrot.slane %v341_v44, 4  ;;  %388 = vst [vmem:[#allocation2 + $0x14] sm:$0x1] %v387_v53  ;;  %v4005_v34 = vrot.slane %v5133_v38, 9 }
  0x53   : > { %v842_v21 = vld [vmem:[#allocation2 + $0x8] sm:$0xf]  ;;  %v404_v62 = vld [vmem:[#allocation2 + $0x2c] sm:$0x1]  ;;  %v3985_v63 = vld [vmem:[#allocation3 + $0x40] sm:$0xf]  ;;  %v408_v2 = vsel %vm4982_vm5, %v336_v49, %v407_v29  ;;  %p4720_p5 = pnand %p4719_p3, %p4713_p0 }
  0x54   : > { %v5151_v1 = vld [vmem:[#allocation3 + $0x44] sm:$0x1]  ;;  %403 = vst [vmem:[#allocation2 + $0x28] sm:$0xf] %v402_v33  ;;  %v4006_v13 = vrot.slane %v5141_v45, 9  ;;  %v860_v5 = vshrl.u32 %v840_v48, 16  ;;  %v414_v12 = vsel %vm4982_vm5, %v344_v59, %v413_v50  ;;  %v405_v32 = vsel %vm4994_vm7, %v329_v43, %v404_v62 }
  0x55   : > { %v2209_v6 = vshrl.u32 %v3985_v63, 16  ;;  %v2212_v9 = vshll.u32 %v3985_v63, 16  ;;  %v2218_v11 = vshll.u32 %v5151_v1, 16  ;;  %409 = vst [vmem:[#allocation2 + $0x30] sm:$0xf] %v408_v2  ;;  %v863_v17 = vshll.u32 %v840_v48, 16 }
  0x56   : > { %394 = vst [vmem:[#allocation2 + $0x1c] sm:$0x1] %v393_v3  ;;  %v410_v14 = vld [vmem:[#allocation2 + $0x34] sm:$0x1]  ;;  %415 = vst [vmem:[#allocation2 + $0x38] sm:$0xf] %v414_v12 }
  0x57   : > { %v862_v16 = vrot.slane %v860_v5, 4  ;;  %v869_v47 = vshll.u32 %v5146_v58, 16  ;;  %v874_v7 = vshrl.u32 %v842_v21, 16  ;;  %v2211_v55 = vrot.slane %v2209_v6, 4  ;;  %v416_v28 = vld [vmem:[#allocation2 + $0x3c] sm:$0x1] }
  0x58   : > { %v2214_v22 = vrot.slane %v2212_v9, 5  ;;  %v2220_v25 = vrot.slane %v2218_v11, 5  ;;  %v877_v27 = vshll.u32 %v842_v21, 16  ;;  %v3953_v29 = vld [vmem:[#allocation2 + $0x24] sm:$0x1]  ;;  %v411_v36 = vsel %vm4994_vm7, %v337_v41, %v410_v14 }
  0x59   : > { %v3999_v30 = vld [vmem:[#allocation2 + $0x20] sm:$0xe]  ;;  %v844_v31 = vld [vmem:[#allocation2 + $0x10] sm:$0xf]  ;;  %v417_v37 = vsel %vm4994_vm7, %v345_v61, %v416_v28  ;;  %v5176_v40 = vld [vmem:[#allocation2 + $0xc] sm:$0x1]  ;;  %v2207_v41 = vsel %vm5061_vm10, %v5121_v26, %v5117_v0 }
  0x5a   : > { %v2215_v38 = vor.u32 %v2214_v22, %v2211_v55  ;;  %v4007_v42 = vrot.slane %v3999_v30, 9  ;;  %v2362_v44 = vrot.slane %v3953_v29, 5  ;;  %v5178_v20 = vld [vmem:[#allocation2 + $0xc] sm:$0x1]  ;;  %406 = vst [vmem:[#allocation2 + $0x2c] sm:$0x1] %v405_v32 }
  0x5b   : > { %412 = vst [vmem:[#allocation2 + $0x34] sm:$0x1] %v411_v36  ;;  %418 = vst [vmem:[#allocation2 + $0x3c] sm:$0x1] %v417_v37  ;;  %v3949_v48 = vld [vmem:[#allocation2 + $0x14] sm:$0x1] }
  0x5c   : > { %v2350_v49 = vrot.slane %v5176_v40, 5  ;;  %v865_v43 = vrot.slane %v863_v17, 5  ;;  %v871_v50 = vrot.slane %v869_v47, 5  ;;  %v876_v53 = vrot.slane %v874_v7, 4  ;;  %v4685_v59 = vld [vmem:[#allocation2 + $0x20] ss:$8 sps:$4 sm:$0xff]  }
  0x5d   : > { %v2216_v33 = vrot.slane %v2215_v38, 4  ;;  %v2354_v61 = vrot.slane %v3949_v48, 5  ;;  %v5187_v21 = vsel %vm5166_vm13, %v4007_v42, %v2362_v44  ;;  %v3951_v63 = vld [vmem:[#allocation2 + $0x1c] sm:$0x1]  ;;  %v879_v3 = vrot.slane %v877_v27, 5  ;;  %4303 = vmatprep.mubr.msk.bf16.mxu1 %vm658_vm6, %v4685_v59 }
  0x5e   : > { %v2351_v62 = vsel %vm5166_vm13, %v4004_v57, %v2350_v49  ;;  %v866_v2 = vor.u32 %v865_v43, %v862_v16  ;;  %v883_v5 = vshll.u32 %v5178_v20, 16  ;;  %v846_v6 = vld [vmem:[#allocation2 + $0x18] sm:$0xf]  ;;  %v2358_v11 = vrot.slane %v3951_v63, 5  ;;  %v5197_v16 = vld [vmem:[#allocation2 + $0x14] sm:$0x1] }
  0x5f   : > { %v2221_v9 = vsel %vm5061_vm10, %v2216_v33, %v2220_v25  ;;  %v4686_v0 = vld [vmem:[#allocation2 + $0x30] ss:$8 sps:$4 sm:$0xff]   ;;  %v2355_v26 = vsel %vm5166_vm13, %v4005_v34, %v2354_v61  ;;  %v888_v12 = vshrl.u32 %v844_v31, 16  ;;  %v880_v47 = vor.u32 %v879_v3, %v876_v53  ;;  %v5199_v7 = vld [vmem:[#allocation2 + $0x1c] sm:$0x1] }
  0x60   : > { %v3991_v14 = vcombine.low %v2207_v41, %v2221_v9  ;;  %v4013_v17 = vcombine.low %v2351_v62, %v2355_v26  ;;  %v867_v57 = vrot.slane %v866_v2, 4  ;;  %4304 = vmatmul.mubr.msk.bf16.gmra.mrb[4].mxu1 %vm658_vm6, %v4686_v0  ;;  %v2359_v55 = vsel %vm5166_vm13, %v4006_v13, %v2358_v11  ;;  %v4000_v27 = vld [vmem:[#allocation2 + $0x28] sm:$0xe]  ;;  %v4001_v42 = vld [vmem:[#allocation2 + $0x30] sm:$0xe] }
  0x61   : > { %v885_v22 = vrot.slane %v883_v5, 5  ;;  %v890_v25 = vrot.slane %v888_v12, 4  ;;  %v891_v34 = vshll.u32 %v844_v31, 16  ;;  %v4014_v28 = vcombine.low %v2359_v55, %v5187_v21  ;;  %v3955_v36 = vld [vmem:[#allocation2 + $0x2c] sm:$0x1] }
  0x62   : > { %4384 = vmatmul.mubr.msk.bf16.gmra.mrb[4].mxu0 %vm658_vm6, %v3991_v14  ;;  %v872_v29 = vsel %vm5061_vm10, %v867_v57, %v871_v50  ;;  %v881_v30 = vrot.slane %v880_v47, 4  ;;  %v897_v32 = vshll.u32 %v5197_v16, 16  ;;  %v3957_v45 = vld [vmem:[#allocation2 + $0x34] sm:$0x1]  ;;  %v902_v37 = vshrl.u32 %v846_v6, 16 }
  0x63   : > { %4389 = vmatprep.mubr.msk.bf16.mxu0 %vm658_vm6, %v4013_v17  ;;  %v893_v13 = vrot.slane %v891_v34, 5  ;;  %v905_v38 = vshll.u32 %v846_v6, 16  ;;  %v911_v31 = vshll.u32 %v5199_v7, 16  ;;  %v4008_v49 = vrot.slane %v4000_v27, 9  ;;  %v289_v50 = vld [vmem:[%s4989_s12 + $0x1c] sm:$0xf] }
  0x64   : > { %v886_v44 = vsel %vm5061_vm10, %v881_v30, %v885_v22  ;;  %v899_v48 = vrot.slane %v897_v32, 5  ;;  %v2366_v43 = vrot.slane %v3955_v36, 5  ;;  %v904_v33 = vrot.slane %v902_v37, 4  ;;  %v3959_v61 = vld [vmem:[#allocation2 + $0x3c] sm:$0x1]  ;;  %s4196_s12 = sshll.u32 %s4780_s21, 10 }
  0x65   : > { %v3861_v53 = vcombine.low %v872_v29, %v886_v44  ;;  %v894_v41 = vor.u32 %v893_v13, %v890_v25  ;;  %v907_v59 = vrot.slane %v905_v38, 5  ;;  %v913_v21 = vrot.slane %v911_v31, 5  ;;  %v4002_v3 = vld [vmem:[#allocation2 + $0x38] sm:$0xe]  ;;  %v848_v26 = vld [vmem:[#allocation2 + $0x20] sm:$0xf]  ;;  %s5706_s21 = scalar_lea.hbm %s5769_s5, %s4196_s12 }
  0x66   : > { %v2367_v62 = vsel %vm5166_vm13, %v4008_v49, %v2366_v43  ;;  %v4009_v63 = vrot.slane %v4001_v42, 9  ;;  %v2370_v2 = vrot.slane %v3957_v45, 5  ;;  %v347_v9 = vshrl.u32 %v289_v50, 16  ;;  %v419_v12 = vld [vmem:[#allocation2 + $0x40] sm:$0xf] }
  0x67   : > { %4309 = vmatprep.mubr.msk.bf16.mxu1 %vm658_vm6, %v3861_v53  ;;  %v895_v5 = vrot.slane %v894_v41, 4  ;;  %v908_v6 = vor.u32 %v907_v59, %v904_v33  ;;  %v350_v0 = vshll.u32 %v289_v50, 16  ;;  %v4010_v14 = vrot.slane %v4002_v3, 9  ;;  %v5221_v57 = vld [vmem:[#allocation2 + $0x24] sm:$0x1] }
  0x68   : > { %v2371_v11 = vsel %vm5166_vm13, %v4009_v63, %v2370_v2  ;;  %v2374_v17 = vrot.slane %v3959_v61, 5  ;;  %v850_v47 = vld [vmem:[#allocation2 + $0x28] sm:$0xf]  ;;  %v349_v34 = vrot.slane %v347_v9, 7  ;;  %v422_v27 = vld [vmem:[#allocation2 + $0x44] sm:$0x1] }
  0x69   : > { %v900_v55 = vsel %vm5061_vm10, %v895_v5, %v899_v48  ;;  %v909_v22 = vrot.slane %v908_v6, 4  ;;  %v4015_v25 = vcombine.low %v2367_v62, %v2371_v11  ;;  %v5225_v29 = vld [vmem:[#allocation2 + $0x2c] sm:$0x1]  ;;  %v916_v32 = vshrl.u32 %v848_v26, 16  ;;  %v852_v13 = vld [vmem:[#allocation2 + $0x30] sm:$0xf] }
  0x6a   : > { %4390 = vmatmul.mubr.msk.bf16.vlgmr.msra.gmra.mrb[0].mxu0 %vm658_vm6, %v4014_v28  ;;  %v5230_v30 = vsel %vm5166_vm13, %v4010_v14, %v2374_v17  ;;  %v919_v36 = vshll.u32 %v848_v26, 16  ;;  %v925_v45 = vshll.u32 %v5221_v57, 16  ;;  %v352_v38 = vor.u32 %v350_v0, %v349_v34  ;;  %v5237_v28 = vld [vmem:[#allocation2 + $0x34] sm:$0x1]  ;;  %v854_v44 = vld [vmem:[#allocation2 + $0x38] sm:$0xf] }
  0x6b   : > { %4398 = vmatpush3.bf16.msra.mxu0 %v4977_v24  ;;  %v914_v37 = vsel %vm5061_vm10, %v909_v22, %v913_v21  ;;  %4393 = vmatprep.mubr.msk.bf16.mxu0 %vm658_vm6, %v4015_v25  ;;  %v353_v31 = vrot.slane %v349_v34, 4  ;;  %v930_v42 = vshrl.u32 %v850_v47, 16  ;;  %v918_v49 = vrot.slane %v916_v32, 4  ;;  %v3869_v53 = vld [vmem:[%s5767_s3 + $0x4] sm:$0xf] }
  0x6c   : > { %v3862_v48 = vcombine.low %v900_v55, %v914_v37  ;;  %v921_v43 = vrot.slane %v919_v36, 5  ;;  %v927_v50 = vrot.slane %v925_v45, 5  ;;  %v420_v24 = vsel %vm4982_vm5, %v352_v38, %v419_v12  ;;  %v5246_v61 = vld [vmem:[#allocation2 + $0x3c] sm:$0x1]  ;;  %4606 = vmatprep.subr.msk.bf16.mxu1 %vm671_vm0, %v3869_v53  ;;  %v4054_v39 = vld [vmem:[%s5766_s2 + $0x18] sm:$0xf] }
  0x6d   : > { %v423_v41 = vsel %vm4994_vm7, %v353_v31, %v422_v27  ;;  %v932_v33 = vrot.slane %v930_v42, 4  ;;  %v933_v59 = vshll.u32 %v850_v47, 16  ;;  %421 = vst [vmem:[#allocation2 + $0x40] sm:$0xf] %v420_v24  ;;  %v939_v62 = vshll.u32 %v5225_v29, 16  ;;  %4615 = vmatprep.subr.msk.bf16.mxu0 %vm671_vm0, %v4054_v39 }
  0x6e   : > { %4310 = vmatmul.mubr.msk.bf16.vlgmr.msra.gmra.mrb[0].mxu1 %vm658_vm6, %v3862_v48  ;;  %424 = vst [vmem:[#allocation2 + $0x44] sm:$0x1] %v423_v41  ;;  %v922_v21 = vor.u32 %v921_v43, %v918_v49  ;;  %v944_v63 = vshrl.u32 %v852_v13, 16  ;;  %v947_v2 = vshll.u32 %v852_v13, 16  ;;  %v953_v3 = vshll.u32 %v5237_v28, 16 }
  0x6f   : > { %v935_v56 = vrot.slane %v933_v59, 5  ;;  %v958_v5 = vshrl.u32 %v854_v44, 16  ;;  %v961_v6 = vshll.u32 %v854_v44, 16  ;;  %v4021_v9 = vld [vmem:[#allocation3 + $0x8] sm:$0xe]  ;;  %v941_v26 = vrot.slane %v939_v62, 5 }
  0x70   : > { %v923_v0 = vrot.slane %v922_v21, 4  ;;  %v946_v11 = vrot.slane %v944_v63, 4  ;;  %v949_v12 = vrot.slane %v947_v2, 5  ;;  %v4022_v14 = vld [vmem:[#allocation3 + $0x10] sm:$0xe]  ;;  %v955_v47 = vrot.slane %v953_v3, 5 }
  0x71   : > { %v936_v17 = vor.u32 %v935_v56, %v932_v33  ;;  %v960_v55 = vrot.slane %v958_v5, 4  ;;  %v963_v22 = vrot.slane %v961_v6, 5  ;;  %v4023_v25 = vld [vmem:[#allocation3 + $0x18] sm:$0xe]  ;;  %v967_v32 = vshll.u32 %v5246_v61, 16 }
  0x72   : > { %v928_v34 = vsel %vm5061_vm10, %v923_v0, %v927_v50  ;;  %v950_v27 = vor.u32 %v949_v12, %v946_v11  ;;  %v4029_v36 = vrot.slane %v4021_v9, 9  ;;  %v4024_v45 = vld [vmem:[#allocation3 + $0x20] sm:$0xe]  ;;  %v4030_v38 = vrot.slane %v4022_v14, 9  ;;  %v5272_v63 = vld [vmem:[#allocation3 + $0x4] sm:$0x1] }
  0x73   : > { %v937_v13 = vrot.slane %v936_v17, 4  ;;  %v964_v37 = vor.u32 %v963_v22, %v960_v55  ;;  %v1228_v31 = vsel %vm671_vm0, %v3869_v53, 0  ;;  %v969_v44 = vrot.slane %v967_v32, 5  ;;  %v1073_v62 = vld [vmem:[#allocation3] sm:$0xf] }
  0x74   : > { %v951_v42 = vrot.slane %v950_v27, 4  ;;  %v2509_v48 = vsel %vm5166_vm13, %v4029_v36, %v2508_v4  ;;  %4318 = vmatpush3.bf16.msra.mxu1 %v1228_v31  ;;  %v4031_v49 = vrot.slane %v4023_v25, 9  ;;  %v4003_v50 = vld [vmem:[#allocation2 + $0x40] sm:$0xe]  ;;  %v2513_v53 = vsel %vm5166_vm13, %v4030_v38, %v2512_v10  ;;  %v1075_v3 = vld [vmem:[#allocation3 + $0x8] sm:$0xf] }
  0x75   : > { %v3961_v43 = vld [vmem:[#allocation2 + $0x44] sm:$0x1]  ;;  %v942_v24 = vsel %vm5061_vm10, %v937_v13, %v941_v26  ;;  %v965_v41 = vrot.slane %v964_v37, 4  ;;  %v4032_v33 = vrot.slane %v4024_v45, 9  ;;  %v4011_v59 = vrot.slane %v4003_v50, 9 }
  0x76   : > { %v2378_v21 = vrot.slane %v3961_v43, 5  ;;  %v3863_v54 = vcombine.low %v928_v34, %v942_v24  ;;  %v956_v4 = vsel %vm5061_vm10, %v951_v42, %v955_v47  ;;  %v4038_v56 = vcombine.low %v2509_v48, %v2513_v53  ;;  %v5288_v5 = vld [vmem:[#allocation3 + $0xc] sm:$0x1]  ;;  %v1077_v6 = vld [vmem:[#allocation3 + $0x10] sm:$0xf] }
  0x77   : > { %v970_v2 = vsel %vm5061_vm10, %v965_v41, %v969_v44  ;;  %v5280_v60 = vsel %vm5166_vm13, %v4031_v49, %v2516_v46  ;;  %v5286_v10 = vsel %vm5166_vm13, %v4032_v33, %v2520_v51  ;;  %v2687_v0 = vsel %vm671_vm0, %v4054_v39, 0  ;;  %v5296_v19 = vld [vmem:[#allocation3 + $0x14] sm:$0x1]  ;;  %v1079_v14 = vld [vmem:[#allocation3 + $0x18] sm:$0xf] }
  0x78   : > { %v2379_v9 = vsel %vm5166_vm13, %v4011_v59, %v2378_v21  ;;  %4313 = vmatprep.mubr.msk.bf16.mxu1 %vm658_vm6, %v3863_v54  ;;  %v3864_v15 = vcombine.low %v956_v4, %v970_v2  ;;  %v4039_v46 = vcombine.low %v5280_v60, %v5286_v10  ;;  %v1090_v26 = vshrl.u32 %v1073_v62, 16  ;;  %v5302_v22 = vld [vmem:[#allocation3 + $0x1c] sm:$0x1]  ;;  %v4025_v32 = vld [vmem:[#allocation3 + $0x28] sm:$0xe] }
  0x79   : > { %v4016_v51 = vcombine.low %v5230_v30, %v2379_v9  ;;  %v1093_v11 = vshll.u32 %v1073_v62, 16  ;;  %v1099_v12 = vshll.u32 %v5272_v63, 16  ;;  %v1104_v17 = vshrl.u32 %v1075_v3, 16  ;;  %v4026_v48 = vld [vmem:[#allocation3 + $0x30] sm:$0xe] }
  0x7a   : > { %4314 = vmatmul.mubr.msk.bf16.gmra.mrb[4].mxu1 %vm658_vm6, %v3864_v15  ;;  %v1107_v47 = vshll.u32 %v1075_v3, 16  ;;  %v1113_v55 = vshll.u32 %v5288_v5, 16  ;;  %v1118_v25 = vshrl.u32 %v1077_v6, 16  ;;  %v1092_v39 = vrot.slane %v1090_v26, 4  ;;  %v4027_v41 = vld [vmem:[#allocation3 + $0x38] sm:$0xe] }
  0x7b   : > { %4394 = vmatmul.mubr.msk.bf16.gmra.mrb[4].mxu0 %vm658_vm6, %v4016_v51  ;;  %v1095_v34 = vrot.slane %v1093_v11, 5  ;;  %v1101_v27 = vrot.slane %v1099_v12, 5  ;;  %v1121_v30 = vshll.u32 %v1077_v6, 16  ;;  %v1106_v36 = vrot.slane %v1104_v17, 4  ;;  %v4028_v54 = vld [vmem:[#allocation3 + $0x40] sm:$0xe] }
  0x7c   : > { %4399 = vmatprep.mubr.msk.bf16.mxu0 %vm658_vm6, %v4038_v56  ;;  %v1109_v45 = vrot.slane %v1107_v47, 5  ;;  %v1115_v13 = vrot.slane %v1113_v55, 5  ;;  %v1120_v37 = vrot.slane %v1118_v25, 4  ;;  %v1127_v42 = vshll.u32 %v5296_v19, 16  ;;  %v1081_v60 = vld [vmem:[#allocation3 + $0x20] sm:$0xf] }
  0x7d   : > { %v1096_v38 = vor.u32 %v1095_v34, %v1092_v39  ;;  %v1123_v31 = vrot.slane %v1121_v30, 5  ;;  %v1132_v44 = vshrl.u32 %v1079_v14, 16  ;;  %v1135_v43 = vshll.u32 %v1079_v14, 16  ;;  %v5309_v10 = vld [vmem:[#allocation3 + $0x24] sm:$0x1] }
  0x7e   : > { %v1110_v49 = vor.u32 %v1109_v45, %v1106_v36  ;;  %v1141_v50 = vshll.u32 %v5302_v22, 16  ;;  %v4033_v24 = vrot.slane %v4025_v32, 9  ;;  %v1129_v59 = vrot.slane %v1127_v42, 5  ;;  %v1083_v51 = vld [vmem:[#allocation3 + $0x28] sm:$0xf] }
  0x7f   : > { %v1097_v53 = vrot.slane %v1096_v38, 4  ;;  %v1124_v33 = vor.u32 %v1123_v31, %v1120_v37  ;;  %v1134_v21 = vrot.slane %v1132_v44, 4  ;;  %v1137_v62 = vrot.slane %v1135_v43, 5  ;;  %v5317_v26 = vld [vmem:[%s5766_s2 + $0x8] sm:$0xf] }
  0x80   : > { %v1111_v4 = vrot.slane %v1110_v49, 4  ;;  %v1143_v2 = vrot.slane %v1141_v50, 5  ;;  %v2524_v56 = vrot.slane %v5083_v52, 5  ;;  %v4034_v9 = vrot.slane %v4026_v48, 9  ;;  %4607 = vmatprep.subr.msk.bf16.mxu1 %vm671_vm0, %v5317_v26  ;;  %v5331_v25 = vld [vmem:[#allocation3 + $0x2c] sm:$0x1] }
  0x81   : > { %v1102_v3 = vsel %vm5061_vm10, %v1097_v53, %v1101_v27  ;;  %v1125_v6 = vrot.slane %v1124_v33, 4  ;;  %v2528_v15 = vrot.slane %v5087_v35, 5  ;;  %v1138_v52 = vor.u32 %v1137_v62, %v1134_v21  ;;  %v4071_v39 = vld [vmem:[%s5767_s3 + $0x18] sm:$0xf]  ;;  %v1085_v38 = vld [vmem:[#allocation3 + $0x30] sm:$0xf] }
  0x82   : > { %v1116_v11 = vsel %vm5061_vm10, %v1111_v4, %v1115_v13  ;;  %v2525_v12 = vsel %vm5166_vm13, %v4033_v24, %v2524_v56  ;;  %v4035_v14 = vrot.slane %v4027_v41, 9  ;;  %v2532_v55 = vrot.slane %v5095_v23, 5  ;;  %v5347_v31 = vld [vmem:[#allocation3 + $0x34] sm:$0x1]  ;;  %v1087_v43 = vld [vmem:[#allocation3 + $0x38] sm:$0xf] }
  0x83   : > { %4400 = vmatmul.mubr.msk.bf16.vlgmr.msra.gmra.mrb[0].mxu0 %vm658_vm6, %v4039_v46  ;;  %v3870_v35 = vcombine.low %v1102_v3, %v1116_v11  ;;  %v1130_v17 = vsel %vm5061_vm10, %v1125_v6, %v1129_v59  ;;  %v2529_v47 = vsel %vm5166_vm13, %v4034_v9, %v2528_v15  ;;  %v1139_v34 = vrot.slane %v1138_v52, 4  ;;  %v5349_v50 = vld [vmem:[#allocation3 + $0x3c] sm:$0x1]  ;;  %v4687_v59 = vld [vmem:[#allocation2 + $0x10] ss:$8 sps:$4 sm:$0xff]  }
  0x84   : > { %4408 = vmatpush3.bf16.msra.mxu0 %v2687_v0  ;;  %v4040_v27 = vcombine.low %v2525_v12, %v2529_v47  ;;  %v4036_v30 = vrot.slane %v4028_v54, 9  ;;  %v2536_v46 = vrot.slane %v5151_v1, 5  ;;  %v2533_v32 = vsel %vm5166_vm13, %v4035_v14, %v2532_v55  ;;  %v1304_v52 = vld [vmem:[#allocation2 + $0x8] sm:$0xe] }
  0x85   : > { %4319 = vmatprep.mubr.msk.bf16.mxu1 %vm658_vm6, %v3870_v35  ;;  %v1146_v36 = vshrl.u32 %v1081_v60, 16  ;;  %v1149_v45 = vshll.u32 %v1081_v60, 16  ;;  %v1155_v23 = vshll.u32 %v5309_v10, 16  ;;  %4616 = vmatprep.subr.msk.bf16.mxu0 %vm671_vm0, %v4071_v39  ;;  %v1144_v13 = vsel %vm5061_vm10, %v1139_v34, %v1143_v2  ;;  %v1303_v2 = vld [vmem:[#allocation2] sm:$0xe] }
  0x86   : > { %4403 = vmatprep.mubr.msk.bf16.mxu0 %vm658_vm6, %v4040_v27  ;;  %v2537_v0 = vsel %vm5166_vm13, %v4036_v30, %v2536_v46  ;;  %v1160_v1 = vshrl.u32 %v1083_v51, 16  ;;  %v1163_v37 = vshll.u32 %v1083_v51, 16  ;;  %v3871_v42 = vcombine.low %v1130_v17, %v1144_v13  ;;  %v4688_v27 = vld [vmem:[#allocation2 + $0x20] ss:$8 sps:$4 sm:$0xff]   ;;  %v1305_v46 = vld [vmem:[#allocation2 + $0x10] sm:$0xe] }
  0x87   : > { %v4041_v44 = vcombine.low %v2533_v32, %v2537_v0  ;;  %v1148_v48 = vrot.slane %v1146_v36, 4  ;;  %v1151_v49 = vrot.slane %v1149_v45, 5  ;;  %v1157_v24 = vrot.slane %v1155_v23, 5  ;;  %v1306_v13 = vld [vmem:[#allocation2 + $0x18] sm:$0xe] }
  0x88   : > { %v1162_v41 = vrot.slane %v1160_v1, 4  ;;  %v1165_v53 = vrot.slane %v1163_v37, 5  ;;  %v1169_v33 = vshll.u32 %v5331_v25, 16  ;;  %4320 = vmatmul.mubr.msk.bf16.vlgmr.msra.gmra.mrb[0].mxu1 %vm658_vm6, %v3871_v42  ;;  %v1174_v54 = vshrl.u32 %v1085_v38, 16  ;;  %v4689_v0 = vld [vmem:[#allocation2 + $0x30] ss:$8 sps:$4 sm:$0xff]  }
  0x89   : > { %v1152_v21 = vor.u32 %v1151_v49, %v1148_v48  ;;  %v1177_v4 = vshll.u32 %v1085_v38, 16  ;;  %v1183_v62 = vshll.u32 %v5347_v31, 16  ;;  %v1188_v3 = vshrl.u32 %v1087_v43, 16 }
  0x8a   : > { %v1166_v56 = vor.u32 %v1165_v53, %v1162_v41  ;;  %v1171_v60 = vrot.slane %v1169_v33, 5  ;;  %v1191_v6 = vshll.u32 %v1087_v43, 16  ;;  %v1176_v15 = vrot.slane %v1174_v54, 4  ;;  %v1308_v43 = vld [vmem:[#allocation2 + $0x28] sm:$0xe] }
  0x8b   : > { %4404 = vmatmul.mubr.msk.bf16.gmra.mrb[4].mxu0 %vm658_vm6, %v4041_v44  ;;  %v1153_v9 = vrot.slane %v1152_v21, 4  ;;  %v1179_v51 = vrot.slane %v1177_v4, 5  ;;  %v1185_v11 = vrot.slane %v1183_v62, 5  ;;  %v1190_v14 = vrot.slane %v1188_v3, 4  ;;  %v1307_v44 = vld [vmem:[#allocation2 + $0x20] sm:$0xe] }
  0x8c   : > { %v1167_v12 = vrot.slane %v1166_v56, 4  ;;  %v1193_v35 = vrot.slane %v1191_v6, 5  ;;  %v1197_v17 = vshll.u32 %v5349_v50, 16  ;;  %4409 = vmatprep.mubr.msk.bf16.mxu0 %vm658_vm6, %v4687_v59  ;;  %v1389_v34 = vsel %vm671_vm0, %v5317_v26, 0  ;;  %v3903_v33 = vld [vmem:[%s5767_s3 + $0x8] sm:$0xf] }
  0x8d   : > { %v1158_v47 = vsel %vm5061_vm10, %v1153_v9, %v1157_v24  ;;  %v1180_v55 = vor.u32 %v1179_v51, %v1176_v15  ;;  %v2807_v30 = vsel %vm671_vm0, %v4071_v39, 0  ;;  %4328 = vmatpush3.bf16.msra.mxu1 %v1389_v34  ;;  %v3878_v23 = vrot.slane %v1303_v2, 9  ;;  %v1309_v59 = vld [vmem:[#allocation2 + $0x30] sm:$0xe]  ;;  %v1310_v21 = vld [vmem:[#allocation2 + $0x38] sm:$0xe] }
  0x8e   : > { %v1172_v32 = vsel %vm5061_vm10, %v1167_v12, %v1171_v60  ;;  %v1194_v36 = vor.u32 %v1193_v35, %v1190_v14  ;;  %v1199_v45 = vrot.slane %v1197_v17, 5  ;;  %v1332_v38 = vrot.slane %v5146_v58, 5  ;;  %4608 = vmatprep.subr.msk.bf16.mxu1 %vm671_vm0, %v3903_v33  ;;  %v4096_v2 = vld [vmem:[%s5766_s2 + $0x1c] sm:$0xf]  ;;  %v4690_v9 = vld [vmem:[#allocation2 + $0x40] ss:$8 sps:$4 sm:$0xff]  }
  0x8f   : > { %v3872_v1 = vcombine.low %v1158_v47, %v1172_v32  ;;  %v1181_v37 = vrot.slane %v1180_v55, 4  ;;  %v3879_v42 = vrot.slane %v1304_v52, 9  ;;  %v1336_v48 = vrot.slane %v5178_v20, 5  ;;  %v1464_v52 = vld [vmem:[#allocation3] sm:$0xe] }
  0x90   : > { %v1195_v26 = vrot.slane %v1194_v36, 4  ;;  %v3880_v39 = vrot.slane %v1305_v46, 9  ;;  %v1340_v49 = vrot.slane %v5197_v16, 5  ;;  %v1333_v41 = vsel %vm5166_vm13, %v3878_v23, %v1332_v38  ;;  %v1466_v47 = vld [vmem:[#allocation3 + $0x10] sm:$0xe] }
  0x91   : > { %4323 = vmatprep.mubr.msk.bf16.mxu1 %vm658_vm6, %v3872_v1  ;;  %v1186_v24 = vsel %vm5061_vm10, %v1181_v37, %v1185_v11  ;;  %v3881_v53 = vrot.slane %v1306_v13, 9  ;;  %v1344_v58 = vrot.slane %v5199_v7, 5  ;;  %v1337_v16 = vsel %vm5166_vm13, %v3879_v42, %v1336_v48  ;;  %v4691_v11 = vld [vmem:[#allocation3 + $0x10] ss:$8 sps:$4 sm:$0xff]   ;;  %v1468_v1 = vld [vmem:[#allocation3 + $0x20] sm:$0xe] }
  0x92   : > { %v1200_v20 = vsel %vm5061_vm10, %v1195_v26, %v1199_v45  ;;  %v3887_v4 = vcombine.low %v1333_v41, %v1337_v16  ;;  %v3882_v62 = vrot.slane %v1307_v44, 9  ;;  %v1348_v7 = vrot.slane %v5221_v57, 5  ;;  %v1467_v55 = vld [vmem:[#allocation3 + $0x18] sm:$0xe]  ;;  %v1469_v37 = vld [vmem:[#allocation3 + $0x28] sm:$0xe] }
  0x93   : > { %v3873_v54 = vcombine.low %v1186_v24, %v1200_v20  ;;  %4410 = vmatmul.mubr.msk.bf16.vlgmr.msra.gmra.mrb[0].mxu0 %vm658_vm6, %v4688_v27  ;;  %v3883_v56 = vrot.slane %v1308_v43, 9  ;;  %v1352_v60 = vrot.slane %v5225_v29, 5  ;;  %v1341_v3 = vsel %vm5166_vm13, %v3880_v39, %v1340_v49  ;;  %v1465_v29 = vld [vmem:[#allocation3 + $0x8] sm:$0xe]  ;;  %v1470_v48 = vld [vmem:[#allocation3 + $0x30] sm:$0xe] }
  0x94   : > { %4418 = vmatpush3.bf16.msra.mxu0 %v2807_v30  ;;  %4413 = vmatprep.mubr.msk.bf16.mxu0 %vm658_vm6, %v4689_v0  ;;  %v1345_v6 = vsel %vm5166_vm13, %v3881_v53, %v1344_v58  ;;  %v3884_v57 = vrot.slane %v1309_v59, 9  ;;  %v1356_v15 = vrot.slane %v5237_v28, 5  ;;  %v3885_v51 = vrot.slane %v1310_v21, 9  ;;  %v4692_v39 = vld [vmem:[#allocation3 + $0x20] ss:$8 sps:$4 sm:$0xff]  }
  0x95   : > { %4324 = vmatmul.mubr.msk.bf16.gmra.mrb[4].mxu1 %vm658_vm6, %v3873_v54  ;;  %4617 = vmatprep.subr.msk.bf16.mxu0 %vm671_vm0, %v4096_v2  ;;  %v1349_v12 = vsel %vm5166_vm13, %v3882_v62, %v1348_v7  ;;  %v1353_v14 = vsel %vm5166_vm13, %v3883_v56, %v1352_v60  ;;  %v1360_v35 = vrot.slane %v5246_v61, 5  ;;  %v3895_v17 = vrot.slane %v1464_v52, 9  ;;  %v1471_v43 = vld [vmem:[#allocation3 + $0x38] sm:$0xe]  ;;  %v4080_v20 = vld [vmem:[#allocation2 + $0x10] sm:$0xf] }
  0x96   : > { %4329 = vmatprep.mubr.msk.bf16.mxu1 %vm658_vm6, %v3887_v4  ;;  %v3888_v34 = vcombine.low %v1341_v3, %v1345_v6  ;;  %v1490_v27 = vrot.slane %v5272_v63, 5  ;;  %v3896_v30 = vrot.slane %v1465_v29, 9  ;;  %v1494_v28 = vrot.slane %v5288_v5, 5  ;;  %v4693_v58 = vld [vmem:[#allocation3 + $0x30] ss:$8 sps:$4 sm:$0xff]  }
  0x97   : > { %v3897_v46 = vrot.slane %v1466_v47, 9  ;;  %v1498_v32 = vrot.slane %v5296_v19, 5  ;;  %v3898_v36 = vrot.slane %v1467_v55, 9  ;;  %v1502_v45 = vrot.slane %v5302_v22, 5  ;;  %v4082_v21 = vld [vmem:[#allocation2 + $0x18] sm:$0xf] }
  0x98   : > { %v3889_v23 = vcombine.low %v1349_v12, %v1353_v14  ;;  %v5407_v13 = vsel %vm5166_vm13, %v3884_v57, %v1356_v15  ;;  %v1547_v61 = vsel %vm671_vm0, %v3903_v33, 0  ;;  %v3037_v0 = vsel %vm671_vm0, %v4096_v2, 0  ;;  %v5449_v54 = vld [vmem:[#allocation2 + $0x1c] sm:$0x1]  ;;  %v4084_v60 = vld [vmem:[#allocation2 + $0x20] sm:$0xf] }
  0x99   : > { %v1361_v63 = vsel %vm5166_vm13, %v3885_v51, %v1360_v35  ;;  %v5416_v5 = vsel %vm5166_vm13, %v3895_v17, %v1490_v27  ;;  %v5420_v19 = vsel %vm5166_vm13, %v3896_v30, %v1494_v28  ;;  %v5424_v22 = vsel %vm5166_vm13, %v3897_v46, %v1498_v32  ;;  %v4121_v56 = vld [vmem:[%s5767_s3 + $0x1c] sm:$0xf]  ;;  %v5467_v15 = vld [vmem:[#allocation2 + $0x24] sm:$0x1]  ;;  %v4086_v12 = vld [vmem:[#allocation2 + $0x28] sm:$0xf] }
  0x9a   : > { %v5429_v38 = vsel %vm5166_vm13, %v3898_v36, %v1502_v45  ;;  %v3899_v42 = vrot.slane %v1468_v1, 9  ;;  %v1506_v44 = vrot.slane %v5309_v10, 5  ;;  %v3900_v26 = vrot.slane %v1469_v37, 9  ;;  %v3920_v10 = vld [vmem:[%s5766_s2 + $0xc] sm:$0xf] }
  0x9b   : > { %4414 = vmatmul.mubr.msk.bf16.gmra.mrb[4].mxu0 %vm658_vm6, %v4690_v9  ;;  %v1510_v49 = vrot.slane %v5331_v25, 5  ;;  %v3901_v24 = vrot.slane %v1470_v48, 9  ;;  %v1514_v41 = vrot.slane %v5347_v31, 5  ;;  %v1518_v53 = vrot.slane %v5349_v50, 5  ;;  %v5447_v50 = vld [vmem:[#allocation2 + $0x14] sm:$0x1] }
  0x9c   : > { %4419 = vmatprep.mubr.msk.bf16.mxu0 %vm658_vm6, %v4691_v11  ;;  %v3902_v33 = vrot.slane %v1471_v43, 9  ;;  %v1890_v16 = vshll.u32 %v5176_v40, 16  ;;  %v3890_v25 = vcombine.low %v5407_v13, %v1361_v63  ;;  %v3904_v59 = vcombine.low %v5416_v5, %v5420_v19  ;;  %v5475_v47 = vld [vmem:[#allocation2 + $0x2c] sm:$0x1] }
  0x9d   : > { %4330 = vmatmul.mubr.msk.bf16.vlgmr.msra.gmra.mrb[0].mxu1 %vm658_vm6, %v3888_v34  ;;  %v3905_v31 = vcombine.low %v5424_v22, %v5429_v38  ;;  %v5453_v4 = vsel %vm5166_vm13, %v3899_v42, %v1506_v44  ;;  %v5457_v62 = vsel %vm5166_vm13, %v3900_v26, %v1510_v49  ;;  %v2899_v7 = vshrl.u32 %v4080_v20, 16 }
  0x9e   : > { %4333 = vmatprep.mubr.msk.bf16.mxu1 %vm658_vm6, %v3889_v23  ;;  %4338 = vmatpush3.bf16.msra.mxu1 %v1547_v61  ;;  %v2902_v2 = vshll.u32 %v4080_v20, 16  ;;  %v5464_v3 = vsel %vm5166_vm13, %v3901_v24, %v1514_v41  ;;  %v2908_v6 = vshll.u32 %v5447_v50, 16  ;;  %v2913_v9 = vshrl.u32 %v4082_v21, 16  ;;  %v4694_v23 = vld [vmem:[#allocation3 + $0x40] ss:$8 sps:$4 sm:$0xff]  }
  0x9f   : > { %4609 = vmatprep.subr.msk.bf16.mxu1 %vm671_vm0, %v3920_v10  ;;  %v2916_v57 = vshll.u32 %v4082_v21, 16  ;;  %v5471_v51 = vsel %vm5166_vm13, %v3902_v33, %v1518_v53  ;;  %v2901_v11 = vrot.slane %v2899_v7, 4  ;;  %v2922_v29 = vshll.u32 %v5449_v54, 16  ;;  %v4088_v41 = vld [vmem:[#allocation2 + $0x30] sm:$0xf] }
  0xa0   : > { %v2904_v52 = vrot.slane %v2902_v2, 5  ;;  %v2910_v14 = vrot.slane %v2908_v6, 5  ;;  %v2915_v35 = vrot.slane %v2913_v9, 4  ;;  %v2927_v55 = vshrl.u32 %v4084_v60, 16  ;;  %v5493_v53 = vld [vmem:[#allocation2 + $0x34] sm:$0x1] }
  0xa1   : > { %v2918_v17 = vrot.slane %v2916_v57, 5  ;;  %v2924_v27 = vrot.slane %v2922_v29, 5  ;;  %v2930_v30 = vshll.u32 %v4084_v60, 16  ;;  %v2936_v28 = vshll.u32 %v5467_v15, 16  ;;  %v5495_v20 = vld [vmem:[#allocation2 + $0x3c] sm:$0x1] }
  0xa2   : > { %v2905_v34 = vor.u32 %v2904_v52, %v2901_v11  ;;  %v2929_v32 = vrot.slane %v2927_v55, 4  ;;  %v2941_v36 = vshrl.u32 %v4086_v12, 16  ;;  %v2944_v45 = vshll.u32 %v4086_v12, 16  ;;  %v4092_v2 = vld [vmem:[#allocation2 + $0x40] sm:$0xf] }
  0xa3   : > { %4420 = vmatmul.mubr.msk.bf16.vlgmr.msra.gmra.mrb[0].mxu0 %vm658_vm6, %v4692_v39  ;;  %v2919_v46 = vor.u32 %v2918_v17, %v2915_v35  ;;  %v1669_v61 = vsel %vm671_vm0, %v3920_v10, 0  ;;  %v2950_v63 = vshll.u32 %v5475_v47, 16  ;;  %v2938_v19 = vrot.slane %v2936_v28, 5  ;;  %v5503_v57 = vld [vmem:[#allocation2 + $0x44] sm:$0x1] }
  0xa4   : > { %4428 = vmatpush3.bf16.msra.mxu0 %v3037_v0  ;;  %4423 = vmatprep.mubr.msk.bf16.mxu0 %vm658_vm6, %v4693_v58  ;;  %v2906_v13 = vrot.slane %v2905_v34, 4  ;;  %v2932_v0 = vrot.slane %v2930_v30, 5  ;;  %v2943_v1 = vrot.slane %v2941_v36, 4  ;;  %v2946_v37 = vrot.slane %v2944_v45, 5  ;;  %v4090_v58 = vld [vmem:[#allocation2 + $0x38] sm:$0xf] }
  0xa5   : > { %4334 = vmatmul.mubr.msk.bf16.gmra.mrb[4].mxu1 %vm658_vm6, %v3890_v25  ;;  %4618 = vmatprep.subr.msk.bf16.mxu0 %vm671_vm0, %v4121_v56  ;;  %v2920_v5 = vrot.slane %v2919_v46, 4  ;;  %v2952_v26 = vrot.slane %v2950_v63, 5  ;;  %v3267_v48 = vsel %vm671_vm0, %v4121_v56, 0  ;;  %v3906_v39 = vcombine.low %v5453_v4, %v5457_v62  ;;  %v5512_v34 = vld [vmem:[#allocation2 + $0x4c] sm:$0x1] }
  0xa6   : > { %4339 = vmatprep.mubr.msk.bf16.mxu1 %vm658_vm6, %v3904_v59  ;;  %v2911_v42 = vsel %vm5061_vm10, %v2906_v13, %v2910_v14  ;;  %v2933_v44 = vor.u32 %v2932_v0, %v2929_v32  ;;  %v3907_v49 = vcombine.low %v5464_v3, %v5471_v51  ;;  %v2947_v24 = vor.u32 %v2946_v37, %v2943_v1  ;;  %v4094_v14 = vld [vmem:[#allocation2 + $0x48] sm:$0xf]  ;;  %v4109_v51 = vld [vmem:[#allocation3 + $0x20] sm:$0xf] }
  0xa7   : > { %v2925_v43 = vsel %vm5061_vm10, %v2920_v5, %v2924_v27  ;;  %v2955_v25 = vshrl.u32 %v4088_v41, 16  ;;  %v2958_v59 = vshll.u32 %v4088_v41, 16  ;;  %v2964_v4 = vshll.u32 %v5493_v53, 16  ;;  %v4695_v28 = vld [vmem:[#allocation2 + $0x8] ss:$8 sps:$4 sm:$0xff]  }
  0xa8   : > { %v4097_v33 = vcombine.low %v2911_v42, %v2925_v43  ;;  %v2934_v10 = vrot.slane %v2933_v44, 4  ;;  %v2948_v21 = vrot.slane %v2947_v24, 4  ;;  %v2969_v62 = vshrl.u32 %v4090_v58, 16  ;;  %v3937_v44 = vld [vmem:[%s5767_s3 + $0xc] sm:$0xf] }
  0xa9   : > { %v2972_v7 = vshll.u32 %v4090_v58, 16  ;;  %v2957_v60 = vrot.slane %v2955_v25, 4  ;;  %v2960_v6 = vrot.slane %v2958_v59, 5  ;;  %v2978_v9 = vshll.u32 %v5495_v20, 16  ;;  %v4107_v41 = vld [vmem:[#allocation3 + $0x18] sm:$0xf] }
  0xaa   : > { %v2939_v56 = vsel %vm5061_vm10, %v2934_v10, %v2938_v19  ;;  %v2953_v11 = vsel %vm5061_vm10, %v2948_v21, %v2952_v26  ;;  %v2966_v52 = vrot.slane %v2964_v4, 5  ;;  %v2971_v29 = vrot.slane %v2969_v62, 4  ;;  %v4105_v26 = vld [vmem:[#allocation3 + $0x10] sm:$0xf]  ;;  %v5528_v58 = vld [vmem:[#allocation3 + $0x1c] sm:$0x1] }
  0xab   : > { %4424 = vmatmul.mubr.msk.bf16.gmra.mrb[4].mxu0 %vm658_vm6, %v4694_v23  ;;  %v2974_v12 = vrot.slane %v2972_v7, 5  ;;  %v4098_v35 = vcombine.low %v2939_v56, %v2953_v11  ;;  %v2961_v17 = vor.u32 %v2960_v6, %v2957_v60  ;;  %v2980_v55 = vrot.slane %v2978_v9, 5  ;;  %v5544_v11 = vld [vmem:[#allocation3 + $0x24] sm:$0x1] }
  0xac   : > { %4429 = vmatprep.mubr.msk.bf16.mxu0 %vm658_vm6, %v4097_v33  ;;  %v2983_v27 = vshrl.u32 %v4092_v2, 16  ;;  %v2986_v22 = vshll.u32 %v4092_v2, 16  ;;  %v2992_v38 = vshll.u32 %v5503_v57, 16  ;;  %v3000_v36 = vshll.u32 %v4094_v14, 16 }
  0xad   : > { %4340 = vmatmul.mubr.msk.bf16.vlgmr.msra.gmra.mrb[0].mxu1 %vm658_vm6, %v3905_v31  ;;  %v2975_v30 = vor.u32 %v2974_v12, %v2971_v29  ;;  %v2997_v31 = vshrl.u32 %v4094_v14, 16  ;;  %v2962_v46 = vrot.slane %v2961_v17, 4  ;;  %v3006_v45 = vshll.u32 %v5512_v34, 16  ;;  %v5549_v17 = vld [vmem:[#allocation3 + $0x2c] sm:$0x1] }
  0xae   : > { %4343 = vmatprep.mubr.msk.bf16.mxu1 %vm658_vm6, %v3906_v39  ;;  %4348 = vmatpush3.bf16.msra.mxu1 %v1669_v61  ;;  %v2985_v32 = vrot.slane %v2983_v27, 4  ;;  %v2988_v13 = vrot.slane %v2986_v22, 5  ;;  %v3368_v0 = vrot.slane %v5447_v50, 5  ;;  %v2994_v5 = vrot.slane %v2992_v38, 5  ;;  %v5525_v39 = vld [vmem:[#allocation3 + $0x14] sm:$0x1] }
  0xaf   : > { %v2976_v23 = vrot.slane %v2975_v30, 4  ;;  %v2999_v61 = vrot.slane %v2997_v31, 4  ;;  %v2967_v63 = vsel %vm5061_vm10, %v2962_v46, %v2966_v52  ;;  %v3002_v19 = vrot.slane %v3000_v36, 5  ;;  %4610 = vmatprep.subr.msk.bf16.mxu1 %vm671_vm0, %v3937_v44  ;;  %v4697_v38 = vld [vmem:[#allocation2 + $0x28] ss:$8 sps:$4 sm:$0xff]  }
  0xb0   : > { %v3008_v1 = vrot.slane %v3006_v45, 5  ;;  %v2989_v42 = vor.u32 %v2988_v13, %v2985_v32  ;;  %v3129_v33 = vshrl.u32 %v4105_v26, 16  ;;  %v3132_v10 = vshll.u32 %v4105_v26, 16  ;;  %v4113_v26 = vld [vmem:[#allocation3 + $0x30] sm:$0xf] }
  0xb1   : > { %v2981_v37 = vsel %vm5061_vm10, %v2976_v23, %v2980_v55  ;;  %v3003_v24 = vor.u32 %v3002_v19, %v2999_v61  ;;  %v3138_v59 = vshll.u32 %v5525_v39, 16  ;;  %v3143_v21 = vshrl.u32 %v4107_v41, 16 }
  0xb2   : > { %v4099_v43 = vcombine.low %v2967_v63, %v2981_v37  ;;  %v2990_v25 = vrot.slane %v2989_v42, 4  ;;  %v3146_v4 = vshll.u32 %v4107_v41, 16  ;;  %v3131_v7 = vrot.slane %v3129_v33, 4  ;;  %v5561_v41 = vld [vmem:[#allocation3 + $0x34] sm:$0x1] }
  0xb3   : > { %4430 = vmatmul.mubr.msk.bf16.vlgmr.msra.gmra.mrb[0].mxu0 %vm658_vm6, %v4098_v35  ;;  %v3004_v62 = vrot.slane %v3003_v24, 4  ;;  %v3134_v2 = vrot.slane %v3132_v10, 5  ;;  %v3152_v3 = vshll.u32 %v5528_v58, 16  ;;  %v3140_v60 = vrot.slane %v3138_v59, 5  ;;  %v4111_v35 = vld [vmem:[#allocation3 + $0x28] sm:$0xf] }
  0xb4   : > { %4438 = vmatpush3.bf16.msra.mxu0 %v3267_v48  ;;  %v4146_v48 = vld [vmem:[%s5766_s2 + $0x20] sm:$0xf]  ;;  %4433 = vmatprep.mubr.msk.bf16.mxu0 %vm658_vm6, %v4099_v43  ;;  %v2995_v56 = vsel %vm5061_vm10, %v2990_v25, %v2994_v5  ;;  %v3145_v6 = vrot.slane %v3143_v21, 4  ;;  %v3148_v9 = vrot.slane %v3146_v4, 5  ;;  %v1789_v14 = vsel %vm671_vm0, %v3937_v44, 0 }
  0xb5   : > { %4344 = vmatmul.mubr.msk.bf16.gmra.mrb[4].mxu1 %vm658_vm6, %v3907_v49  ;;  %v4696_v49 = vld [vmem:[#allocation2 + $0x18] ss:$8 sps:$4 sm:$0xff]   ;;  %4619 = vmatprep.subr.msk.bf16.mxu0 %vm671_vm0, %v4146_v48  ;;  %v3009_v52 = vsel %vm5061_vm10, %v3004_v62, %v3008_v1  ;;  %v3135_v29 = vor.u32 %v3134_v2, %v3131_v7  ;;  %v3154_v12 = vrot.slane %v3152_v3, 5  ;;  %v3157_v30 = vshrl.u32 %v4109_v51, 16  ;;  %v4115_v33 = vld [vmem:[#allocation3 + $0x38] sm:$0xf] }
  0xb6   : > { %4349 = vmatprep.mubr.msk.bf16.mxu1 %vm658_vm6, %v4695_v28  ;;  %v4100_v55 = vcombine.low %v2995_v56, %v3009_v52  ;;  %v3149_v27 = vor.u32 %v3148_v9, %v3145_v6  ;;  %v3160_v22 = vshll.u32 %v4109_v51, 16  ;;  %v3166_v28 = vshll.u32 %v5544_v11, 16  ;;  %v5563_v10 = vld [vmem:[#allocation3 + $0x3c] sm:$0x1]  ;;  %v4698_v25 = vld [vmem:[#allocation2 + $0x38] ss:$8 sps:$4 sm:$0xff]  }
  0xb7   : > { %v3136_v31 = vrot.slane %v3135_v29, 4  ;;  %v3171_v46 = vshrl.u32 %v4111_v35, 16  ;;  %v3174_v32 = vshll.u32 %v4111_v35, 16  ;;  %v3159_v45 = vrot.slane %v3157_v30, 4  ;;  %v4117_v7 = vld [vmem:[#allocation3 + $0x40] sm:$0xf] }
  0xb8   : > { %v3150_v36 = vrot.slane %v3149_v27, 4  ;;  %v3162_v23 = vrot.slane %v3160_v22, 5  ;;  %v3180_v13 = vshll.u32 %v5549_v17, 16  ;;  %v3168_v63 = vrot.slane %v3166_v28, 5  ;;  %v4699_v2 = vld [vmem:[#allocation3 + $0x8] ss:$8 sps:$4 sm:$0xff]  }
  0xb9   : > { %v3141_v61 = vsel %vm5061_vm10, %v3136_v31, %v3140_v60  ;;  %v3173_v5 = vrot.slane %v3171_v46, 4  ;;  %v3176_v19 = vrot.slane %v3174_v32, 5  ;;  %v3425_v44 = vsel %vm671_vm0, %v4146_v48, 0  ;;  %v5568_v56 = vld [vmem:[#allocation3 + $0x44] sm:$0x1] }
  0xba   : > { %v3155_v1 = vsel %vm5061_vm10, %v3150_v36, %v3154_v12  ;;  %v3163_v37 = vor.u32 %v3162_v23, %v3159_v45  ;;  %v3182_v42 = vrot.slane %v3180_v13, 5  ;;  %v3185_v21 = vshrl.u32 %v4113_v26, 16  ;;  %v4119_v29 = vld [vmem:[#allocation3 + $0x48] sm:$0xf]  ;;  %v5574_v27 = vld [vmem:[#allocation3 + $0x4c] sm:$0x1] }
  0xbb   : > { %4434 = vmatmul.mubr.msk.bf16.gmra.mrb[4].mxu0 %vm658_vm6, %v4100_v55  ;;  %v4122_v43 = vcombine.low %v3141_v61, %v3155_v1  ;;  %v3177_v24 = vor.u32 %v3176_v19, %v3173_v5  ;;  %v3188_v4 = vshll.u32 %v4113_v26, 16  ;;  %v3194_v62 = vshll.u32 %v5561_v41, 16 }
  0xbc   : > { %v3164_v59 = vrot.slane %v3163_v37, 4  ;;  %v3199_v3 = vshrl.u32 %v4115_v33, 16  ;;  %v3202_v51 = vshll.u32 %v4115_v33, 16  ;;  %v3187_v6 = vrot.slane %v3185_v21, 4  ;;  %v4700_v37 = vld [vmem:[#allocation3 + $0x18] ss:$8 sps:$4 sm:$0xff]  }
  0xbd   : > { %4350 = vmatmul.mubr.msk.bf16.vlgmr.msra.gmra.mrb[0].mxu1 %vm658_vm6, %v4696_v49  ;;  %4439 = vmatprep.mubr.msk.bf16.mxu0 %vm658_vm6, %v4122_v43  ;;  %v3178_v48 = vrot.slane %v3177_v24, 4  ;;  %v3208_v49 = vshll.u32 %v5563_v10, 16  ;;  %v3190_v9 = vrot.slane %v3188_v4, 5  ;;  %v3196_v52 = vrot.slane %v3194_v62, 5  ;;  %v3962_v24 = vld [vmem:[%s5766_s2 + $0x10] sm:$0xf] }
  0xbe   : > { %4353 = vmatprep.mubr.msk.bf16.mxu1 %vm658_vm6, %v4697_v38  ;;  %4358 = vmatpush3.bf16.msra.mxu1 %v1789_v14  ;;  %v3169_v60 = vsel %vm5061_vm10, %v3164_v59, %v3168_v63  ;;  %v3201_v14 = vrot.slane %v3199_v3, 4  ;;  %v3204_v35 = vrot.slane %v3202_v51, 5  ;;  %v3213_v38 = vshrl.u32 %v4117_v7, 16  ;;  %v4701_v59 = vld [vmem:[#allocation3 + $0x28] ss:$8 sps:$4 sm:$0xff]  }
  0xbf   : > { %v3183_v12 = vsel %vm5061_vm10, %v3178_v48, %v3182_v42  ;;  %v3210_v55 = vrot.slane %v3208_v49, 5  ;;  %v3191_v22 = vor.u32 %v3190_v9, %v3187_v6  ;;  %v3216_v31 = vshll.u32 %v4117_v7, 16  ;;  %4611 = vmatprep.subr.msk.bf16.mxu1 %vm671_vm0, %v3962_v24  ;;  %v4130_v21 = vld [vmem:[#allocation2 + $0x10] sm:$0xe]  ;;  %v4131_v4 = vld [vmem:[#allocation2 + $0x18] sm:$0xe] }
  0xc0   : > { %v4123_v30 = vcombine.low %v3169_v60, %v3183_v12  ;;  %v3205_v28 = vor.u32 %v3204_v35, %v3201_v14  ;;  %v3222_v46 = vshll.u32 %v5568_v56, 16  ;;  %v3227_v32 = vshrl.u32 %v4119_v29, 16  ;;  %v4171_v62 = vld [vmem:[%s5767_s3 + $0x20] sm:$0xf]  ;;  %v4133_v60 = vld [vmem:[#allocation2 + $0x28] sm:$0xe] }
  0xc1   : > { %v3230_v36 = vshll.u32 %v4119_v29, 16  ;;  %v3192_v45 = vrot.slane %v3191_v22, 4  ;;  %v3215_v23 = vrot.slane %v3213_v38, 4  ;;  %v3218_v13 = vrot.slane %v3216_v31, 5  ;;  %v3946_v35 = vld [vmem:[#allocation2 + $0x8] sm:$0xf] }
  0xc2   : > { %v3236_v61 = vshll.u32 %v5574_v27, 16  ;;  %v3206_v63 = vrot.slane %v3205_v28, 4  ;;  %v3224_v5 = vrot.slane %v3222_v46, 5  ;;  %v3229_v19 = vrot.slane %v3227_v32, 4  ;;  %v3950_v46 = vld [vmem:[#allocation2 + $0x18] sm:$0xf] }
  0xc3   : > { %4440 = vmatmul.mubr.msk.bf16.vlgmr.msra.gmra.mrb[0].mxu0 %vm658_vm6, %v4123_v30  ;;  %v3232_v1 = vrot.slane %v3230_v36, 5  ;;  %v3197_v42 = vsel %vm5061_vm10, %v3192_v45, %v3196_v52  ;;  %v3219_v26 = vor.u32 %v3218_v13, %v3215_v23  ;;  %v3372_v33 = vrot.slane %v5449_v54, 5  ;;  %v4132_v54 = vld [vmem:[#allocation2 + $0x20] sm:$0xe] }
  0xc4   : > { %4448 = vmatpush3.bf16.msra.mxu0 %v3425_v44  ;;  %v3238_v43 = vrot.slane %v3236_v61, 5  ;;  %v3211_v44 = vsel %vm5061_vm10, %v3206_v63, %v3210_v55  ;;  %v4139_v3 = vrot.slane %v4131_v4, 9  ;;  %v2019_v49 = vsel %vm671_vm0, %v3962_v24, 0  ;;  %v3948_v55 = vld [vmem:[#allocation2 + $0x10] sm:$0xf] }
  0xc5   : > { %4354 = vmatmul.mubr.msk.bf16.gmra.mrb[4].mxu1 %vm658_vm6, %v4698_v25  ;;  %v3233_v25 = vor.u32 %v3232_v1, %v3229_v19  ;;  %v4124_v7 = vcombine.low %v3197_v42, %v3211_v44  ;;  %v3220_v48 = vrot.slane %v3219_v26, 4  ;;  %4620 = vmatprep.subr.msk.bf16.mxu0 %vm671_vm0, %v4171_v62  ;;  %v4140_v6 = vrot.slane %v4132_v54, 9  ;;  %v4702_v1 = vld [vmem:[#allocation3 + $0x38] ss:$8 sps:$4 sm:$0xff]   ;;  %v4705_v54 = vld [vmem:[#allocation2 + $0x24] sm:$0x1] }
  0xc6   : > { %4359 = vmatprep.mubr.msk.bf16.mxu1 %vm658_vm6, %v4699_v2  ;;  %v4138_v2 = vrot.slane %v4130_v21, 9  ;;  %v3376_v9 = vrot.slane %v5467_v15, 5  ;;  %v3373_v12 = vsel %vm5166_vm13, %v4139_v3, %v3372_v33  ;;  %v4141_v14 = vrot.slane %v4133_v60, 9 }
  0xc7   : > { %v3234_v51 = vrot.slane %v3233_v25, 4  ;;  %4443 = vmatprep.mubr.msk.bf16.mxu0 %vm658_vm6, %v4124_v7  ;;  %v3225_v52 = vsel %vm5061_vm10, %v3220_v48, %v3224_v5  ;;  %v3380_v38 = vrot.slane %v5475_v47, 5  ;;  %v1881_v31 = vshrl.u32 %v3946_v35, 16  ;;  %v3952_v47 = vld [vmem:[#allocation2 + $0x20] sm:$0xf] }
  0xc8   : > { %v3369_v29 = vsel %vm5166_vm13, %v4138_v2, %v3368_v0  ;;  %v3377_v22 = vsel %vm5166_vm13, %v4140_v6, %v3376_v9  ;;  %v3583_v0 = vsel %vm671_vm0, %v4171_v62, 0  ;;  %v1884_v28 = vshll.u32 %v3946_v35, 16  ;;  %v4703_v5 = vld [vmem:[#allocation2 + $0x14] sm:$0x1]  ;;  %v4134_v25 = vld [vmem:[#allocation2 + $0x30] sm:$0xe] }
  0xc9   : > { %v3239_v30 = vsel %vm5061_vm10, %v3234_v51, %v3238_v43  ;;  %v4147_v15 = vcombine.low %v3369_v29, %v3373_v12  ;;  %v3381_v32 = vsel %vm5166_vm13, %v4141_v14, %v3380_v38  ;;  %v1892_v36 = vrot.slane %v1890_v16, 5  ;;  %v4704_v16 = vld [vmem:[#allocation2 + $0x1c] sm:$0x1]  ;;  %v4135_v7 = vld [vmem:[#allocation2 + $0x38] sm:$0xe] }
  0xca   : > { %v4125_v50 = vcombine.low %v3225_v52, %v3239_v30  ;;  %v1895_v45 = vshrl.u32 %v3948_v55, 16  ;;  %v1898_v23 = vshll.u32 %v3948_v55, 16  ;;  %v4148_v13 = vcombine.low %v3377_v22, %v3381_v32  ;;  %v4136_v52 = vld [vmem:[#allocation2 + $0x40] sm:$0xe]  ;;  %v4137_v55 = vld [vmem:[#allocation2 + $0x48] sm:$0xe] }
  0xcb   : > { %v1883_v61 = vrot.slane %v1881_v31, 4  ;;  %v1886_v63 = vrot.slane %v1884_v28, 5  ;;  %v1904_v19 = vshll.u32 %v4703_v5, 16  ;;  %v1909_v26 = vshrl.u32 %v3950_v46, 16  ;;  %v4706_v5 = vld [vmem:[#allocation2 + $0x2c] sm:$0x1] }
  0xcc   : > { %4444 = vmatmul.mubr.msk.bf16.gmra.mrb[4].mxu0 %vm658_vm6, %v4125_v50  ;;  %v1900_v42 = vrot.slane %v1898_v23, 5  ;;  %v1912_v43 = vshll.u32 %v3950_v46, 16  ;;  %v1918_v33 = vshll.u32 %v4704_v16, 16  ;;  %v1923_v44 = vshrl.u32 %v3952_v47, 16  ;;  %v3954_v50 = vld [vmem:[#allocation2 + $0x28] sm:$0xf] }
  0xcd   : > { %4360 = vmatmul.mubr.msk.bf16.vlgmr.msra.gmra.mrb[0].mxu1 %vm658_vm6, %v4700_v37  ;;  %4449 = vmatprep.mubr.msk.bf16.mxu0 %vm658_vm6, %v4147_v15  ;;  %v1897_v37 = vrot.slane %v1895_v45, 4  ;;  %v1887_v24 = vor.u32 %v1886_v63, %v1883_v61  ;;  %v1906_v40 = vrot.slane %v1904_v19, 5  ;;  %v1911_v21 = vrot.slane %v1909_v26, 4 }
  0xce   : > { %4363 = vmatprep.mubr.msk.bf16.mxu1 %vm658_vm6, %v4701_v59  ;;  %4368 = vmatpush3.bf16.msra.mxu1 %v2019_v49  ;;  %v1914_v4 = vrot.slane %v1912_v43, 5  ;;  %v1926_v62 = vshll.u32 %v3952_v47, 16  ;;  %v1920_v2 = vrot.slane %v1918_v33, 5  ;;  %v1925_v3 = vrot.slane %v1923_v44, 4 }
  0xcf   : > { %v1901_v59 = vor.u32 %v1900_v42, %v1897_v37  ;;  %v1888_v48 = vrot.slane %v1887_v24, 4  ;;  %v1932_v51 = vshll.u32 %v4705_v54, 16  ;;  %v4142_v9 = vrot.slane %v4134_v25, 9  ;;  %v3958_v37 = vld [vmem:[#allocation2 + $0x38] sm:$0xf] }
  0xd0   : > { %v1915_v60 = vor.u32 %v1914_v4, %v1911_v21  ;;  %v1928_v6 = vrot.slane %v1926_v62, 5  ;;  %v3384_v14 = vrot.slane %v5493_v53, 5  ;;  %v4143_v35 = vrot.slane %v4135_v7, 9  ;;  %v3956_v53 = vld [vmem:[#allocation2 + $0x30] sm:$0xf] }
  0xd1   : > { %v1902_v49 = vrot.slane %v1901_v59, 4  ;;  %v1893_v29 = vsel %vm5061_vm10, %v1888_v48, %v1892_v36  ;;  %v1934_v12 = vrot.slane %v1932_v51, 5  ;;  %v3388_v38 = vrot.slane %v5495_v20, 5  ;;  %v4707_v59 = vld [vmem:[#allocation2 + $0x34] sm:$0x1] }
  0xd2   : > { %v1916_v15 = vrot.slane %v1915_v60, 4  ;;  %v1929_v22 = vor.u32 %v1928_v6, %v1925_v3  ;;  %v3385_v28 = vsel %vm5166_vm13, %v4142_v9, %v3384_v14  ;;  %v4144_v46 = vrot.slane %v4136_v52, 9  ;;  %v4708_v48 = vld [vmem:[#allocation2 + $0x3c] sm:$0x1]  ;;  %v4155_v51 = vld [vmem:[#allocation3 + $0x10] sm:$0xe] }
  0xd3   : > { %v1907_v30 = vsel %vm5061_vm10, %v1902_v49, %v1906_v40  ;;  %v3392_v32 = vrot.slane %v5503_v57, 5  ;;  %v3389_v23 = vsel %vm5166_vm13, %v4143_v35, %v3388_v38  ;;  %v4145_v20 = vrot.slane %v4137_v55, 9  ;;  %v3960_v40 = vld [vmem:[#allocation2 + $0x40] sm:$0xf]  ;;  %v4156_v52 = vld [vmem:[#allocation3 + $0x18] sm:$0xe] }
  0xd4   : > { %4450 = vmatmul.mubr.msk.bf16.vlgmr.msra.gmra.mrb[0].mxu0 %vm658_vm6, %v4148_v13  ;;  %v3963_v31 = vcombine.low %v1893_v29, %v1907_v30  ;;  %v1921_v36 = vsel %vm5061_vm10, %v1916_v15, %v1920_v2  ;;  %v1930_v45 = vrot.slane %v1929_v22, 4  ;;  %v4149_v47 = vcombine.low %v3385_v28, %v3389_v23  ;;  %v4709_v15 = vld [vmem:[#allocation2 + $0x44] sm:$0x1] }
  0xd5   : > { %4364 = vmatmul.mubr.msk.bf16.gmra.mrb[4].mxu1 %vm658_vm6, %v4702_v1  ;;  %4458 = vmatpush3.bf16.msra.mxu0 %v3583_v0  ;;  %v3393_v13 = vsel %vm5166_vm13, %v4144_v46, %v3392_v32  ;;  %v3396_v61 = vrot.slane %v5512_v34, 5  ;;  %v1937_v63 = vshrl.u32 %v3954_v50, 16  ;;  %v1940_v0 = vshll.u32 %v3954_v50, 16  ;;  %v4157_v50 = vld [vmem:[#allocation3 + $0x20] sm:$0xe] }
  0xd6   : > { %4369 = vmatprep.mubr.msk.bf16.mxu1 %vm658_vm6, %v3963_v31  ;;  %v1935_v57 = vsel %vm5061_vm10, %v1930_v45, %v1934_v12  ;;  %v1946_v19 = vshll.u32 %v4706_v5, 16  ;;  %v1951_v1 = vshrl.u32 %v3956_v53, 16  ;;  %4453 = vmatprep.mubr.msk.bf16.mxu0 %vm658_vm6, %v4149_v47  ;;  %v1954_v24 = vshll.u32 %v3956_v53, 16  ;;  %v4158_v53 = vld [vmem:[#allocation3 + $0x28] sm:$0xe] }
  0xd7   : > { %v3964_v42 = vcombine.low %v1921_v36, %v1935_v57  ;;  %v3397_v26 = vsel %vm5166_vm13, %v4145_v20, %v3396_v61  ;;  %v1939_v43 = vrot.slane %v1937_v63, 4  ;;  %v1942_v34 = vrot.slane %v1940_v0, 5  ;;  %v4159_v47 = vld [vmem:[#allocation3 + $0x30] sm:$0xe]  ;;  %v4160_v0 = vld [vmem:[#allocation3 + $0x38] sm:$0xe] }
  0xd8   : > { %v4150_v16 = vcombine.low %v3393_v13, %v3397_v26  ;;  %v1948_v33 = vrot.slane %v1946_v19, 5  ;;  %v1953_v44 = vrot.slane %v1951_v1, 4  ;;  %v1956_v25 = vrot.slane %v1954_v24, 5  ;;  %v4162_v24 = vld [vmem:[#allocation3 + $0x48] sm:$0xe] }
  0xd9   : > { %v1960_v21 = vshll.u32 %v4707_v59, 16  ;;  %v1965_v4 = vshrl.u32 %v3958_v37, 16  ;;  %v1968_v62 = vshll.u32 %v3958_v37, 16  ;;  %v1943_v7 = vor.u32 %v1942_v34, %v1939_v43  ;;  %v4161_v37 = vld [vmem:[#allocation3 + $0x40] sm:$0xe] }
  0xda   : > { %v1974_v2 = vshll.u32 %v4708_v48, 16  ;;  %v1979_v3 = vshrl.u32 %v3960_v40, 16  ;;  %v1982_v54 = vshll.u32 %v3960_v40, 16  ;;  %v1957_v49 = vor.u32 %v1956_v25, %v1953_v44 }
  0xdb   : > { %v1962_v60 = vrot.slane %v1960_v21, 5  ;;  %v1967_v6 = vrot.slane %v1965_v4, 4  ;;  %v1970_v9 = vrot.slane %v1968_v62, 5  ;;  %v1944_v29 = vrot.slane %v1943_v7, 4 }
  0xdc   : > { %4454 = vmatmul.mubr.msk.bf16.gmra.mrb[4].mxu0 %vm658_vm6, %v4150_v16  ;;  %v1976_v12 = vrot.slane %v1974_v2, 5  ;;  %v1981_v14 = vrot.slane %v1979_v3, 4  ;;  %v1984_v35 = vrot.slane %v1982_v54, 5  ;;  %v1958_v55 = vrot.slane %v1957_v49, 4  ;;  %v4180_v49 = vld [vmem:[%s5768_s4] ss:$0 sm:$0xff] }
  0xdd   : > { %4370 = vmatmul.mubr.msk.bf16.vlgmr.msra.gmra.mrb[0].mxu1 %vm658_vm6, %v3964_v42  ;;  %v1971_v30 = vor.u32 %v1970_v9, %v1967_v6  ;;  %v1988_v22 = vshll.u32 %v4709_v15, 16  ;;  %v4163_v38 = vrot.slane %v4155_v51, 9  ;;  %v1949_v31 = vsel %vm5061_vm10, %v1944_v29, %v1948_v33 }
  0xde   : > { %v1985_v28 = vor.u32 %v1984_v35, %v1981_v14  ;;  %v3526_v46 = vrot.slane %v5525_v39, 5  ;;  %v4164_v32 = vrot.slane %v4156_v52, 9  ;;  %v1963_v36 = vsel %vm5061_vm10, %v1958_v55, %v1962_v60 }
  0xdf   : > { %v1972_v45 = vrot.slane %v1971_v30, 4  ;;  %v1990_v23 = vrot.slane %v1988_v22, 5  ;;  %v3530_v20 = vrot.slane %v5528_v58, 5  ;;  %v3965_v13 = vcombine.low %v1949_v31, %v1963_v36 }
  0xe0   : > { %v1986_v61 = vrot.slane %v1985_v28, 4  ;;  %v3527_v63 = vsel %vm5166_vm13, %v4163_v38, %v3526_v46  ;;  %v4165_v57 = vrot.slane %v4157_v50, 9  ;;  %v3534_v19 = vrot.slane %v5544_v11, 5 }
  0xe1   : > { %v1977_v39 = vsel %vm5061_vm10, %v1972_v45, %v1976_v12  ;;  %v3531_v5 = vsel %vm5166_vm13, %v4164_v32, %v3530_v20  ;;  %v4166_v1 = vrot.slane %v4158_v53, 9  ;;  %4373 = vmatprep.mubr.msk.bf16.mxu1 %vm658_vm6, %v3965_v13  ;;  %v3538_v26 = vrot.slane %v5549_v17, 5 }
  0xe2   : > { %v1991_v58 = vsel %vm5061_vm10, %v1986_v61, %v1990_v23  ;;  %v4172_v42 = vcombine.low %v3527_v63, %v3531_v5  ;;  %v4167_v43 = vrot.slane %v4159_v47, 9  ;;  %v3535_v16 = vsel %vm5166_vm13, %v4165_v57, %v3534_v19 }
  0xe3   : > { %v3966_v40 = vcombine.low %v1977_v39, %v1991_v58  ;;  %v3542_v34 = vrot.slane %v5561_v41, 5  ;;  %v4168_v33 = vrot.slane %v4160_v0, 9  ;;  %v3539_v11 = vsel %vm5166_vm13, %v4166_v1, %v3538_v26 }
  0xe4   : > { %4459 = vmatprep.mubr.msk.bf16.mxu0 %vm658_vm6, %v4172_v42  ;;  %v3546_v18 = vrot.slane %v5563_v10, 5  ;;  %v4169_v44 = vrot.slane %v4161_v37, 9  ;;  %v3550_v25 = vrot.slane %v5568_v56, 5  ;;  %v4173_v17 = vcombine.low %v3535_v16, %v3539_v11 }
  0xe5   : > { %4374 = vmatmul.mubr.msk.bf16.gmra.mrb[4].mxu1 %vm658_vm6, %v3966_v40  ;;  %v3543_v59 = vsel %vm5166_vm13, %v4167_v43, %v3542_v34  ;;  %v4170_v21 = vrot.slane %v4162_v24, 9  ;;  %v3554_v41 = vrot.slane %v5574_v27, 5  ;;  %vm3696_vm15 = vcmask 130048  }
  0xe6   : > { %v3547_v4 = vsel %vm5166_vm13, %v4168_v33, %v3546_v18  ;;  %4460 = vmatmul.mubr.msk.bf16.vlgmr.msra.gmra.mrb[0].mxu0 %vm658_vm6, %v4173_v17  ;;  %v3551_v10 = vsel %vm5166_vm13, %v4169_v44, %v3550_v25 }
  0xe7   : > { %v4174_v62 = vcombine.low %v3543_v59, %v3547_v4  ;;  %v3555_v56 = vsel %vm5166_vm13, %v4170_v21, %v3554_v41 }
  0xe8   : > { %v4175_v7 = vcombine.low %v3551_v10, %v3555_v56 }
  0xe9   : > { %4463 = vmatprep.mubr.msk.bf16.mxu0 %vm658_vm6, %v4174_v62 }
  0xee   : > { %4464 = vmatmul.mubr.msk.bf16.gmra.mrb[4].mxu0 %vm658_vm6, %v4175_v7 }
 0x1b0   : > { %v4371_v48 = vpop.f32.mrb[0].mxu1 }
 0x1b1   : > { %v2055_v27 = vpop.f32.mrb[1].mxu1 }
 0x1b2   : > { %v4372_v2 = vpop.f32.mrb[2].mxu1 }
 0x1b3   : > { %v2058_v3 = vpop.f32.mrb[3].mxu1 }
 0x1b8   : > { %v4375_v54 = vpop.f32.mrb[4].mxu1 }
 0x1b9   : > { %v2071_v51 = vpop.f32.mrb[5].mxu1  ;;  %v4461_v60 = vpop.f32.mrb[0].mxu0 }
 0x1ba   : > { %v4376_v8 = vpop.f32.mrb[6].mxu1  ;;  %v4467_v6 = vadd.f32 %v4461_v60, %v4371_v48  ;;  %v3619_v9 = vpop.f32.mrb[1].mxu0 }
 0x1bb   : > { %v2074_v52 = vpop.f32.mrb[7].mxu1  ;;  %v4468_v29 = vadd.f32 %v3619_v9, %v2055_v27  ;;  %v4462_v12 = vpop.f32.mrb[2].mxu0 }
 0x1bc   : > { %v3666_v14 = vadd.f32 %v4467_v6, %v4180_v49  ;;  %v4469_v35 = vadd.f32 %v4462_v12, %v4372_v2  ;;  %v3622_v55 = vpop.f32.mrb[3].mxu0 }
 0x1bd   : > { %v3664_v30 = vadd.f32 %v4468_v29, %v4180_v49  ;;  %v4470_v15 = vadd.f32 %v3622_v55, %v2058_v3 }
 0x1be   : > { %vm3674_vm14 = vcmp.ge.f32.partialorder %v3666_v14, 0.0  ;;  %v3682_v22 = vmul.f32 0.01, %v3666_v14  ;;  %v3667_v38 = vadd.f32 %v4469_v35, %v4180_v49 }
 0x1bf   : > { %vm3672_vm0 = vcmp.ge.f32.partialorder %v3664_v30, 0.0  ;;  %v3680_v50 = vmul.f32 0.01, %v3664_v30  ;;  %v3665_v31 = vadd.f32 %v4470_v15, %v4180_v49 }
 0x1c0   : > { %v3690_v28 = vsel %vm3674_vm14, %v3666_v14, %v3682_v22  ;;  %vm3675_vm1 = vcmp.ge.f32.partialorder %v3667_v38, 0.0  ;;  %v3683_v46 = vmul.f32 0.01, %v3667_v38 }
 0x1c1   : > { %3699 = vst.msk [vmem:[%s5689_s11 + $0x10] sm:$0xff] %vm3696_vm15, %v3690_v28  ;;  %v3688_v32 = vsel %vm3672_vm0, %v3664_v30, %v3680_v50  ;;  %vm3673_vm2 = vcmp.ge.f32.partialorder %v3665_v31, 0.0  ;;  %v3681_v53 = vmul.f32 0.01, %v3665_v31  ;;  %v4465_v36 = vpop.f32.mrb[4].mxu0 }
 0x1c2   : > { %3697 = vst.msk [vmem:[%s5689_s11] sm:$0xff] %vm3696_vm15, %v3688_v32  ;;  %v3691_v45 = vsel %vm3675_vm1, %v3667_v38, %v3683_v46  ;;  %v4471_v23 = vadd.f32 %v4465_v36, %v4375_v54  ;;  %v3635_v20 = vpop.f32.mrb[5].mxu0 }
 0x1c3   : > { %3700 = vst.msk [vmem:[%s5689_s11 + $0x18] sm:$0xff] %vm3696_vm15, %v3691_v45  ;;  %v3689_v47 = vsel %vm3673_vm2, %v3665_v31, %v3681_v53  ;;  %v4472_v13 = vadd.f32 %v3635_v20, %v2071_v51  ;;  %v4466_v61 = vpop.f32.mrb[6].mxu0 }
 0x1c4   : > { %3698 = vst.msk [vmem:[%s5689_s11 + $0x8] sm:$0xff] %vm3696_vm15, %v3689_v47  ;;  %v3670_v63 = vadd.f32 %v4471_v23, %v4180_v49  ;;  %v4473_v57 = vadd.f32 %v4466_v61, %v4376_v8  ;;  %v3638_v0 = vpop.f32.mrb[7].mxu0 }
 0x1c5   : > { %v3668_v39 = vadd.f32 %v4472_v13, %v4180_v49  ;;  %v4474_v5 = vadd.f32 %v3638_v0, %v2074_v52 }
 0x1c6   : > { %vm3678_vm3 = vcmp.ge.f32.partialorder %v3670_v63, 0.0  ;;  %v3686_v19 = vmul.f32 0.01, %v3670_v63  ;;  %v3671_v1 = vadd.f32 %v4473_v57, %v4180_v49 }
 0x1c7   : > { %vm3676_vm4 = vcmp.ge.f32.partialorder %v3668_v39, 0.0  ;;  %v3684_v37 = vmul.f32 0.01, %v3668_v39  ;;  %v3669_v58 = vadd.f32 %v4474_v5, %v4180_v49 }
 0x1c8   : > { %v3694_v42 = vsel %vm3678_vm3, %v3670_v63, %v3686_v19  ;;  %vm3679_vm5 = vcmp.ge.f32.partialorder %v3671_v1, 0.0  ;;  %v3687_v26 = vmul.f32 0.01, %v3671_v1 }
 0x1c9   : > { %3703 = vst.msk [vmem:[%s5689_s11 + $0x30] sm:$0xff] %vm3696_vm15, %v3694_v42  ;;  %v3692_v43 = vsel %vm3676_vm4, %v3668_v39, %v3684_v37  ;;  %vm3677_vm6 = vcmp.ge.f32.partialorder %v3669_v58, 0.0  ;;  %v3685_v24 = vmul.f32 0.01, %v3669_v58 }
 0x1ca   : > { %3701 = vst.msk [vmem:[%s5689_s11 + $0x20] sm:$0xff] %vm3696_vm15, %v3692_v43  ;;  %v3695_v40 = vsel %vm3679_vm5, %v3671_v1, %v3687_v26 }
 0x1cb   : > { %3704 = vst.msk [vmem:[%s5689_s11 + $0x38] sm:$0xff] %vm3696_vm15, %v3695_v40  ;;  %v3693_v16 = vsel %vm3677_vm6, %v3669_v58, %v3685_v24 }
 0x1cc   : > { %3702 = vst.msk [vmem:[%s5689_s11 + $0x28] sm:$0xff] %vm3696_vm15, %v3693_v16 }
 0x1cd   : > { %4723 = shalt.err (!%p4720_p5)
}
 0x1ce   : > { %s4724_s29 = scalar_lea.hbm %s5706_s21, 1024  ;;  %s4728_s9 = scalar_lea.hbm %s5769_s5, 2048 }
 0x1cf   : > { %p4725_p6 = scmp.ne.s32.totalorder %s5706_s21, %s4724_s29  ;;  %p4729_p10 = scmp.lt.u32.totalorder %s5706_s21, %s5769_s5 }
 0x1d0   : > { %p4730_p11 = scmp.lt.u32.totalorder %s4728_s9, %s4724_s29  ;;  %p4732_p13 = scmp.lt.u32.totalorder %s4724_s29, %s5706_s21 }
 0x1d1   : > { %p4726_p7 = pnand %p4725_p6, %p4864_p4 }
 0x1d2   : > { %p4731_p12 = por %p4730_p11, %p4729_p10 }
 0x1d3   : > { %p4727_p9 = pneg %p4726_p7 }
 0x1d4   : > { %p4733_p0 = por %p4732_p13, %p4731_p12 }
 0x1d6   : > { %p4734_p1 = pnand %p4733_p0, %p4727_p9 }
 0x1d8   : > { %4737 = shalt.err (!%p4734_p1)
}
 0x1d9   : > { %s4792_s12 = smov 128   ;;  %s4793_s14 = smov 8  }
 0x1da   : > { %4621 = dma.vmem_to_hbm [thread:$0]  (%p4864_p4), %s5708_s13, 1024, %s5706_s21, %s5718_s16, %s4792_s12, %s4792_s12, %s4793_s14  }
 0x1db PF: > { %p4627_p2 = scmp.ge.s32.totalorder %s4788_s23, 2  ;;  %s3736_s15 = sand.u32 1, %s4768_s18  }
 0x1dc   : > { %s3737_s17 = scalar_lea.sflag [#allocation5], %s3736_s15 }
 0x1dd   : > { %p4624_p3 = pnand %p4627_p2, %p4871_p8 }
 0x1df   : > { %4763 = dma.done.wait (!%p4624_p3), %s3737_s17, 1024  }
 0x1e0   : > { %4765 = vsyncadd (!%p4624_p3), %s3737_s17, 4294966272  ;;  %s18_s23 = sadd.s32 1, %s4788_s23   ;;  %s5780_s18 = smov %s4772_s19 }
 0x1e1   : > { %p15_p5 = scmp.ge.s32.totalorder %s18_s23, 4   ;;  %s5781_s19 = smov %s4776_s20 }
 0x1e2   : > { %s5782_s20 = smov %s4877_s6  ;;  %s5783_s21 = smov %s4784_s22 }
 0x1e3   : > { %s5784_s22 = smov %s5786_s26  ;;  %17 = sbr.rel (!%p15_p5) target bundleno = 4 (0x4), region = 102 }
 0x1ea   :  { %3742 = vsyncpa [#allocation5], 1 }
 0x1eb   :  { %3744 = vsyncpa [#allocation5 + $0x1], 1 }

</bundles_post_ra>
